<compile_context>
chip_gen: v6e
topology: v6e:2x2x1
jax: 0.10.0
libtpu: 0.0.40
codegen_flags: <defaults>
</compile_context>

<pallas_src>
import jax
import jax.numpy as jnp
from jax.experimental import pallas as pl
from jax.experimental.pallas import tpu as pltpu


def _round_up(n, m):
    return (n + m - 1) // m * m


# --------------------------------------------------------------------------
# Kernel
# --------------------------------------------------------------------------
def _mlp_bel_sml_kernel(alphas_ref, x_ref,
                        w1, b1, w2, b2, w3, b3, w4, b4,
                        wh, bh,
                        out_ref):
    """One batch row-tile, fully in VMEM.

    Weights/activations are bf16 on the MXU; accumulation, bias-add and PReLU
    are f32.  alphas_ref is a (4,) f32 SMEM array (one scalar per PReLU).
    Dropout layers are identity (inference semantics).  The two head linears
    are pre-folded, so the tail is one lane-dense matmul + bias.
    """

    def trunk_layer(h, w_ref, b_ref, k):
        y = jnp.dot(h, w_ref[...], preferred_element_type=jnp.float32) + b_ref[...]
        a = alphas_ref[k]                      # scalar PReLU slope from SMEM
        y = jnp.where(y > 0, y, a * y)
        return y.astype(jnp.bfloat16)

    h = x_ref[...]                             # (tile_b, in_pad) bf16
    h = trunk_layer(h, w1, b1, 0)              # Linear(in,1280) + PReLU
    h = trunk_layer(h, w2, b2, 1)              # Linear(1280,512) + PReLU
    h = trunk_layer(h, w3, b3, 2)              # Linear(512,256) + PReLU
    h = trunk_layer(h, w4, b4, 3)              # Linear(256,32->128pad) + PReLU

    # All per-joint heads, both linears folded into one matmul (exact fusion).
    out_ref[...] = (jnp.dot(h, wh[...], preferred_element_type=jnp.float32)
                    + bh[...])                 # lane-dense full-block store


# --------------------------------------------------------------------------
# Parameter preparation (done once, outside the kernel)
# --------------------------------------------------------------------------
def prepare_kernel_params(params):
    """Cast to bf16, stack PReLU alphas, pad narrow dims, fold the head."""
    (w1, b1, a1, w2, b2, a2, w3, b3, a3, w4, b4, a4,
     hw1, hb1, hw2, hb2) = params

    in_dim = w1.shape[0]
    in_pad = _round_up(in_dim, 128)
    J, k32, h1 = hw1.shape                     # (J, 32, 20)
    nb = hw2.shape[2]
    out_dim = J * nb
    out_pad = _round_up(max(out_dim, 128), 128)

    alphas = jnp.concatenate([a.reshape(1) for a in (a1, a2, a3, a4)]
                             ).astype(jnp.float32)

    # Layer 1: zero-pad the contraction (input) dim to 128 lanes — exact,
    # since the matching x columns are zero-padded in the wrapper.
    w1p = jnp.zeros((in_pad, w1.shape[1]), jnp.float32).at[:in_dim].set(w1)

    # Layer 4: zero-pad the output 32 -> 128 lanes.  PReLU(0) = 0, so the
    # padded columns are exactly zero and the fold below is exact.
    h4 = w4.shape[1]                           # 32
    h4_pad = _round_up(h4, 128)                # 128
    w4p = jnp.zeros((w4.shape[0], h4_pad), jnp.float32).at[:, :h4].set(w4)
    b4p = jnp.zeros((1, h4_pad), jnp.float32).at[:, :h4].set(b4)

    # Fold the two per-joint head linears (no nonlinearity between them):
    #   y_j = (h @ hw1[j] + hb1[j]) @ hw2[j] + hb2[j]
    #       = h @ (hw1[j] @ hw2[j]) + (hb1[j] @ hw2[j] + hb2[j])
    wh_blocks = [hw1[j] @ hw2[j] for j in range(J)]                     # (32, nb)
    bh_blocks = [hb1[j].reshape(1, h1) @ hw2[j] + hb2[j].reshape(1, nb)
                 for j in range(J)]                                     # (1, nb)
    wh = jnp.concatenate(wh_blocks, axis=1)    # (32, out_dim)
    bh = jnp.concatenate(bh_blocks, axis=1)    # (1, out_dim)

    whp = jnp.zeros((h4_pad, out_pad), jnp.float32).at[:h4, :out_dim].set(wh)
    bhp = jnp.zeros((1, out_pad), jnp.float32).at[:, :out_dim].set(bh)

    bf16 = jnp.bfloat16
    return dict(
        alphas=alphas,
        w1=w1p.astype(bf16), b1=b1.astype(jnp.float32),
        w2=w2.astype(bf16), b2=b2.astype(jnp.float32),
        w3=w3.astype(bf16), b3=b3.astype(jnp.float32),
        w4=w4p.astype(bf16), b4=b4p.astype(jnp.float32),
        wh=whp.astype(bf16), bh=bhp.astype(jnp.float32),
        in_dim=in_dim, in_pad=in_pad, out_dim=out_dim, out_pad=out_pad,
    )


# --------------------------------------------------------------------------
# Wrapper
# --------------------------------------------------------------------------
def mlp_bel_sml_forward(x, kparams, *, tile_b=None):
    """Handles x.dim()==1, pads batch/features, calls pallas_call."""
    if x.ndim == 1:
        x = x[None, :]                         # PyTorch keeps the batch dim.
    batch, in_dim = x.shape
    assert in_dim == kparams["in_dim"]
    in_pad = kparams["in_pad"]
    out_dim = kparams["out_dim"]
    out_pad = kparams["out_pad"]

    b_aligned = max(16, _round_up(batch, 16))  # bf16 sublane-friendly rows
    if tile_b is None:
        # Small batches: a single grid step (no per-step overhead, weights
        # DMA'd exactly once).  Large batches: 256-row tiles across the grid.
        tile_b = b_aligned if b_aligned <= 512 else 256
    tile_b = min(max(16, _round_up(tile_b, 16)), 512)
    b_pad = _round_up(b_aligned, tile_b)
    n_tiles = b_pad // tile_b

    x_p = jnp.zeros((b_pad, in_pad), jnp.bfloat16)
    x_p = x_p.at[:batch, :in_dim].set(x.astype(jnp.bfloat16))

    weight_names = ["w1", "b1", "w2", "b2", "w3", "b3", "w4", "b4", "wh", "bh"]
    weights = [kparams[n] for n in weight_names]

    def const_spec(arr):
        # Full-array block, constant index map -> stays VMEM-resident across
        # batch tiles (no re-DMA when the block index is unchanged).
        return pl.BlockSpec(arr.shape, lambda i: (0, 0))

    in_specs = ([pl.BlockSpec(memory_space=pltpu.MemorySpace.SMEM),     # alphas
                 pl.BlockSpec((tile_b, in_pad), lambda i: (i, 0))]      # x
                + [const_spec(w) for w in weights])
    out_specs = pl.BlockSpec((tile_b, out_pad), lambda i: (i, 0))

    # Only shard the batch axis across TensorCores (v7x megacore) when there
    # is enough per-core work to amortize the duplicated weight DMA.
    semantics = ("parallel",) if (n_tiles > 1 and b_pad >= 512) else ("arbitrary",)

    # VMEM budget from actual buffer sizes: double-buffered weights +
    # double-buffered x/out tiles + f32 layer-1 intermediate, plus slack.
    weight_bytes = sum(int(w.size) * w.dtype.itemsize for w in weights)
    act_bytes = 2 * tile_b * (in_pad * 2 + out_pad * 4)
    inter_bytes = 2 * tile_b * 1280 * 4
    vmem_bytes = min(2 * weight_bytes + act_bytes + inter_bytes + (8 << 20),
                     40 << 20)

    out = pl.pallas_call(
        _mlp_bel_sml_kernel,
        out_shape=jax.ShapeDtypeStruct((b_pad, out_pad), jnp.float32),
        grid=(n_tiles,),
        in_specs=in_specs,
        out_specs=out_specs,
        compiler_params=pltpu.CompilerParams(
            dimension_semantics=semantics,
            vmem_limit_bytes=int(vmem_bytes),
        ),
    )(kparams["alphas"], x_p, *weights)

    return out[:batch, :out_dim]


# --------------------------------------------------------------------------
# Init + reference
# --------------------------------------------------------------------------
def init_params(key, input_size, output_size, num_bits=40):
    """PyTorch-Linear-style init: U(-1/sqrt(fan_in), 1/sqrt(fan_in)), f32."""
    def linear(key, fan_in, fan_out):
        kw, kb = jax.random.split(key)
        bound = 1.0 / jnp.sqrt(float(fan_in))
        w = jax.random.uniform(kw, (fan_in, fan_out), jnp.float32, -bound, bound)
        b = jax.random.uniform(kb, (1, fan_out), jnp.float32, -bound, bound)
        return w, b

    keys = jax.random.split(key, 6)
    w1, b1 = linear(keys[0], input_size, 1280)
    w2, b2 = linear(keys[1], 1280, 512)
    w3, b3 = linear(keys[2], 512, 256)
    w4, b4 = linear(keys[3], 256, 32)
    a1 = jnp.full((1, 1), 0.25, jnp.float32)
    a2 = jnp.full((1, 1), 0.25, jnp.float32)
    a3 = jnp.full((1, 1), 0.25, jnp.float32)
    a4 = jnp.full((1, 1), 0.25, jnp.float32)

    hkeys1 = jax.random.split(keys[4], output_size)
    hkeys2 = jax.random.split(keys[5], output_size)
    heads1 = [linear(hkeys1[j], 32, 20) for j in range(output_size)]
    heads2 = [linear(hkeys2[j], 20, num_bits) for j in range(output_size)]
    hw1 = jnp.stack([p[0] for p in heads1])
    hb1 = jnp.stack([p[1] for p in heads1])
    hw2 = jnp.stack([p[0] for p in heads2])
    hb2 = jnp.stack([p[1] for p in heads2])

    return (w1, b1, a1, w2, b2, a2, w3, b3, a3, w4, b4, a4, hw1, hb1, hw2, hb2)


def reference_forward(x, params):
    """Pure-f32 reference mirroring the PyTorch module (eval mode) exactly,
    including the original per-joint head loop (checks the offline fold)."""
    (w1, b1, a1, w2, b2, a2, w3, b3, a3, w4, b4, a4,
     hw1, hb1, hw2, hb2) = params
    if x.ndim == 1:
        x = x[None, :]

    def layer(h, w, b, a):
        y = h @ w + b
        return jnp.where(y > 0, y, a.reshape(()) * y)

    h = layer(x, w1, b1, a1)
    h = layer(h, w2, b2, a2)
    h = layer(h, w3, b3, a3)
    h = layer(h, w4, b4, a4)
    outs = []
    for j in range(hw1.shape[0]):
        t = h @ hw1[j] + hb1[j]
        t = t @ hw2[j] + hb2[j]
        outs.append(t)
    return jnp.concatenate(outs, axis=1)


# --------------------------------------------------------------------------
# Self-test
# --------------------------------------------------------------------------
if __name__ == "__main__":
    INPUT_SIZE = 64
    OUTPUT_SIZE = 4        # num_joints
    NUM_BITS = 40
    BATCH = 40             # padded to 48 rows -> a single grid step

    key = jax.random.PRNGKey(0)
    kx, kp = jax.random.split(key)
    x = jax.random.normal(kx, (BATCH, INPUT_SIZE), jnp.float32)
    params = init_params(kp, INPUT_SIZE, OUTPUT_SIZE, NUM_BITS)
    kparams = prepare_kernel_params(params)

    out = mlp_bel_sml_forward(x, kparams)      # default tiling: grid=(1,)
    out = jax.block_until_ready(out)

    ref = reference_forward(x, params)
    assert out.shape == (BATCH, OUTPUT_SIZE * NUM_BITS), out.shape
    max_err = float(jnp.max(jnp.abs(out - ref)))
    assert jnp.allclose(out, ref, atol=1e-2, rtol=1e-2), (
        "mismatch vs f32 reference: max abs err = %e" % max_err)

    # Also exercise the 1-D-input path (PyTorch unsqueeze semantics).
    out1 = jax.block_until_ready(mlp_bel_sml_forward(x[0], kparams))
    assert out1.shape == (1, OUTPUT_SIZE * NUM_BITS)
    assert jnp.allclose(out1, ref[:1], atol=1e-2, rtol=1e-2)

    # And the multi-tile path (explicit small tile => 3 grid steps).
    out_t = jax.block_until_ready(mlp_bel_sml_forward(x, kparams, tile_b=16))
    assert jnp.allclose(out_t, ref, atol=1e-2, rtol=1e-2)

    print("KERNEL_OK")
</pallas_src>

<mosaic_0001>
module attributes {stable_mosaic.version = 11 : i64} {
  func.func @_mlp_bel_sml_kernel(%arg0: i32, %arg1: memref<4xf32, #tpu.memory_space<smem>>, %arg2: memref<48x128xbf16, #tpu.memory_space<vmem>>, %arg3: memref<128x1280xbf16, #tpu.memory_space<vmem>>, %arg4: memref<1x1280xf32, #tpu.memory_space<vmem>>, %arg5: memref<1280x512xbf16, #tpu.memory_space<vmem>>, %arg6: memref<1x512xf32, #tpu.memory_space<vmem>>, %arg7: memref<512x256xbf16, #tpu.memory_space<vmem>>, %arg8: memref<1x256xf32, #tpu.memory_space<vmem>>, %arg9: memref<256x128xbf16, #tpu.memory_space<vmem>>, %arg10: memref<1x128xf32, #tpu.memory_space<vmem>>, %arg11: memref<128x256xbf16, #tpu.memory_space<vmem>>, %arg12: memref<1x256xf32, #tpu.memory_space<vmem>>, %arg13: memref<48x256xf32, #tpu.memory_space<vmem>>) attributes {dimension_semantics = [#tpu.dimension_semantics<arbitrary>], iteration_bounds = array<i64: 1>, scalar_prefetch = 0 : i64, scratch_operands = 0 : i64, tpu.core_type = #tpu.core_type<tc>, window_params = [{transform_indices = @transform_0, window_bounds = array<i64: 4>}, {transform_indices = @transform_1, window_bounds = array<i64: 48, 128>}, {pipeline_mode = #tpu.pipeline_mode<synchronous>, transform_indices = @transform_2, window_bounds = array<i64: 128, 1280>}, {pipeline_mode = #tpu.pipeline_mode<synchronous>, transform_indices = @transform_3, window_bounds = array<i64: 1, 1280>}, {pipeline_mode = #tpu.pipeline_mode<synchronous>, transform_indices = @transform_4, window_bounds = array<i64: 1280, 512>}, {pipeline_mode = #tpu.pipeline_mode<synchronous>, transform_indices = @transform_5, window_bounds = array<i64: 1, 512>}, {pipeline_mode = #tpu.pipeline_mode<synchronous>, transform_indices = @transform_6, window_bounds = array<i64: 512, 256>}, {pipeline_mode = #tpu.pipeline_mode<synchronous>, transform_indices = @transform_7, window_bounds = array<i64: 1, 256>}, {pipeline_mode = #tpu.pipeline_mode<synchronous>, transform_indices = @transform_8, window_bounds = array<i64: 256, 128>}, {pipeline_mode = #tpu.pipeline_mode<synchronous>, transform_indices = @transform_9, window_bounds = array<i64: 1, 128>}, {pipeline_mode = #tpu.pipeline_mode<synchronous>, transform_indices = @transform_10, window_bounds = array<i64: 128, 256>}, {pipeline_mode = #tpu.pipeline_mode<synchronous>, transform_indices = @transform_11, window_bounds = array<i64: 1, 256>}, {transform_indices = @transform_12, window_bounds = array<i64: 48, 256>}]} {
    %c0 = arith.constant 0 : index
    %c0_0 = arith.constant 0 : index
    %0 = vector.load %arg2[%c0, %c0_0] : memref<48x128xbf16, #tpu.memory_space<vmem>>, vector<48x128xbf16>
    %c0_1 = arith.constant 0 : index
    %c0_2 = arith.constant 0 : index
    %1 = vector.load %arg3[%c0_1, %c0_2] : memref<128x1280xbf16, #tpu.memory_space<vmem>>, vector<128x1280xbf16>
    %cst = arith.constant dense<0.000000e+00> : vector<48x1280xf32>
    %2 = tpu.matmul %0, %1, %cst {dimension_numbers = #tpu.dot_dimension_numbers<[1], [0], [0], [1], [0, 0, 1, 1], [], []>} : vector<48x128xbf16>, vector<128x1280xbf16>, vector<48x1280xf32> -> vector<48x1280xf32>
    %c0_3 = arith.constant 0 : index
    %c0_4 = arith.constant 0 : index
    %3 = vector.load %arg4[%c0_3, %c0_4] : memref<1x1280xf32, #tpu.memory_space<vmem>>, vector<1x1280xf32>
    %4 = vector.broadcast %3 : vector<1x1280xf32> to vector<48x1280xf32>
    %5 = arith.addf %2, %4 : vector<48x1280xf32>
    %c0_5 = arith.constant 0 : index
    %6 = memref.load %arg1[%c0_5] : memref<4xf32, #tpu.memory_space<smem>>
    %cst_6 = arith.constant 0.000000e+00 : f32
    %7 = vector.broadcast %cst_6 : f32 to vector<48x1280xf32>
    %8 = arith.cmpf ogt, %5, %7 : vector<48x1280xf32>
    %9 = vector.broadcast %6 : f32 to vector<48x1280xf32>
    %10 = arith.mulf %9, %5 : vector<48x1280xf32>
    %11 = arith.select %8, %5, %10 : vector<48x1280xi1>, vector<48x1280xf32>
    %12 = arith.truncf %11 : vector<48x1280xf32> to vector<48x1280xbf16>
    %c0_7 = arith.constant 0 : index
    %c0_8 = arith.constant 0 : index
    %13 = vector.load %arg5[%c0_7, %c0_8] : memref<1280x512xbf16, #tpu.memory_space<vmem>>, vector<1280x512xbf16>
    %cst_9 = arith.constant dense<0.000000e+00> : vector<48x512xf32>
    %14 = tpu.matmul %12, %13, %cst_9 {dimension_numbers = #tpu.dot_dimension_numbers<[1], [0], [0], [1], [0, 0, 1, 1], [], []>} : vector<48x1280xbf16>, vector<1280x512xbf16>, vector<48x512xf32> -> vector<48x512xf32>
    %c0_10 = arith.constant 0 : index
    %c0_11 = arith.constant 0 : index
    %15 = vector.load %arg6[%c0_10, %c0_11] : memref<1x512xf32, #tpu.memory_space<vmem>>, vector<1x512xf32>
    %16 = vector.broadcast %15 : vector<1x512xf32> to vector<48x512xf32>
    %17 = arith.addf %14, %16 : vector<48x512xf32>
    %c1 = arith.constant 1 : index
    %18 = memref.load %arg1[%c1] : memref<4xf32, #tpu.memory_space<smem>>
    %cst_12 = arith.constant 0.000000e+00 : f32
    %19 = vector.broadcast %cst_12 : f32 to vector<48x512xf32>
    %20 = arith.cmpf ogt, %17, %19 : vector<48x512xf32>
    %21 = vector.broadcast %18 : f32 to vector<48x512xf32>
    %22 = arith.mulf %21, %17 : vector<48x512xf32>
    %23 = arith.select %20, %17, %22 : vector<48x512xi1>, vector<48x512xf32>
    %24 = arith.truncf %23 : vector<48x512xf32> to vector<48x512xbf16>
    %c0_13 = arith.constant 0 : index
    %c0_14 = arith.constant 0 : index
    %25 = vector.load %arg7[%c0_13, %c0_14] : memref<512x256xbf16, #tpu.memory_space<vmem>>, vector<512x256xbf16>
    %cst_15 = arith.constant dense<0.000000e+00> : vector<48x256xf32>
    %26 = tpu.matmul %24, %25, %cst_15 {dimension_numbers = #tpu.dot_dimension_numbers<[1], [0], [0], [1], [0, 0, 1, 1], [], []>} : vector<48x512xbf16>, vector<512x256xbf16>, vector<48x256xf32> -> vector<48x256xf32>
    %c0_16 = arith.constant 0 : index
    %c0_17 = arith.constant 0 : index
    %27 = vector.load %arg8[%c0_16, %c0_17] : memref<1x256xf32, #tpu.memory_space<vmem>>, vector<1x256xf32>
    %28 = vector.broadcast %27 : vector<1x256xf32> to vector<48x256xf32>
    %29 = arith.addf %26, %28 : vector<48x256xf32>
    %c2 = arith.constant 2 : index
    %30 = memref.load %arg1[%c2] : memref<4xf32, #tpu.memory_space<smem>>
    %cst_18 = arith.constant 0.000000e+00 : f32
    %31 = vector.broadcast %cst_18 : f32 to vector<48x256xf32>
    %32 = arith.cmpf ogt, %29, %31 : vector<48x256xf32>
    %33 = vector.broadcast %30 : f32 to vector<48x256xf32>
    %34 = arith.mulf %33, %29 : vector<48x256xf32>
    %35 = arith.select %32, %29, %34 : vector<48x256xi1>, vector<48x256xf32>
    %36 = arith.truncf %35 : vector<48x256xf32> to vector<48x256xbf16>
    %c0_19 = arith.constant 0 : index
    %c0_20 = arith.constant 0 : index
    %37 = vector.load %arg9[%c0_19, %c0_20] : memref<256x128xbf16, #tpu.memory_space<vmem>>, vector<256x128xbf16>
    %cst_21 = arith.constant dense<0.000000e+00> : vector<48x128xf32>
    %38 = tpu.matmul %36, %37, %cst_21 {dimension_numbers = #tpu.dot_dimension_numbers<[1], [0], [0], [1], [0, 0, 1, 1], [], []>} : vector<48x256xbf16>, vector<256x128xbf16>, vector<48x128xf32> -> vector<48x128xf32>
    %c0_22 = arith.constant 0 : index
    %c0_23 = arith.constant 0 : index
    %39 = vector.load %arg10[%c0_22, %c0_23] : memref<1x128xf32, #tpu.memory_space<vmem>>, vector<1x128xf32>
    %40 = vector.broadcast %39 : vector<1x128xf32> to vector<48x128xf32>
    %41 = arith.addf %38, %40 : vector<48x128xf32>
    %c3 = arith.constant 3 : index
    %42 = memref.load %arg1[%c3] : memref<4xf32, #tpu.memory_space<smem>>
    %cst_24 = arith.constant 0.000000e+00 : f32
    %43 = vector.broadcast %cst_24 : f32 to vector<48x128xf32>
    %44 = arith.cmpf ogt, %41, %43 : vector<48x128xf32>
    %45 = vector.broadcast %42 : f32 to vector<48x128xf32>
    %46 = arith.mulf %45, %41 : vector<48x128xf32>
    %47 = arith.select %44, %41, %46 : vector<48x128xi1>, vector<48x128xf32>
    %48 = arith.truncf %47 : vector<48x128xf32> to vector<48x128xbf16>
    %c0_25 = arith.constant 0 : index
    %c0_26 = arith.constant 0 : index
    %49 = vector.load %arg11[%c0_25, %c0_26] : memref<128x256xbf16, #tpu.memory_space<vmem>>, vector<128x256xbf16>
    %cst_27 = arith.constant dense<0.000000e+00> : vector<48x256xf32>
    %50 = tpu.matmul %48, %49, %cst_27 {dimension_numbers = #tpu.dot_dimension_numbers<[1], [0], [0], [1], [0, 0, 1, 1], [], []>} : vector<48x128xbf16>, vector<128x256xbf16>, vector<48x256xf32> -> vector<48x256xf32>
    %c0_28 = arith.constant 0 : index
    %c0_29 = arith.constant 0 : index
    %51 = vector.load %arg12[%c0_28, %c0_29] : memref<1x256xf32, #tpu.memory_space<vmem>>, vector<1x256xf32>
    %52 = vector.broadcast %51 : vector<1x256xf32> to vector<48x256xf32>
    %53 = arith.addf %50, %52 : vector<48x256xf32>
    %c0_30 = arith.constant 0 : index
    %c0_31 = arith.constant 0 : index
    %54 = vector.load %arg13[%c0_30, %c0_31] : memref<48x256xf32, #tpu.memory_space<vmem>>, vector<48x256xf32>
    tpu.vector_store %arg13[%c0_30, %c0_31], %53 {strides = array<i32>} : memref<48x256xf32, #tpu.memory_space<vmem>>, vector<48x256xf32>,
    return
  }
  func.func @transform_0(%arg0: i32) -> i32 {
    %c0_i32 = arith.constant 0 : i32
    %c0_i32_0 = arith.constant 0 : i32
    return %c0_i32 : i32
  }
  func.func @transform_1(%arg0: i32) -> (i32, i32) {
    %c0_i32 = arith.constant 0 : i32
    %c0_i32_0 = arith.constant 0 : i32
    return %arg0, %c0_i32 : i32, i32
  }
  func.func @transform_2(%arg0: i32) -> (i32, i32) {
    %c0_i32 = arith.constant 0 : i32
    %c0_i32_0 = arith.constant 0 : i32
    %c0_i32_1 = arith.constant 0 : i32
    return %c0_i32, %c0_i32_0 : i32, i32
  }
  func.func @transform_3(%arg0: i32) -> (i32, i32) {
    %c0_i32 = arith.constant 0 : i32
    %c0_i32_0 = arith.constant 0 : i32
    %c0_i32_1 = arith.constant 0 : i32
    return %c0_i32, %c0_i32_0 : i32, i32
  }
  func.func @transform_4(%arg0: i32) -> (i32, i32) {
    %c0_i32 = arith.constant 0 : i32
    %c0_i32_0 = arith.constant 0 : i32
    %c0_i32_1 = arith.constant 0 : i32
    return %c0_i32, %c0_i32_0 : i32, i32
  }
  func.func @transform_5(%arg0: i32) -> (i32, i32) {
    %c0_i32 = arith.constant 0 : i32
    %c0_i32_0 = arith.constant 0 : i32
    %c0_i32_1 = arith.constant 0 : i32
    return %c0_i32, %c0_i32_0 : i32, i32
  }
  func.func @transform_6(%arg0: i32) -> (i32, i32) {
    %c0_i32 = arith.constant 0 : i32
    %c0_i32_0 = arith.constant 0 : i32
    %c0_i32_1 = arith.constant 0 : i32
    return %c0_i32, %c0_i32_0 : i32, i32
  }
  func.func @transform_7(%arg0: i32) -> (i32, i32) {
    %c0_i32 = arith.constant 0 : i32
    %c0_i32_0 = arith.constant 0 : i32
    %c0_i32_1 = arith.constant 0 : i32
    return %c0_i32, %c0_i32_0 : i32, i32
  }
  func.func @transform_8(%arg0: i32) -> (i32, i32) {
    %c0_i32 = arith.constant 0 : i32
    %c0_i32_0 = arith.constant 0 : i32
    %c0_i32_1 = arith.constant 0 : i32
    return %c0_i32, %c0_i32_0 : i32, i32
  }
  func.func @transform_9(%arg0: i32) -> (i32, i32) {
    %c0_i32 = arith.constant 0 : i32
    %c0_i32_0 = arith.constant 0 : i32
    %c0_i32_1 = arith.constant 0 : i32
    return %c0_i32, %c0_i32_0 : i32, i32
  }
  func.func @transform_10(%arg0: i32) -> (i32, i32) {
    %c0_i32 = arith.constant 0 : i32
    %c0_i32_0 = arith.constant 0 : i32
    %c0_i32_1 = arith.constant 0 : i32
    return %c0_i32, %c0_i32_0 : i32, i32
  }
  func.func @transform_11(%arg0: i32) -> (i32, i32) {
    %c0_i32 = arith.constant 0 : i32
    %c0_i32_0 = arith.constant 0 : i32
    %c0_i32_1 = arith.constant 0 : i32
    return %c0_i32, %c0_i32_0 : i32, i32
  }
  func.func @transform_12(%arg0: i32) -> (i32, i32) {
    %c0_i32 = arith.constant 0 : i32
    %c0_i32_0 = arith.constant 0 : i32
    return %arg0, %c0_i32 : i32, i32
  }
}

</mosaic_0001>

<bundles_post_ra>
// kernel: tpu_custom_call.1
= control target key start
LH: loop header
LB: loop body
LE: loop exit
PB: predicated region body
PF: predicated region fallthrough
CT: control target
= control target key end

     0   :  { %17 = vsyncpa [#allocation5], 0  ;;  %s7476_s0 = inlined_call_operand.hbm [shape: f32[4], index: 0, kind: input, shape index: {}]   ;;  %s7477_s1 = inlined_call_operand.hbm [shape: bf16[48,128], index: 1, kind: input, shape index: {}]   ;;  %s7478_s2 = inlined_call_operand.hbm [shape: bf16[128,1280], index: 2, kind: input, shape index: {}]   ;;  %s7479_s3 = inlined_call_operand.hbm [shape: f32[1,1280], index: 3, kind: input, shape index: {}]   ;;  %s7480_s4 = inlined_call_operand.hbm [shape: bf16[1280,512], index: 4, kind: input, shape index: {}]   ;;  %s7481_s5 = inlined_call_operand.hbm [shape: f32[1,512], index: 5, kind: input, shape index: {}]   ;;  %s7482_s6 = inlined_call_operand.hbm [shape: bf16[512,256], index: 6, kind: input, shape index: {}]   ;;  %s7483_s7 = inlined_call_operand.hbm [shape: f32[1,256], index: 7, kind: input, shape index: {}]   ;;  %s7484_s8 = inlined_call_operand.hbm [shape: bf16[256,128], index: 8, kind: input, shape index: {}]   ;;  %s7485_s9 = inlined_call_operand.hbm [shape: f32[1,128], index: 9, kind: input, shape index: {}]   ;;  %s7486_s10 = inlined_call_operand.hbm [shape: bf16[128,256], index: 10, kind: input, shape index: {}]   ;;  %s7487_s11 = inlined_call_operand.hbm [shape: f32[1,256], index: 11, kind: input, shape index: {}]   ;;  %s7488_s12 = inlined_call_operand.hbm [shape: f32[48,256], index: 12, kind: output, shape index: {}]  }
   0x1   :  { %18 = vsyncpa [#allocation3], 0 }
   0x2   :  { %19 = vsyncpa [#allocation8], 0 }
   0x3   :  { %20 = vsyncpa [#allocation11], 0 }
   0x4   :  { %21 = vsyncpa [#allocation14], 0 }
   0x5   :  { %22 = vsyncpa [#allocation17], 0 }
   0x6   :  { %23 = vsyncpa [#allocation20], 0 }
   0x7   :  { %24 = vsyncpa [#allocation4], 0  ;;  %s6501_s21 = smov [#allocation7]  }
   0x8   :  { %s50_s22 = sshll.u32 %s6501_s21, 4  ;;  %s51_s22 = int_to_ptr.vmem [resolvable:$true] %s50_s22 }
   0x9   :  { %s6245_s23 = scalar_lea.vmem %s51_s22, 10240  ;;  %p6250_p1 = scmp.lt.s32.totalorder %s51_s22, %s51_s22 }
   0xa   :  { %p6246_p0 = scmp.ne.s32.totalorder %s51_s22, %s6245_s23  ;;  %p6251_p2 = scmp.lt.s32.totalorder %s6245_s23, %s6245_s23 }
   0xc   :  { %p6252_p3 = por %p6251_p2, %p6250_p1 }
   0xe   :  { %p6253_p4 = pnand %p6252_p3, %p6246_p0 }
  0x10   :  { %6256 = shalt.err (!%p6253_p4)
}
  0x11   :  { %s6502_s24 = smov 640   ;;  %s6503_s25 = smov 40  }
  0x12   :  { %56 = dma.hbm_to_vmem [thread:$0]  %s7478_s2, 10240, %s51_s22, [#allocation8], %s6502_s24, %s6502_s24, %s6503_s25  }
  0x13   :  { %s6504_s28 = smov [#allocation10]  }
  0x14   :  { %s72_s29 = sshll.u32 %s6504_s28, 4  ;;  %s73_s29 = int_to_ptr.vmem [resolvable:$true] %s72_s29 }
  0x15   :  { %s6265_s30 = scalar_lea.vmem %s73_s29, 40960  ;;  %p6270_p6 = scmp.lt.s32.totalorder %s73_s29, %s73_s29 }
  0x16   :  { %p6266_p5 = scmp.ne.s32.totalorder %s73_s29, %s6265_s30  ;;  %p6271_p7 = scmp.lt.s32.totalorder %s6265_s30, %s6265_s30 }
  0x18   :  { %p6272_p8 = por %p6271_p7, %p6270_p6 }
  0x1a   :  { %p6273_p9 = pnand %p6272_p8, %p6266_p5 }
  0x1c   :  { %6276 = shalt.err (!%p6273_p9)
}
  0x1d   :  { %s6505_s13 = smov 256   ;;  %s6506_s14 = smov 16  }
  0x1e   :  { %78 = dma.hbm_to_vmem [thread:$0]  %s7480_s4, 40960, %s73_s29, [#allocation11], %s6505_s13, %s6505_s13, %s6506_s14  }
  0x1f   :  { %s6507_s2 = smov [#allocation13]  }
  0x20   :  { %s94_s17 = sshll.u32 %s6507_s2, 4  ;;  %s95_s17 = int_to_ptr.vmem [resolvable:$true] %s94_s17 }
  0x21   :  { %s6285_s18 = scalar_lea.vmem %s95_s17, 8192  ;;  %p6290_p11 = scmp.lt.s32.totalorder %s95_s17, %s95_s17 }
  0x22   :  { %p6286_p10 = scmp.ne.s32.totalorder %s95_s17, %s6285_s18  ;;  %p6291_p12 = scmp.lt.s32.totalorder %s6285_s18, %s6285_s18 }
  0x24   :  { %p6292_p13 = por %p6291_p12, %p6290_p11 }
  0x26   :  { %p6293_p0 = pnand %p6292_p13, %p6286_p10 }
  0x28   :  { %6296 = shalt.err (!%p6293_p0)
}
  0x29   :  { %s6508_s19 = smov 128   ;;  %s6509_s20 = smov 8  }
  0x2a   :  { %100 = dma.hbm_to_vmem [thread:$0]  %s7482_s6, 8192, %s95_s17, [#allocation14], %s6508_s19, %s6508_s19, %s6509_s20  }
  0x2b   :  { %s6510_s23 = smov [#allocation16]   ;;  %s6511_s4 = smov [#allocation19]  }
  0x2c   :  { %s116_s24 = sshll.u32 %s6510_s23, 4  ;;  %s138_s25 = sshll.u32 %s6511_s4, 4  ;;  %s117_s24 = int_to_ptr.vmem [resolvable:$true] %s116_s24  ;;  %s139_s25 = int_to_ptr.vmem [resolvable:$true] %s138_s25 }
  0x2d   :  { %s6305_s26 = scalar_lea.vmem %s117_s24, 2048  ;;  %p6310_p2 = scmp.lt.s32.totalorder %s117_s24, %s117_s24 }
  0x2e   :  { %p6306_p1 = scmp.ne.s32.totalorder %s117_s24, %s6305_s26  ;;  %p6311_p3 = scmp.lt.s32.totalorder %s6305_s26, %s6305_s26 }
  0x30   :  { %p6312_p4 = por %p6311_p3, %p6310_p2 }
  0x32   :  { %p6313_p5 = pnand %p6312_p4, %p6306_p1 }
  0x34   :  { %6316 = shalt.err (!%p6313_p5)
}
  0x35   :  { %s6512_s27 = smov 64   ;;  %s6513_s28 = smov 4  }
  0x36   :  { %122 = dma.hbm_to_vmem [thread:$0]  %s7484_s8, 2048, %s117_s24, [#allocation17], %s6512_s27, %s6512_s27, %s6513_s28  }
  0x37   :  { %s6325_s6 = scalar_lea.vmem %s139_s25, 2048  ;;  %p6330_p7 = scmp.lt.s32.totalorder %s139_s25, %s139_s25 }
  0x38   :  { %p6326_p6 = scmp.ne.s32.totalorder %s139_s25, %s6325_s6  ;;  %p6331_p8 = scmp.lt.s32.totalorder %s6325_s6, %s6325_s6 }
  0x3a   :  { %p6332_p9 = por %p6331_p8, %p6330_p7 }
  0x3c   :  { %p6333_p10 = pnand %p6332_p9, %p6326_p6 }
  0x3e   :  { %6336 = shalt.err (!%p6333_p10)
}
  0x3f   :  { %144 = dma.hbm_to_vmem [thread:$0]  %s7486_s10, 2048, %s139_s25, [#allocation20], %s6508_s19, %s6508_s19, %s6509_s20  }
  0x40   :  { %s6514_s2 = smov [#allocation2]   ;;  %s6515_s21 = smov [#allocation6]  }
  0x41   :  { %32 = dma.hbm_to_smem %s7476_s0, 16, %s6514_s2, [#allocation5]  }
  0x42   :  { %s38_s22 = sshll.u32 %s6515_s21, 4  ;;  %s6516_s8 = smov [#allocation9]   ;;  %s39_s22 = int_to_ptr.vmem [resolvable:$true] %s38_s22 }
  0x43   :  { %s63_s23 = sshll.u32 %s6516_s8, 4  ;;  %s6353_s24 = scalar_lea.vmem %s39_s22, 384  ;;  %s64_s23 = int_to_ptr.vmem [resolvable:$true] %s63_s23 }
  0x44   :  { %p6354_p11 = scmp.ne.s32.totalorder %s39_s22, %s6353_s24  ;;  %p6358_p12 = scmp.lt.s32.totalorder %s39_s22, %s39_s22 }
  0x45   :  { %p6359_p13 = scmp.lt.s32.totalorder %s6353_s24, %s6353_s24 }
  0x47   :  { %p6360_p0 = por %p6359_p13, %p6358_p12 }
  0x49   :  { %p6361_p1 = pnand %p6360_p0, %p6354_p11 }
  0x4b   :  { %6364 = shalt.err (!%p6361_p1)
}
  0x4c   :  { %44 = dma.hbm_to_vmem [thread:$0]  %s7477_s1, 384, %s39_s22, [#allocation3], %s6512_s27, %s6512_s27, %s6513_s28  }
  0x4d   :  { %s6373_s0 = scalar_lea.vmem %s64_s23, 160  ;;  %p6378_p3 = scmp.lt.s32.totalorder %s64_s23, %s64_s23 }
  0x4e   :  { %p6374_p2 = scmp.ne.s32.totalorder %s64_s23, %s6373_s0  ;;  %p6379_p4 = scmp.lt.s32.totalorder %s6373_s0, %s6373_s0 }
  0x50   :  { %p6380_p5 = por %p6379_p4, %p6378_p3 }
  0x52   :  { %p6381_p6 = pnand %p6380_p5, %p6374_p2 }
  0x54   :  { %6384 = shalt.err (!%p6381_p6)
}
  0x55   :  { %66 = dma.hbm_to_vmem [thread:$0]  %s7479_s3, 160, %s64_s23, [#allocation8]  }
  0x56   :  { %s6517_s25 = smov [#allocation12]   ;;  %s6518_s29 = smov [#allocation15]  }
  0x57   :  { %s85_s26 = sshll.u32 %s6517_s25, 4  ;;  %s107_s30 = sshll.u32 %s6518_s29, 4  ;;  %s86_s26 = int_to_ptr.vmem [resolvable:$true] %s85_s26  ;;  %s108_s30 = int_to_ptr.vmem [resolvable:$true] %s107_s30 }
  0x58   :  { %s6393_s6 = scalar_lea.vmem %s86_s26, 64  ;;  %p6398_p8 = scmp.lt.s32.totalorder %s86_s26, %s86_s26 }
  0x59   :  { %p6394_p7 = scmp.ne.s32.totalorder %s86_s26, %s6393_s6  ;;  %p6399_p9 = scmp.lt.s32.totalorder %s6393_s6, %s6393_s6 }
  0x5b   :  { %p6400_p10 = por %p6399_p9, %p6398_p8 }
  0x5d   :  { %p6401_p11 = pnand %p6400_p10, %p6394_p7 }
  0x5f   :  { %6404 = shalt.err (!%p6401_p11)
}
  0x60   :  { %88 = dma.hbm_to_vmem [thread:$0]  %s7481_s5, 64, %s86_s26, [#allocation11]  }
  0x61   :  { %s6413_s28 = scalar_lea.vmem %s108_s30, 32  ;;  %p6418_p13 = scmp.lt.s32.totalorder %s108_s30, %s108_s30 }
  0x62   :  { %p6414_p12 = scmp.ne.s32.totalorder %s108_s30, %s6413_s28  ;;  %p6419_p0 = scmp.lt.s32.totalorder %s6413_s28, %s6413_s28 }
  0x64   :  { %p6420_p1 = por %p6419_p0, %p6418_p13 }
  0x66   :  { %p6421_p2 = pnand %p6420_p1, %p6414_p12 }
  0x68   :  { %6424 = shalt.err (!%p6421_p2)
}
  0x69   :  { %110 = dma.hbm_to_vmem [thread:$0]  %s7483_s7, 32, %s108_s30, [#allocation14]  }
  0x6a   :  { %s6519_s16 = smov [#allocation18]   ;;  %s6520_s17 = smov [#allocation21]  }
  0x6b   :  { %s129_s2 = sshll.u32 %s6519_s16, 4  ;;  %s151_s18 = sshll.u32 %s6520_s17, 4  ;;  %s130_s2 = int_to_ptr.vmem [resolvable:$true] %s129_s2  ;;  %s152_s18 = int_to_ptr.vmem [resolvable:$true] %s151_s18 }
  0x6c   :  { %s6433_s21 = scalar_lea.vmem %s130_s2, 16  ;;  %s6437_s5 = scalar_lea.vmem %s130_s2, 32 }
  0x6d   :  { %p6434_p3 = scmp.ne.s32.totalorder %s130_s2, %s6433_s21  ;;  %p6438_p4 = scmp.lt.s32.totalorder %s130_s2, %s130_s2 }
  0x6e   :  { %p6439_p5 = scmp.lt.s32.totalorder %s6437_s5, %s6433_s21 }
  0x70   :  { %p6440_p6 = por %p6439_p5, %p6438_p4 }
  0x72   :  { %p6441_p7 = pnand %p6440_p6, %p6434_p3 }
  0x74   :  { %6444 = shalt.err (!%p6441_p7)
}
  0x75   :  { %132 = dma.hbm_to_vmem [thread:$0]  %s7485_s9, 16, %s130_s2, [#allocation17]  }
  0x76   :  { %s6453_s23 = scalar_lea.vmem %s152_s18, 32  ;;  %p6458_p9 = scmp.lt.s32.totalorder %s152_s18, %s152_s18 }
  0x77   :  { %p6454_p8 = scmp.ne.s32.totalorder %s152_s18, %s6453_s23  ;;  %p6459_p10 = scmp.lt.s32.totalorder %s6453_s23, %s6453_s23 }
  0x79   :  { %p6460_p11 = por %p6459_p10, %p6458_p9 }
  0x7b   :  { %p6461_p12 = pnand %p6460_p11, %p6454_p8 }
  0x7d   :  { %6464 = shalt.err (!%p6461_p12)
}
  0x7e   :  { %154 = dma.hbm_to_vmem [thread:$0]  %s7487_s11, 32, %s152_s18, [#allocation20]  }
  0x7f   :  { %6485 = dma.done.wait [#allocation5], 16  }
  0x80   :  { %6486 = vsyncadd [#allocation5], 4294967280 }
  0x81   :  { %6487 = dma.done.wait [#allocation3], 384  }
  0x82   :  { %6488 = vsyncadd [#allocation3], 4294966912 }
  0x83   :  { %6489 = dma.done.wait [#allocation8], 10400  }
  0x84   :  { %6490 = vsyncadd [#allocation8], 4294956896 }
  0x85   :  { %6491 = dma.done.wait [#allocation11], 41024  }
  0x86   :  { %6492 = vsyncadd [#allocation11], 4294926272 }
  0x87   :  { %6493 = dma.done.wait [#allocation14], 8224  }
  0x88   :  { %6494 = vsyncadd [#allocation14], 4294959072 }
  0x89   :  { %6495 = dma.done.wait [#allocation17], 2064  }
  0x8a   :  { %6496 = vsyncadd [#allocation17], 4294965232 }
  0x8b   :  { %6497 = dma.done.wait [#allocation20], 2080  }
  0x8c   :  { %6498 = vsyncadd [#allocation20], 4294965216 }
  0x8d   :  { %191 = sfence }
  0x8e   :  { %v5498_v0 = vld [vmem:[#allocation7 + $0x234] ss:$40 sps:$4 sm:$0xff]   ;;  %v7489_v2 = vmov 0   ;;  %v5502_v3 = vld [vmem:[#allocation7 + $0x230] ss:$40 sps:$4 sm:$0xff]   ;;  %v6635_v35 = vld [vmem:[#allocation6] sm:$0xff]  }
  0x8f   :  { %v5500_v1 = vld [vmem:[#allocation7 + $0x23c] ss:$40 sps:$4 sm:$0xff]   ;;  %783 = vmatprep.mubr.bf16.mxu0 %v7489_v2  ;;  %846 = vmatprep.mubr.bf16.mxu1 %v7489_v2  ;;  %v5503_v4 = vld [vmem:[#allocation7 + $0x238] ss:$40 sps:$4 sm:$0xff]   ;;  %v5506_v6 = vld [vmem:[#allocation7 + $0x1ec] ss:$40 sps:$4 sm:$0xff]  }
  0x90   :  { %751 = vmatprep.subr.bf16.mxu0 %v5498_v0  ;;  %814 = vmatprep.subr.bf16.mxu1 %v5500_v1  ;;  %v5504_v5 = vld [vmem:[#allocation7 + $0x1e4] ss:$40 sps:$4 sm:$0xff]   ;;  %v5508_v7 = vld [vmem:[#allocation7 + $0x1e0] ss:$40 sps:$4 sm:$0xff]   ;;  %v5510_v9 = vld [vmem:[#allocation7 + $0x194] ss:$40 sps:$4 sm:$0xff]  }
  0x91   :  { %752 = vmatpush1.bf16.msra.mxu0 %v5502_v3  ;;  %815 = vmatpush1.bf16.msra.mxu1 %v5503_v4  ;;  %v5509_v8 = vld [vmem:[#allocation7 + $0x1e8] ss:$40 sps:$4 sm:$0xff]   ;;  %v5512_v10 = vld [vmem:[#allocation7 + $0x19c] ss:$40 sps:$4 sm:$0xff]   ;;  %v5515_v12 = vld [vmem:[#allocation7 + $0x198] ss:$40 sps:$4 sm:$0xff]  }
  0x92   :  { %753 = vmatprep.subr.bf16.mxu0 %v5504_v5  ;;  %816 = vmatprep.subr.bf16.mxu1 %v5506_v6  ;;  %v5514_v11 = vld [vmem:[#allocation7 + $0x190] ss:$40 sps:$4 sm:$0xff]   ;;  %v5516_v13 = vld [vmem:[#allocation7 + $0x144] ss:$40 sps:$4 sm:$0xff]   ;;  %v5520_v15 = vld [vmem:[#allocation7 + $0x140] ss:$40 sps:$4 sm:$0xff]  }
  0x93   :  { %v5518_v14 = vld [vmem:[#allocation7 + $0x14c] ss:$40 sps:$4 sm:$0xff]   ;;  %v5521_v16 = vld [vmem:[#allocation7 + $0x148] ss:$40 sps:$4 sm:$0xff]   ;;  %v5524_v18 = vld [vmem:[#allocation7 + $0xfc] ss:$40 sps:$4 sm:$0xff]  }
  0x94   :  { %v5522_v17 = vld [vmem:[#allocation7 + $0xf4] ss:$40 sps:$4 sm:$0xff]   ;;  %v5526_v19 = vld [vmem:[#allocation7 + $0xf0] ss:$40 sps:$4 sm:$0xff]   ;;  %v5528_v21 = vld [vmem:[#allocation7 + $0xa4] ss:$40 sps:$4 sm:$0xff]  }
  0x95   :  { %754 = vmatpush1.bf16.msra.mxu0 %v5508_v7  ;;  %817 = vmatpush1.bf16.msra.mxu1 %v5509_v8  ;;  %v5527_v20 = vld [vmem:[#allocation7 + $0xf8] ss:$40 sps:$4 sm:$0xff]   ;;  %v5530_v22 = vld [vmem:[#allocation7 + $0xac] ss:$40 sps:$4 sm:$0xff]   ;;  %v5533_v24 = vld [vmem:[#allocation7 + $0xa8] ss:$40 sps:$4 sm:$0xff]  }
  0x96   :  { %755 = vmatprep.subr.bf16.mxu0 %v5510_v9  ;;  %818 = vmatprep.subr.bf16.mxu1 %v5512_v10  ;;  %v5532_v23 = vld [vmem:[#allocation7 + $0xa0] ss:$40 sps:$4 sm:$0xff]   ;;  %v5534_v25 = vld [vmem:[#allocation7 + $0x54] ss:$40 sps:$4 sm:$0xff]   ;;  %v5538_v27 = vld [vmem:[#allocation7 + $0x50] ss:$40 sps:$4 sm:$0xff]  }
  0x97   :  { %v5536_v26 = vld [vmem:[#allocation7 + $0x5c] ss:$40 sps:$4 sm:$0xff]   ;;  %v5539_v28 = vld [vmem:[#allocation7 + $0x58] ss:$40 sps:$4 sm:$0xff]   ;;  %v5542_v30 = vld [vmem:[#allocation7 + $0xc] ss:$40 sps:$4 sm:$0xff]  }
  0x98   :  { %v5540_v29 = vld [vmem:[#allocation7 + $0x4] ss:$40 sps:$4 sm:$0xff]   ;;  %v5544_v31 = vld [vmem:[#allocation7] ss:$40 sps:$4 sm:$0xff]   ;;  %v5555_v38 = vld [vmem:[#allocation7 + $0x1f4] ss:$40 sps:$4 sm:$0xff]  }
  0x99   :  { %756 = vmatpush1.bf16.msra.mxu0 %v5514_v11  ;;  %819 = vmatpush1.bf16.msra.mxu1 %v5515_v12  ;;  %v5545_v32 = vld [vmem:[#allocation7 + $0x8] ss:$40 sps:$4 sm:$0xff]   ;;  %v5549_v33 = vld [vmem:[#allocation7 + $0x244] ss:$40 sps:$4 sm:$0xff]   ;;  %v5556_v41 = vld [vmem:[#allocation7 + $0x1f8] ss:$40 sps:$4 sm:$0xff]  }
  0x9a   :  { %757 = vmatprep.subr.bf16.mxu0 %v5516_v13  ;;  %820 = vmatprep.subr.bf16.mxu1 %v5518_v14  ;;  %v5552_v34 = vld [vmem:[#allocation7 + $0x24c] ss:$40 sps:$4 sm:$0xff]   ;;  %v5547_v36 = vld [vmem:[#allocation7 + $0x240] ss:$40 sps:$4 sm:$0xff]   ;;  %v5558_v39 = vld [vmem:[#allocation7 + $0x1fc] ss:$40 sps:$4 sm:$0xff]  }
  0x9b   :  { %v5550_v37 = vld [vmem:[#allocation7 + $0x248] ss:$40 sps:$4 sm:$0xff]   ;;  %v5561_v42 = vld [vmem:[#allocation7 + $0x1a4] ss:$40 sps:$4 sm:$0xff]   ;;  %v5568_v47 = vld [vmem:[#allocation7 + $0x154] ss:$40 sps:$4 sm:$0xff]  }
  0x9c   :  { %v5553_v40 = vld [vmem:[#allocation7 + $0x1f0] ss:$40 sps:$4 sm:$0xff]   ;;  %v5565_v43 = vld [vmem:[#allocation7 + $0x1ac] ss:$40 sps:$4 sm:$0xff]   ;;  %v5559_v44 = vld [vmem:[#allocation7 + $0x1a0] ss:$40 sps:$4 sm:$0xff]  }
  0x9d   :  { %758 = vmatpush1.bf16.msra.mxu0 %v5520_v15  ;;  %821 = vmatpush1.bf16.msra.mxu1 %v5521_v16  ;;  %v6641_v45 = vld [vmem:[#allocation6 + $0x8] sm:$0xff]   ;;  %v5571_v48 = vld [vmem:[#allocation7 + $0x15c] ss:$40 sps:$4 sm:$0xff]   ;;  %v5569_v50 = vld [vmem:[#allocation7 + $0x158] ss:$40 sps:$4 sm:$0xff]   ;;  %s1066_s9 = sld [smem:[#allocation2]] }
  0x9e   :  { %759 = vmatprep.subr.bf16.mxu0 %v5522_v17  ;;  %822 = vmatprep.subr.bf16.mxu1 %v5524_v18  ;;  %v5563_v46 = vld [vmem:[#allocation7 + $0x1a8] ss:$40 sps:$4 sm:$0xff]   ;;  %v5574_v51 = vld [vmem:[#allocation7 + $0x104] ss:$40 sps:$4 sm:$0xff]   ;;  %v6647_v54 = vld [vmem:[#allocation6 + $0x10] sm:$0xff]   ;;  %s7245_s11 = sld [smem:[#allocation2 + $0x1]] }
  0x9f   :  { %v5566_v49 = vld [vmem:[#allocation7 + $0x150] ss:$40 sps:$4 sm:$0xff]   ;;  %v5578_v52 = vld [vmem:[#allocation7 + $0x10c] ss:$40 sps:$4 sm:$0xff]   ;;  %v5572_v53 = vld [vmem:[#allocation7 + $0x100] ss:$40 sps:$4 sm:$0xff]  }
  0xa0   :  { %v5576_v55 = vld [vmem:[#allocation7 + $0x108] ss:$40 sps:$4 sm:$0xff]   ;;  %v5581_v56 = vld [vmem:[#allocation7 + $0xb4] ss:$40 sps:$4 sm:$0xff]   ;;  %v5582_v59 = vld [vmem:[#allocation7 + $0xb8] ss:$40 sps:$4 sm:$0xff]  }
  0xa1   :  { %760 = vmatpush1.bf16.msra.mxu0 %v5526_v19  ;;  %823 = vmatpush1.bf16.msra.mxu1 %v5527_v20  ;;  %v5584_v57 = vld [vmem:[#allocation7 + $0xbc] ss:$40 sps:$4 sm:$0xff]   ;;  %v5579_v58 = vld [vmem:[#allocation7 + $0xb0] ss:$40 sps:$4 sm:$0xff]   ;;  %v5590_v61 = vld [vmem:[#allocation7 + $0x6c] ss:$40 sps:$4 sm:$0xff]  }
  0xa2   :  { %761 = vmatprep.subr.bf16.mxu0 %v5528_v21  ;;  %824 = vmatprep.subr.bf16.mxu1 %v5530_v22  ;;  %v5587_v60 = vld [vmem:[#allocation7 + $0x64] ss:$40 sps:$4 sm:$0xff]   ;;  %v5585_v62 = vld [vmem:[#allocation7 + $0x60] ss:$40 sps:$4 sm:$0xff]   ;;  %v5593_v0 = vld [vmem:[#allocation7 + $0x14] ss:$40 sps:$4 sm:$0xff]  }
  0xa3   :  { %v5588_v63 = vld [vmem:[#allocation7 + $0x68] ss:$40 sps:$4 sm:$0xff]   ;;  %v5596_v1 = vld [vmem:[#allocation7 + $0x1c] ss:$40 sps:$4 sm:$0xff]   ;;  %v5594_v4 = vld [vmem:[#allocation7 + $0x18] ss:$40 sps:$4 sm:$0xff]  }
  0xa4   :  { %v5591_v3 = vld [vmem:[#allocation7 + $0x10] ss:$40 sps:$4 sm:$0xff]   ;;  %v5599_v5 = vld [vmem:[#allocation7 + $0x254] ss:$40 sps:$4 sm:$0xff]   ;;  %v5602_v9 = vld [vmem:[#allocation7 + $0x204] ss:$40 sps:$4 sm:$0xff]  }
  0xa5   :  { %762 = vmatpush1.bf16.msra.mxu0 %v5532_v23  ;;  %825 = vmatpush1.bf16.msra.mxu1 %v5533_v24  ;;  %v5623_v6 = vld [vmem:[#allocation10 + $0xe4] ss:$16 sps:$4 sm:$0xff]   ;;  %v5621_v8 = vld [vmem:[#allocation10 + $0xe0] ss:$16 sps:$4 sm:$0xff]   ;;  %s5391_s10 = sld [smem:[#allocation2 + $0x2]]  ;;  %s6522_s0 = smov [#allocation22]  }
  0xa6   :  { %763 = vmatprep.subr.bf16.mxu0 %v5534_v25  ;;  %826 = vmatprep.subr.bf16.mxu1 %v5536_v26  ;;  %v5597_v7 = vld [vmem:[#allocation7 + $0x250] ss:$40 sps:$4 sm:$0xff]   ;;  %v5600_v11 = vld [vmem:[#allocation7 + $0x200] ss:$40 sps:$4 sm:$0xff]   ;;  %v5605_v13 = vld [vmem:[#allocation7 + $0x1b4] ss:$40 sps:$4 sm:$0xff]  }
  0xa7   :  { %v5629_v10 = vld [vmem:[#allocation10 + $0xc4] ss:$16 sps:$4 sm:$0xff]   ;;  %v5627_v12 = vld [vmem:[#allocation10 + $0xc0] ss:$16 sps:$4 sm:$0xff]   ;;  %s5409_s19 = sld [smem:[#allocation2 + $0x3]]  ;;  %s4905_s20 = sshll.u32 %s6522_s0, 4  ;;  %s4906_s20 = int_to_ptr.vmem [resolvable:$true] %s4905_s20 }
  0xa8   :  { %v5635_v14 = vld [vmem:[#allocation10 + $0xa4] ss:$16 sps:$4 sm:$0xff]   ;;  %v5633_v16 = vld [vmem:[#allocation10 + $0xa0] ss:$16 sps:$4 sm:$0xff]   ;;  %s6465_s4 = scalar_lea.vmem %s4906_s20, 1536  ;;  %p6470_p0 = scmp.lt.s32.totalorder %s4906_s20, %s4906_s20 }
  0xa9   :  { %764 = vmatpush1.bf16.msra.mxu0 %v5538_v27  ;;  %827 = vmatpush1.bf16.msra.mxu1 %v5539_v28  ;;  %v5603_v15 = vld [vmem:[#allocation7 + $0x1b0] ss:$40 sps:$4 sm:$0xff]   ;;  %v5608_v17 = vld [vmem:[#allocation7 + $0x164] ss:$40 sps:$4 sm:$0xff]   ;;  %v5606_v19 = vld [vmem:[#allocation7 + $0x160] ss:$40 sps:$4 sm:$0xff]   ;;  %p6466_p13 = scmp.ne.s32.totalorder %s4906_s20, %s6465_s4  ;;  %p6471_p1 = scmp.lt.s32.totalorder %s6465_s4, %s6465_s4 }
  0xaa   :  { %765 = vmatprep.subr.bf16.mxu0 %v5540_v29  ;;  %828 = vmatprep.subr.bf16.mxu1 %v5542_v30  ;;  %v5641_v18 = vld [vmem:[#allocation10 + $0x84] ss:$16 sps:$4 sm:$0xff]   ;;  %v5639_v20 = vld [vmem:[#allocation10 + $0x80] ss:$16 sps:$4 sm:$0xff]  }
  0xab   :  { %v5611_v21 = vld [vmem:[#allocation7 + $0x114] ss:$40 sps:$4 sm:$0xff]   ;;  %v5609_v23 = vld [vmem:[#allocation7 + $0x110] ss:$40 sps:$4 sm:$0xff]   ;;  %v5614_v25 = vld [vmem:[#allocation7 + $0xc4] ss:$40 sps:$4 sm:$0xff]   ;;  %p6472_p2 = por %p6471_p1, %p6470_p0 }
  0xac   :  { %v5647_v22 = vld [vmem:[#allocation10 + $0x64] ss:$16 sps:$4 sm:$0xff]   ;;  %v5645_v24 = vld [vmem:[#allocation10 + $0x60] ss:$16 sps:$4 sm:$0xff]  }
  0xad   :  { %766 = vmatpush1.bf16.msra.mxu0 %v5544_v31  ;;  %829 = vmatpush1.bf16.msra.mxu1 %v5545_v32  ;;  %v5653_v26 = vld [vmem:[#allocation10 + $0x44] ss:$16 sps:$4 sm:$0xff]   ;;  %v5651_v28 = vld [vmem:[#allocation10 + $0x40] ss:$16 sps:$4 sm:$0xff]   ;;  %p6473_p3 = pnand %p6472_p2, %p6466_p13 }
  0xae   :  { %877 = vmatprep.subr.bf16.mxu0 %v5549_v33  ;;  %940 = vmatprep.subr.bf16.mxu1 %v5552_v34  ;;  %v5612_v27 = vld [vmem:[#allocation7 + $0xc0] ss:$40 sps:$4 sm:$0xff]   ;;  %v5617_v29 = vld [vmem:[#allocation7 + $0x74] ss:$40 sps:$4 sm:$0xff]   ;;  %v5615_v31 = vld [vmem:[#allocation7 + $0x70] ss:$40 sps:$4 sm:$0xff]  }
  0xaf   :  { %v5659_v30 = vld [vmem:[#allocation10 + $0x24] ss:$16 sps:$4 sm:$0xff]   ;;  %v5657_v32 = vld [vmem:[#allocation10 + $0x20] ss:$16 sps:$4 sm:$0xff]  }
  0xb0   :  { %784 = vmatmul.mubr.bf16.vlgmr.msra.gmra.mxu0 %v6635_v35  ;;  %847 = vmatmul.mubr.bf16.vlgmr.msra.gmra.mxu1 %v6635_v35  ;;  %v5620_v33 = vld [vmem:[#allocation7 + $0x24] ss:$40 sps:$4 sm:$0xff]  }
  0xb1   :  { %878 = vmatpush1.bf16.msra.mxu0 %v5547_v36  ;;  %941 = vmatpush1.bf16.msra.mxu1 %v5550_v37  ;;  %v5665_v34 = vld [vmem:[#allocation10 + $0x4] ss:$16 sps:$4 sm:$0xff]   ;;  %v5663_v37 = vld [vmem:[#allocation10] ss:$16 sps:$4 sm:$0xff]  }
  0xb2   :  { %879 = vmatprep.subr.bf16.mxu0 %v5555_v38  ;;  %942 = vmatprep.subr.bf16.mxu1 %v5558_v39  ;;  %v5618_v36 = vld [vmem:[#allocation7 + $0x20] ss:$40 sps:$4 sm:$0xff]  }
  0xb3   :  { %793 = vmatprep.mubr.bf16.mxu0 %v7489_v2  ;;  %856 = vmatprep.mubr.bf16.mxu1 %v7489_v2  ;;  %v5626_v38 = vld [vmem:[#allocation10 + $0x2e4] ss:$16 sps:$4 sm:$0xff]  }
  0xb4   :  { %v5671_v39 = vld [vmem:[#allocation10 + $0x1e4] ss:$16 sps:$4 sm:$0xff]  }
  0xb5   :  { %880 = vmatpush1.bf16.msra.mxu0 %v5553_v40  ;;  %943 = vmatpush1.bf16.msra.mxu1 %v5556_v41  ;;  %v5624_v40 = vld [vmem:[#allocation10 + $0x2e0] ss:$16 sps:$4 sm:$0xff]   ;;  %v5632_v41 = vld [vmem:[#allocation10 + $0x2c4] ss:$16 sps:$4 sm:$0xff]  }
  0xb6   :  { %881 = vmatprep.subr.bf16.mxu0 %v5561_v42  ;;  %944 = vmatprep.subr.bf16.mxu1 %v5565_v43  ;;  %v5669_v42 = vld [vmem:[#allocation10 + $0x1e0] ss:$16 sps:$4 sm:$0xff]   ;;  %v5677_v43 = vld [vmem:[#allocation10 + $0x1c4] ss:$16 sps:$4 sm:$0xff]  }
  0xb8   :  { %794 = vmatmul.mubr.bf16.gmra.mxu0 %v6641_v45  ;;  %857 = vmatmul.mubr.bf16.gmra.mxu1 %v6641_v45 }
  0xb9   :  { %882 = vmatpush1.bf16.msra.mxu0 %v5559_v44  ;;  %945 = vmatpush1.bf16.msra.mxu1 %v5563_v46  ;;  %v5630_v44 = vld [vmem:[#allocation10 + $0x2c0] ss:$16 sps:$4 sm:$0xff]   ;;  %v5638_v46 = vld [vmem:[#allocation10 + $0x2a4] ss:$16 sps:$4 sm:$0xff]  }
  0xba   :  { %883 = vmatprep.subr.bf16.mxu0 %v5568_v47  ;;  %946 = vmatprep.subr.bf16.mxu1 %v5571_v48  ;;  %v5675_v47 = vld [vmem:[#allocation10 + $0x1c0] ss:$16 sps:$4 sm:$0xff]   ;;  %v5683_v48 = vld [vmem:[#allocation10 + $0x1a4] ss:$16 sps:$4 sm:$0xff]  }
  0xbb   :  { %803 = vmatprep.mubr.bf16.mxu0 %v7489_v2  ;;  %866 = vmatprep.mubr.bf16.mxu1 %v7489_v2 }
  0xbd   :  { %884 = vmatpush1.bf16.msra.mxu0 %v5566_v49  ;;  %947 = vmatpush1.bf16.msra.mxu1 %v5569_v50  ;;  %v5636_v49 = vld [vmem:[#allocation10 + $0x2a0] ss:$16 sps:$4 sm:$0xff]   ;;  %v5644_v50 = vld [vmem:[#allocation10 + $0x284] ss:$16 sps:$4 sm:$0xff]  }
  0xbe   :  { %885 = vmatprep.subr.bf16.mxu0 %v5574_v51  ;;  %948 = vmatprep.subr.bf16.mxu1 %v5578_v52  ;;  %v5681_v51 = vld [vmem:[#allocation10 + $0x1a0] ss:$16 sps:$4 sm:$0xff]   ;;  %v5689_v52 = vld [vmem:[#allocation10 + $0x184] ss:$16 sps:$4 sm:$0xff]  }
  0xc0   :  { %804 = vmatmul.mubr.bf16.gmra.mxu0 %v6647_v54  ;;  %867 = vmatmul.mubr.bf16.gmra.mxu1 %v6647_v54 }
  0xc1   :  { %886 = vmatpush1.bf16.msra.mxu0 %v5572_v53  ;;  %949 = vmatpush1.bf16.msra.mxu1 %v5576_v55  ;;  %v5650_v53 = vld [vmem:[#allocation10 + $0x264] ss:$16 sps:$4 sm:$0xff]   ;;  %v5687_v55 = vld [vmem:[#allocation10 + $0x180] ss:$16 sps:$4 sm:$0xff]  }
  0xc2   :  { %887 = vmatprep.subr.bf16.mxu0 %v5581_v56  ;;  %950 = vmatprep.subr.bf16.mxu1 %v5584_v57  ;;  %v5695_v56 = vld [vmem:[#allocation10 + $0x164] ss:$16 sps:$4 sm:$0xff]   ;;  %v5648_v57 = vld [vmem:[#allocation10 + $0x260] ss:$16 sps:$4 sm:$0xff]  }
  0xc3   :  { %909 = vmatprep.mubr.bf16.mxu0 %v7489_v2  ;;  %972 = vmatprep.mubr.bf16.mxu1 %v7489_v2 }
  0xc5   :  { %888 = vmatpush1.bf16.msra.mxu0 %v5579_v58  ;;  %951 = vmatpush1.bf16.msra.mxu1 %v5582_v59  ;;  %v5656_v58 = vld [vmem:[#allocation10 + $0x244] ss:$16 sps:$4 sm:$0xff]   ;;  %v5693_v59 = vld [vmem:[#allocation10 + $0x160] ss:$16 sps:$4 sm:$0xff]  }
  0xc6   :  { %889 = vmatprep.subr.bf16.mxu0 %v5587_v60  ;;  %952 = vmatprep.subr.bf16.mxu1 %v5590_v61  ;;  %v5701_v60 = vld [vmem:[#allocation10 + $0x144] ss:$16 sps:$4 sm:$0xff]  }
  0xc7   :  { %v5662_v61 = vld [vmem:[#allocation10 + $0x224] ss:$16 sps:$4 sm:$0xff]  }
  0xc9   :  { %890 = vmatpush1.bf16.msra.mxu0 %v5585_v62  ;;  %953 = vmatpush1.bf16.msra.mxu1 %v5588_v63  ;;  %v5699_v62 = vld [vmem:[#allocation10 + $0x140] ss:$16 sps:$4 sm:$0xff]   ;;  %v5707_v63 = vld [vmem:[#allocation10 + $0x124] ss:$16 sps:$4 sm:$0xff]  }
  0xca   :  { %891 = vmatprep.subr.bf16.mxu0 %v5593_v0  ;;  %954 = vmatprep.subr.bf16.mxu1 %v5596_v1  ;;  %v5660_v0 = vld [vmem:[#allocation10 + $0x220] ss:$16 sps:$4 sm:$0xff]   ;;  %v5668_v1 = vld [vmem:[#allocation10 + $0x204] ss:$16 sps:$4 sm:$0xff]  }
  0xcd   :  { %892 = vmatpush1.bf16.msra.mxu0 %v5591_v3  ;;  %955 = vmatpush1.bf16.msra.mxu1 %v5594_v4  ;;  %v5705_v3 = vld [vmem:[#allocation10 + $0x120] ss:$16 sps:$4 sm:$0xff]   ;;  %v5713_v4 = vld [vmem:[#allocation10 + $0x104] ss:$16 sps:$4 sm:$0xff]  }
  0xce   :  { %1003 = vmatprep.subr.bf16.mxu0 %v5599_v5  ;;  %3220 = vmatprep.subr.bf16.mxu1 %v5623_v6  ;;  %v5666_v5 = vld [vmem:[#allocation10 + $0x200] ss:$16 sps:$4 sm:$0xff]   ;;  %v5674_v6 = vld [vmem:[#allocation10 + $0x3e4] ss:$16 sps:$4 sm:$0xff]  }
  0xd0   :  { %910 = vmatmul.mubr.bf16.vlgmr.msra.gmra.mxu0 %v6635_v35  ;;  %973 = vmatmul.mubr.bf16.vlgmr.msra.gmra.mxu1 %v6635_v35 }
  0xd1   :  { %919 = vmatprep.mubr.bf16.mxu0 %v7489_v2  ;;  %982 = vmatprep.mubr.bf16.mxu1 %v7489_v2 }
  0xd2   :  { %1004 = vmatpush1.bf16.msra.mxu0 %v5597_v7  ;;  %3221 = vmatpush1.bf16.msra.mxu1 %v5621_v8  ;;  %v5719_v7 = vld [vmem:[#allocation10 + $0x4e4] ss:$16 sps:$4 sm:$0xff]   ;;  %v5672_v8 = vld [vmem:[#allocation10 + $0x3e0] ss:$16 sps:$4 sm:$0xff]  }
  0xd3   :  { %1005 = vmatprep.subr.bf16.mxu0 %v5602_v9  ;;  %3222 = vmatprep.subr.bf16.mxu1 %v5629_v10  ;;  %v5680_v9 = vld [vmem:[#allocation10 + $0x3c4] ss:$16 sps:$4 sm:$0xff]   ;;  %v5678_v10 = vld [vmem:[#allocation10 + $0x3c0] ss:$16 sps:$4 sm:$0xff]  }
  0xd6   :  { %1006 = vmatpush1.bf16.msra.mxu0 %v5600_v11  ;;  %3223 = vmatpush1.bf16.msra.mxu1 %v5627_v12  ;;  %v5686_v11 = vld [vmem:[#allocation10 + $0x3a4] ss:$16 sps:$4 sm:$0xff]   ;;  %v5684_v12 = vld [vmem:[#allocation10 + $0x3a0] ss:$16 sps:$4 sm:$0xff]  }
  0xd7   :  { %1007 = vmatprep.subr.bf16.mxu0 %v5605_v13  ;;  %3224 = vmatprep.subr.bf16.mxu1 %v5635_v14  ;;  %v5692_v13 = vld [vmem:[#allocation10 + $0x384] ss:$16 sps:$4 sm:$0xff]   ;;  %v5690_v14 = vld [vmem:[#allocation10 + $0x380] ss:$16 sps:$4 sm:$0xff]  }
  0xd8   :  { %920 = vmatmul.mubr.bf16.gmra.mxu0 %v6641_v45  ;;  %983 = vmatmul.mubr.bf16.gmra.mxu1 %v6641_v45 }
  0xd9   :  { %929 = vmatprep.mubr.bf16.mxu0 %v7489_v2  ;;  %992 = vmatprep.mubr.bf16.mxu1 %v7489_v2 }
  0xda   :  { %1008 = vmatpush1.bf16.msra.mxu0 %v5603_v15  ;;  %3225 = vmatpush1.bf16.msra.mxu1 %v5633_v16  ;;  %v5698_v15 = vld [vmem:[#allocation10 + $0x364] ss:$16 sps:$4 sm:$0xff]   ;;  %v5696_v16 = vld [vmem:[#allocation10 + $0x360] ss:$16 sps:$4 sm:$0xff]  }
  0xdb   :  { %1009 = vmatprep.subr.bf16.mxu0 %v5608_v17  ;;  %3226 = vmatprep.subr.bf16.mxu1 %v5641_v18  ;;  %v5704_v17 = vld [vmem:[#allocation10 + $0x344] ss:$16 sps:$4 sm:$0xff]   ;;  %v5702_v18 = vld [vmem:[#allocation10 + $0x340] ss:$16 sps:$4 sm:$0xff]  }
  0xde   :  { %1010 = vmatpush1.bf16.msra.mxu0 %v5606_v19  ;;  %3227 = vmatpush1.bf16.msra.mxu1 %v5639_v20  ;;  %v5710_v19 = vld [vmem:[#allocation10 + $0x324] ss:$16 sps:$4 sm:$0xff]   ;;  %v5708_v20 = vld [vmem:[#allocation10 + $0x320] ss:$16 sps:$4 sm:$0xff]  }
  0xdf   :  { %1011 = vmatprep.subr.bf16.mxu0 %v5611_v21  ;;  %3228 = vmatprep.subr.bf16.mxu1 %v5647_v22  ;;  %v5716_v21 = vld [vmem:[#allocation10 + $0x304] ss:$16 sps:$4 sm:$0xff]   ;;  %v5714_v22 = vld [vmem:[#allocation10 + $0x300] ss:$16 sps:$4 sm:$0xff]  }
  0xe0   :  { %930 = vmatmul.mubr.bf16.gmra.mxu0 %v6647_v54  ;;  %993 = vmatmul.mubr.bf16.gmra.mxu1 %v6647_v54 }
  0xe1   :  { %1035 = vmatprep.mubr.bf16.mxu0 %v7489_v2 }
  0xe2   :  { %1012 = vmatpush1.bf16.msra.mxu0 %v5609_v23  ;;  %3229 = vmatpush1.bf16.msra.mxu1 %v5645_v24  ;;  %v5722_v23 = vld [vmem:[#allocation10 + $0x6e4] ss:$16 sps:$4 sm:$0xff]   ;;  %v283_v24 = vlaneseq }
  0xe3   :  { %1013 = vmatprep.subr.bf16.mxu0 %v5614_v25  ;;  %3230 = vmatprep.subr.bf16.mxu1 %v5653_v26 }
  0xe4   :  { %v6669_v25 = vshrl.u32 %v283_v24, 7 }
  0xe6   :  { %1014 = vmatpush1.bf16.msra.mxu0 %v5612_v27  ;;  %3231 = vmatpush1.bf16.msra.mxu1 %v5651_v28  ;;  %v6672_v26 = vsub.s32 0, %v6669_v25  ;;  %v293_v27 = vsub.s32 2, %v6669_v25  ;;  %v6675_v28 = vld [vmem:[#allocation9] sm:$0xff] }
  0xe7   :  { %1015 = vmatprep.subr.bf16.mxu0 %v5617_v29  ;;  %3232 = vmatprep.subr.bf16.mxu1 %v5659_v30  ;;  %v6678_v29 = vsub.s32 1, %v6669_v25  ;;  %v7491_v30 = vsub.s32 3, %v6669_v25 }
  0xea   :  { %1016 = vmatpush1.bf16.msra.mxu0 %v5615_v31  ;;  %3233 = vmatpush1.bf16.msra.mxu1 %v5657_v32  ;;  %v6683_v31 = vrot.slane %v6675_v28, %v6672_v26  ;;  %v6688_v32 = vrot.slane %v6675_v28, %v293_v27 }
  0xeb   :  { %1017 = vmatprep.subr.bf16.mxu0 %v5620_v33  ;;  %3234 = vmatprep.subr.bf16.mxu1 %v5665_v34 }
  0xee   :  { %1018 = vmatpush1.bf16.msra.mxu0 %v5618_v36  ;;  %3235 = vmatpush1.bf16.msra.mxu1 %v5663_v37  ;;  %v6692_v36 = vrot.slane %v6675_v28, %v6678_v29  ;;  %v6697_v37 = vrot.slane %v6675_v28, %v7491_v30 }
  0xef   :  { %3283 = vmatprep.subr.bf16.mxu0 %v5626_v38  ;;  %3236 = vmatprep.subr.bf16.mxu1 %v5671_v39  ;;  %v6700_v39 = vstv %s1066_s9 }
  0xf1   :  { %1036 = vmatmul.mubr.bf16.vlgmr.msra.gmra.mxu0 %v6635_v35  ;;  %v5642_v35 = vld [vmem:[#allocation10 + $0x280] ss:$16 sps:$4 sm:$0xff]  }
  0xf2   :  { %1045 = vmatprep.mubr.bf16.mxu0 %v7489_v2  ;;  %3284 = vmatpush1.bf16.msra.mxu0 %v5624_v40 }
  0xf3   :  { %3285 = vmatprep.subr.bf16.mxu0 %v5632_v41  ;;  %3237 = vmatpush2.bf16.msra.mxu1 %v5669_v42 }
  0xf4   :  { %3238 = vmatprep.subr.bf16.mxu1 %v5677_v43  ;;  %v305_v43 = vsub.s32 5, %v6669_v25 }
  0xf6   :  { %3286 = vmatpush1.bf16.msra.mxu0 %v5630_v44  ;;  %v313_v44 = vsub.s32 7, %v6669_v25 }
  0xf7   :  { %3287 = vmatprep.subr.bf16.mxu0 %v5638_v46  ;;  %3239 = vmatpush2.bf16.msra.mxu1 %v5675_v47 }
  0xf8   :  { %3240 = vmatprep.subr.bf16.mxu1 %v5683_v48 }
  0xf9   :  { %1046 = vmatmul.mubr.bf16.gmra.mxu0 %v6641_v45  ;;  %v5654_v45 = vld [vmem:[#allocation10 + $0x240] ss:$16 sps:$4 sm:$0xff]  }
  0xfa   :  { %1055 = vmatprep.mubr.bf16.mxu0 %v7489_v2  ;;  %3288 = vmatpush1.bf16.msra.mxu0 %v5636_v49 }
  0xfb   :  { %3289 = vmatprep.subr.bf16.mxu0 %v5644_v50  ;;  %3241 = vmatpush2.bf16.msra.mxu1 %v5681_v51 }
  0xfc   :  { %3242 = vmatprep.subr.bf16.mxu1 %v5689_v52 }
  0xfe   :  { %3290 = vmatpush1.bf16.msra.mxu0 %v5642_v35 }
  0xff   :  { %3291 = vmatprep.subr.bf16.mxu0 %v5650_v53  ;;  %3243 = vmatpush2.bf16.msra.mxu1 %v5687_v55 }
 0x100   :  { %3244 = vmatprep.subr.bf16.mxu1 %v5695_v56 }
 0x101   :  { %1056 = vmatmul.mubr.bf16.gmra.mxu0 %v6647_v54  ;;  %v5711_v54 = vld [vmem:[#allocation10 + $0x100] ss:$16 sps:$4 sm:$0xff]  }
 0x102   :  { %3292 = vmatpush1.bf16.msra.mxu0 %v5648_v57 }
 0x103   :  { %3293 = vmatprep.subr.bf16.mxu0 %v5656_v58  ;;  %3245 = vmatpush2.bf16.msra.mxu1 %v5693_v59 }
 0x104   :  { %3246 = vmatprep.subr.bf16.mxu1 %v5701_v60 }
 0x106   :  { %3294 = vmatpush1.bf16.msra.mxu0 %v5654_v45 }
 0x107   :  { %3295 = vmatprep.subr.bf16.mxu0 %v5662_v61  ;;  %3247 = vmatpush2.bf16.msra.mxu1 %v5699_v62 }
 0x108   :  { %3248 = vmatprep.subr.bf16.mxu1 %v5707_v63 }
 0x10a   :  { %3296 = vmatpush1.bf16.msra.mxu0 %v5660_v0 }
 0x10b   :  { %3297 = vmatprep.subr.bf16.mxu0 %v5668_v1  ;;  %3249 = vmatpush2.bf16.msra.mxu1 %v5705_v3 }
 0x10c   :  { %3250 = vmatprep.subr.bf16.mxu1 %v5713_v4 }
 0x10e   :  { %3298 = vmatpush1.bf16.msra.mxu0 %v5666_v5 }
 0x10f   :  { %3299 = vmatprep.subr.bf16.mxu0 %v5674_v6  ;;  %3251 = vmatpush2.bf16.msra.mxu1 %v5711_v54 }
 0x110   :  { %3346 = vmatprep.subr.bf16.mxu1 %v5719_v7 }
 0x112   :  { %3300 = vmatpush2.bf16.msra.mxu0 %v5672_v8 }
 0x113   :  { %3301 = vmatprep.subr.bf16.mxu0 %v5680_v9 }
 0x116   :  { %3302 = vmatpush2.bf16.msra.mxu0 %v5678_v10 }
 0x117   :  { %3303 = vmatprep.subr.bf16.mxu0 %v5686_v11 }
 0x11a   :  { %3304 = vmatpush2.bf16.msra.mxu0 %v5684_v12 }
 0x11b   :  { %3305 = vmatprep.subr.bf16.mxu0 %v5692_v13  ;;  %v5717_v13 = vld [vmem:[#allocation10 + $0x4e0] ss:$16 sps:$4 sm:$0xff]  }
 0x11e   :  { %3306 = vmatpush2.bf16.msra.mxu0 %v5690_v14 }
 0x11f   :  { %3307 = vmatprep.subr.bf16.mxu0 %v5698_v15  ;;  %v5720_v15 = vld [vmem:[#allocation10 + $0x6e0] ss:$16 sps:$4 sm:$0xff]  }
 0x122   :  { %3308 = vmatpush2.bf16.msra.mxu0 %v5696_v16  ;;  %v5725_v16 = vld [vmem:[#allocation10 + $0x4c4] ss:$16 sps:$4 sm:$0xff]  }
 0x123   :  { %3309 = vmatprep.subr.bf16.mxu0 %v5704_v17 }
 0x126   :  { %3310 = vmatpush2.bf16.msra.mxu0 %v5702_v18 }
 0x127   :  { %3311 = vmatprep.subr.bf16.mxu0 %v5710_v19 }
 0x12a   :  { %3312 = vmatpush2.bf16.msra.mxu0 %v5708_v20 }
 0x12b   :  { %3313 = vmatprep.subr.bf16.mxu0 %v5716_v21 }
 0x12e   :  { %3314 = vmatpush2.bf16.msra.mxu0 %v5714_v22 }
 0x12f   :  { %3409 = vmatprep.subr.bf16.mxu0 %v5722_v23 }
 0x170   :  { %v785_v33 = vpop.f32.mrf.mxu0  ;;  %v848_v34 = vpop.f32.mrf.mxu1 }
 0x171   :  { %v786_v38 = vadd.f32 %v785_v33, %v6683_v31  ;;  %v849_v40 = vadd.f32 %v848_v34, %v6688_v32 }
 0x172   :  { %v787_v41 = vpop.f32.mrf.mxu0  ;;  %v850_v42 = vpop.f32.mrf.mxu1 }
 0x173   :  { %v1128_v46 = vmul.f32 %v6700_v39, %v786_v38  ;;  %v1130_v47 = vmul.f32 %v6700_v39, %v849_v40  ;;  %v788_v48 = vadd.f32 %v787_v41, %v6692_v36  ;;  %v851_v49 = vadd.f32 %v850_v42, %v6697_v37  ;;  %v5728_v42 = vld [vmem:[#allocation10 + $0x6c4] ss:$16 sps:$4 sm:$0xff]  }
 0x174   :  { %v789_v50 = vpop.f32.mrf.mxu0  ;;  %v852_v51 = vpop.f32.mrf.mxu1  ;;  %vm1067_vm0 = vcmp.gt.f32.partialorder %v786_v38, 0.0  ;;  %vm1069_vm1 = vcmp.gt.f32.partialorder %v849_v40, 0.0 }
 0x175   :  { %v790_v52 = vadd.f32 %v789_v50, %v6683_v31  ;;  %v853_v35 = vadd.f32 %v852_v51, %v6688_v32  ;;  %vm1068_vm2 = vcmp.gt.f32.partialorder %v788_v48, 0.0  ;;  %v1129_v53 = vmul.f32 %v6700_v39, %v788_v48 }
 0x176   :  { %vm1070_vm3 = vcmp.gt.f32.partialorder %v851_v49, 0.0  ;;  %v1131_v55 = vmul.f32 %v6700_v39, %v851_v49  ;;  %v791_v56 = vpop.f32.mrf.mxu0  ;;  %v854_v57 = vpop.f32.mrf.mxu1  ;;  %v1188_v60 = vsel %vm1067_vm0, %v786_v38, %v1128_v46  ;;  %v1190_v45 = vsel %vm1069_vm1, %v849_v40, %v1130_v47 }
 0x177   :  { %vm1077_vm4 = vcmp.gt.f32.partialorder %v790_v52, 0.0  ;;  %v1138_v58 = vmul.f32 %v6700_v39, %v790_v52  ;;  %vm1079_vm5 = vcmp.gt.f32.partialorder %v853_v35, 0.0  ;;  %v1140_v59 = vmul.f32 %v6700_v39, %v853_v35 }
 0x178   :  { %v792_v61 = vadd.f32 %v791_v56, %v6692_v36  ;;  %v855_v62 = vadd.f32 %v854_v57, %v6697_v37  ;;  %v795_v63 = vpop.f32.mrf.mxu0  ;;  %v858_v0 = vpop.f32.mrf.mxu1  ;;  %v1189_v4 = vsel %vm1068_vm2, %v788_v48, %v1129_v53  ;;  %v1191_v54 = vsel %vm1070_vm3, %v851_v49, %v1131_v55  ;;  %v5723_v48 = vld [vmem:[#allocation10 + $0x4c0] ss:$16 sps:$4 sm:$0xff]  }
 0x179   :  { %v1198_v1 = vsel %vm1077_vm4, %v790_v52, %v1138_v58  ;;  %v1200_v3 = vsel %vm1079_vm5, %v853_v35, %v1140_v59  ;;  %v6719_v5 = vadd.f32 %v795_v63, %v6683_v31  ;;  %v6724_v8 = vadd.f32 %v858_v0, %v6688_v32  ;;  %v5726_v57 = vld [vmem:[#allocation10 + $0x6c0] ss:$16 sps:$4 sm:$0xff]   ;;  %v5731_v58 = vld [vmem:[#allocation10 + $0x4a4] ss:$16 sps:$4 sm:$0xff]  }
 0x17a   :  { %vm1078_vm6 = vcmp.gt.f32.partialorder %v792_v61, 0.0  ;;  %v1139_v6 = vmul.f32 %v6700_v39, %v792_v61  ;;  %v797_v7 = vpop.f32.mrf.mxu0  ;;  %v860_v9 = vpop.f32.mrf.mxu1  ;;  %v6726_v10 = vpack.c.bf16 %v1198_v1, %v1188_v60  ;;  %v6728_v11 = vpack.c.bf16 %v1200_v3, %v1190_v45  ;;  %v5734_v63 = vld [vmem:[#allocation10 + $0x6a4] ss:$16 sps:$4 sm:$0xff]  }
 0x17b   :  { %vm1080_vm7 = vcmp.gt.f32.partialorder %v855_v62, 0.0  ;;  %v1141_v12 = vmul.f32 %v6700_v39, %v855_v62  ;;  %vm1087_vm8 = vcmp.gt.f32.partialorder %v6719_v5, 0.0  ;;  %v6734_v17 = vmul.f32 %v6700_v39, %v6719_v5 }
 0x17c   :  { %v1199_v14 = vsel %vm1078_vm6, %v792_v61, %v1139_v6  ;;  %v798_v18 = vadd.f32 %v797_v7, %v6692_v36  ;;  %v799_v19 = vpop.f32.mrf.mxu0  ;;  %v862_v20 = vpop.f32.mrf.mxu1  ;;  %v6743_v24 = vadd.f32 %v860_v9, %v6697_v37  ;;  %vm1089_vm9 = vcmp.gt.f32.partialorder %v6724_v8, 0.0  ;;  %v5737_v6 = vld [vmem:[#allocation10 + $0x484] ss:$16 sps:$4 sm:$0xff]  }
 0x17d   :  { %v6737_v21 = vpack.c.bf16 %v1199_v14, %v1189_v4  ;;  %v1201_v22 = vsel %vm1080_vm7, %v855_v62, %v1141_v12  ;;  %v6740_v23 = vadd.f32 %v799_v19, %v6683_v31  ;;  %v6750_v40 = vadd.f32 %v862_v20, %v6688_v32  ;;  %v5729_v62 = vld [vmem:[#allocation10 + $0x4a0] ss:$16 sps:$4 sm:$0xff]  }
 0x17e   :  { %v6745_v33 = vpack.c.bf16 %v1201_v22, %v1191_v54  ;;  %v1149_v34 = vmul.f32 %v6700_v39, %v798_v18  ;;  %v801_v38 = vpop.f32.mrf.mxu0  ;;  %v864_v41 = vpop.f32.mrf.mxu1  ;;  %vm1088_vm10 = vcmp.gt.f32.partialorder %v798_v18, 0.0  ;;  %v6755_v46 = vmul.f32 %v6700_v39, %v6724_v8  ;;  %v5732_v4 = vld [vmem:[#allocation10 + $0x6a0] ss:$16 sps:$4 sm:$0xff]  }
 0x17f   :  { %3252 = vmatprep.mubr.bf16.mxu1 %v6737_v21  ;;  %vm1097_vm11 = vcmp.gt.f32.partialorder %v6740_v23, 0.0  ;;  %v1158_v47 = vmul.f32 %v6700_v39, %v6740_v23  ;;  %vm1090_vm12 = vcmp.gt.f32.partialorder %v6743_v24, 0.0  ;;  %v1151_v49 = vmul.f32 %v6700_v39, %v6743_v24 }
 0x180   :  { %3315 = vmatprep.mubr.bf16.mxu0 %v6745_v33  ;;  %3253 = vmatmul.mubr.bf16.vlgmr.msra.gmra.mxu1 %v6726_v10  ;;  %v802_v50 = vadd.f32 %v801_v38, %v6692_v36  ;;  %v805_v51 = vpop.f32.mrf.mxu0  ;;  %v865_v52 = vadd.f32 %v864_v41, %v6697_v37  ;;  %v868_v35 = vpop.f32.mrf.mxu1  ;;  %vm1099_vm13 = vcmp.gt.f32.partialorder %v6750_v40, 0.0  ;;  %v6771_v53 = vmul.f32 %v6700_v39, %v6750_v40  ;;  %v5735_v38 = vld [vmem:[#allocation10 + $0x480] ss:$16 sps:$4 sm:$0xff]  }
 0x181   :  { %3316 = vmatmul.mubr.bf16.vlgmr.msra.gmra.mxu0 %v6728_v11  ;;  %3347 = vmatpush1.bf16.msra.mxu1 %v5717_v13  ;;  %v6774_v55 = vadd.f32 %v805_v51, %v6683_v31  ;;  %v6777_v56 = vadd.f32 %v868_v35, %v6688_v32  ;;  %v1209_v61 = vsel %vm1088_vm10, %v798_v18, %v1149_v34  ;;  %v5738_v51 = vld [vmem:[#allocation10 + $0x680] ss:$16 sps:$4 sm:$0xff]   ;;  %v5743_v35 = vld [vmem:[#allocation10 + $0x464] ss:$16 sps:$4 sm:$0xff]  }
 0x182   :  { %3410 = vmatpush1.bf16.msra.mxu0 %v5720_v15  ;;  %3348 = vmatprep.subr.bf16.mxu1 %v5725_v16  ;;  %vm1098_vm14 = vcmp.gt.f32.partialorder %v802_v50, 0.0  ;;  %v1159_v59 = vmul.f32 %v6700_v39, %v802_v50  ;;  %vm1100_vm15 = vcmp.gt.f32.partialorder %v865_v52, 0.0  ;;  %v807_v60 = vpop.f32.mrf.mxu0  ;;  %v870_v45 = vpop.f32.mrf.mxu1  ;;  %v1161_v1 = vmul.f32 %v6700_v39, %v865_v52 }
 0x183   :  { %3411 = vmatprep.subr.bf16.mxu0 %v5728_v42  ;;  %vm1107_vm0 = vcmp.gt.f32.partialorder %v6774_v55, 0.0  ;;  %v1168_v0 = vmul.f32 %v6700_v39, %v6774_v55  ;;  %v808_v3 = vadd.f32 %v807_v60, %v6692_v36  ;;  %vm1109_vm1 = vcmp.gt.f32.partialorder %v6777_v56, 0.0  ;;  %v5749_v60 = vld [vmem:[#allocation10 + $0x444] ss:$16 sps:$4 sm:$0xff]  }
 0x184   :  { %v6789_v54 = vmul.f32 %v6700_v39, %v6777_v56  ;;  %v809_v7 = vpop.f32.mrf.mxu0  ;;  %v871_v9 = vadd.f32 %v870_v45, %v6697_v37  ;;  %v872_v12 = vpop.f32.mrf.mxu1  ;;  %v1219_v13 = vsel %vm1098_vm14, %v802_v50, %v1159_v59  ;;  %v1208_v16 = vsel %vm1087_vm8, %v6719_v5, %v6734_v17  ;;  %v5744_v59 = vld [vmem:[#allocation10 + $0x660] ss:$16 sps:$4 sm:$0xff]  }
 0x185   :  { %3349 = vmatpush1.bf16.msra.mxu1 %v5723_v48  ;;  %vm1108_vm2 = vcmp.gt.f32.partialorder %v808_v3, 0.0  ;;  %v810_v14 = vadd.f32 %v809_v7, %v6683_v31  ;;  %v873_v15 = vadd.f32 %v872_v12, %v6688_v32  ;;  %v1169_v18 = vmul.f32 %v6700_v39, %v808_v3  ;;  %v5740_v32 = vld [vmem:[#allocation10 + $0x684] ss:$16 sps:$4 sm:$0xff]   ;;  %v5750_v7 = vld [vmem:[#allocation10 + $0x640] ss:$16 sps:$4 sm:$0xff]  }
 0x186   :  { %3412 = vmatpush1.bf16.msra.mxu0 %v5726_v57  ;;  %3350 = vmatprep.subr.bf16.mxu1 %v5731_v58  ;;  %vm1110_vm3 = vcmp.gt.f32.partialorder %v871_v9, 0.0  ;;  %v811_v19 = vpop.f32.mrf.mxu0  ;;  %v6800_v20 = vpack.c.bf16 %v1219_v13, %v1209_v61  ;;  %v1218_v22 = vsel %vm1097_vm11, %v6740_v23, %v1158_v47  ;;  %v874_v31 = vpop.f32.mrf.mxu1  ;;  %v1171_v5 = vmul.f32 %v6700_v39, %v871_v9 }
 0x187   :  { %3413 = vmatprep.subr.bf16.mxu0 %v5734_v63  ;;  %vm1117_vm4 = vcmp.gt.f32.partialorder %v810_v14, 0.0  ;;  %v1178_v34 = vmul.f32 %v6700_v39, %v810_v14  ;;  %v812_v17 = vadd.f32 %v811_v19, %v6692_v36  ;;  %v1180_v41 = vmul.f32 %v6700_v39, %v873_v15 }
 0x188   :  { %3262 = vmatprep.mubr.bf16.mxu1 %v6800_v20  ;;  %v6810_v42 = vpack.c.bf16 %v1218_v22, %v1208_v16  ;;  %v875_v48 = vadd.f32 %v874_v31, %v6697_v37  ;;  %v1211_v23 = vsel %vm1090_vm12, %v6743_v24, %v1151_v49  ;;  %v1221_v50 = vsel %vm1100_vm15, %v865_v52, %v1161_v1  ;;  %v5741_v49 = vld [vmem:[#allocation10 + $0x460] ss:$16 sps:$4 sm:$0xff]   ;;  %v5746_v52 = vld [vmem:[#allocation10 + $0x664] ss:$16 sps:$4 sm:$0xff]  }
 0x189   :  { %3351 = vmatpush1.bf16.msra.mxu1 %v5729_v62  ;;  %vm1118_vm5 = vcmp.gt.f32.partialorder %v812_v17, 0.0  ;;  %v1179_v47 = vmul.f32 %v6700_v39, %v812_v17  ;;  %v1210_v36 = vsel %vm1089_vm9, %v6724_v8, %v6755_v46  ;;  %v6823_v57 = vpack.c.bf16 %v1221_v50, %v1211_v23 }
 0x18a   :  { %3414 = vmatpush1.bf16.msra.mxu0 %v5732_v4  ;;  %3352 = vmatprep.subr.bf16.mxu1 %v5737_v6  ;;  %vm1120_vm6 = vcmp.gt.f32.partialorder %v875_v48, 0.0  ;;  %v1181_v37 = vmul.f32 %v6700_v39, %v875_v48  ;;  %v1220_v24 = vsel %vm1099_vm13, %v6750_v40, %v6771_v53  ;;  %vm1119_vm7 = vcmp.gt.f32.partialorder %v873_v15, 0.0 }
 0x18b   :  { %3415 = vmatprep.subr.bf16.mxu0 %v5740_v32  ;;  %3263 = vmatmul.mubr.bf16.gmra.mxu1 %v6810_v42  ;;  %v6830_v8 = vpack.c.bf16 %v1220_v24, %v1210_v36  ;;  %v1229_v46 = vsel %vm1108_vm2, %v808_v3, %v1169_v18  ;;  %v1239_v58 = vsel %vm1118_vm5, %v812_v17, %v1179_v47  ;;  %v5752_v3 = vld [vmem:[#allocation10 + $0x644] ss:$16 sps:$4 sm:$0xff]   ;;  %v5753_v18 = vld [vmem:[#allocation10 + $0x420] ss:$16 sps:$4 sm:$0xff]  }
 0x18c   :  { %3325 = vmatprep.mubr.bf16.mxu0 %v6823_v57  ;;  %v6835_v45 = vpack.c.bf16 %v1239_v58, %v1229_v46  ;;  %v1228_v40 = vsel %vm1107_vm0, %v6774_v55, %v1168_v0  ;;  %v1238_v53 = vsel %vm1117_vm4, %v810_v14, %v1178_v34  ;;  %v1231_v61 = vsel %vm1110_vm3, %v871_v9, %v1171_v5  ;;  %v5747_v0 = vld [vmem:[#allocation10 + $0x440] ss:$16 sps:$4 sm:$0xff]   ;;  %v5755_v9 = vld [vmem:[#allocation10 + $0x424] ss:$16 sps:$4 sm:$0xff]  }
 0x18d   :  { %3353 = vmatpush1.bf16.msra.mxu1 %v5735_v38  ;;  %3326 = vmatmul.mubr.bf16.gmra.mxu0 %v6830_v8  ;;  %v1241_v62 = vsel %vm1120_vm6, %v875_v48, %v1181_v37  ;;  %v1230_v1 = vsel %vm1109_vm1, %v6777_v56, %v6789_v54  ;;  %v1240_v55 = vsel %vm1119_vm7, %v873_v15, %v1180_v41  ;;  %v5758_v15 = vld [vmem:[#allocation10 + $0x624] ss:$16 sps:$4 sm:$0xff]   ;;  %v5756_v32 = vld [vmem:[#allocation10 + $0x620] ss:$16 sps:$4 sm:$0xff]  }
 0x18e   :  { %3416 = vmatpush1.bf16.msra.mxu0 %v5738_v51  ;;  %3354 = vmatprep.subr.bf16.mxu1 %v5743_v35  ;;  %v6844_v63 = vpack.c.bf16 %v1241_v62, %v1231_v61  ;;  %v6852_v4 = vpack.c.bf16 %v1238_v53, %v1228_v40  ;;  %v6857_v6 = vrot.slane %v6675_v28, %v305_v43  ;;  %v5761_v34 = vld [vmem:[#allocation10 + $0x404] ss:$16 sps:$4 sm:$0xff]   ;;  %v5759_v38 = vld [vmem:[#allocation10 + $0x400] ss:$16 sps:$4 sm:$0xff]  }
 0x18f   :  { %3417 = vmatprep.subr.bf16.mxu0 %v5746_v52  ;;  %3272 = vmatprep.mubr.bf16.mxu1 %v6835_v45  ;;  %v6867_v54 = vrot.slane %v6675_v28, %v313_v44  ;;  %v6869_v13 = vpack.c.bf16 %v1240_v55, %v1230_v1  ;;  %v5764_v41 = vld [vmem:[#allocation10 + $0x604] ss:$16 sps:$4 sm:$0xff]   ;;  %v5762_v35 = vld [vmem:[#allocation10 + $0x600] ss:$16 sps:$4 sm:$0xff]  }
 0x190   :  { %v6859_v12 = vpop.f32.mrf.mxu0  ;;  %3335 = vmatprep.mubr.bf16.mxu0 %v6844_v63  ;;  %v6862_v56 = vpop.f32.mrf.mxu1  ;;  %v5767_v37 = vld [vmem:[#allocation10 + $0x5e4] ss:$16 sps:$4 sm:$0xff]   ;;  %v5765_v40 = vld [vmem:[#allocation10 + $0x5e0] ss:$16 sps:$4 sm:$0xff]  }
 0x191   :  { %3355 = vmatpush1.bf16.msra.mxu1 %v5741_v49  ;;  %v5770_v49 = vld [vmem:[#allocation10 + $0x7e4] ss:$16 sps:$4 sm:$0xff]   ;;  %v5768_v53 = vld [vmem:[#allocation10 + $0x7e0] ss:$16 sps:$4 sm:$0xff]  }
 0x192   :  { %3418 = vmatpush1.bf16.msra.mxu0 %v5744_v59  ;;  %3356 = vmatprep.subr.bf16.mxu1 %v5749_v60  ;;  %v913_v43 = vpop.f32.mrf.mxu0  ;;  %v976_v14 = vpop.f32.mrf.mxu1  ;;  %v5773_v61 = vld [vmem:[#allocation10 + $0x5c4] ss:$16 sps:$4 sm:$0xff]  }
 0x193   :  { %3419 = vmatprep.subr.bf16.mxu0 %v5752_v3  ;;  %3273 = vmatmul.mubr.bf16.gmra.mxu1 %v6852_v4  ;;  %v914_v16 = vadd.f32 %v913_v43, %v6857_v6  ;;  %v977_v22 = vadd.f32 %v976_v14, %v6867_v54  ;;  %v5776_v55 = vld [vmem:[#allocation10 + $0x7c4] ss:$16 sps:$4 sm:$0xff]   ;;  %v5771_v3 = vld [vmem:[#allocation10 + $0x5c0] ss:$16 sps:$4 sm:$0xff]  }
 0x194   :  { %v6873_v19 = vpop.f32.mrf.mxu0  ;;  %v6876_v44 = vpop.f32.mrf.mxu1  ;;  %v5777_v14 = vld [vmem:[#allocation10 + $0x5a0] ss:$16 sps:$4 sm:$0xff]  }
 0x195   :  { %3357 = vmatpush1.bf16.msra.mxu1 %v5747_v0  ;;  %v1133_v31 = vmul.f32 %v6700_v39, %v914_v16  ;;  %3336 = vmatmul.mubr.bf16.gmra.mxu0 %v6869_v13  ;;  %vm1072_vm8 = vcmp.gt.f32.partialorder %v914_v16, 0.0  ;;  %v1135_v48 = vmul.f32 %v6700_v39, %v977_v22  ;;  %vm1074_vm9 = vcmp.gt.f32.partialorder %v977_v22, 0.0 }
 0x196   :  { %3420 = vmatpush1.bf16.msra.mxu0 %v5750_v7  ;;  %3358 = vmatprep.subr.bf16.mxu1 %v5755_v9  ;;  %v917_v5 = vpop.f32.mrf.mxu0  ;;  %v980_v17 = vpop.f32.mrf.mxu1  ;;  %v5774_v7 = vld [vmem:[#allocation10 + $0x7c0] ss:$16 sps:$4 sm:$0xff]   ;;  %v5779_v9 = vld [vmem:[#allocation10 + $0x5a4] ss:$16 sps:$4 sm:$0xff]  }
 0x197   :  { %3421 = vmatprep.subr.bf16.mxu0 %v5758_v15  ;;  %v918_v23 = vadd.f32 %v917_v5, %v6857_v6  ;;  %v981_v47 = vadd.f32 %v980_v17, %v6867_v54  ;;  %v1193_v51 = vsel %vm1072_vm8, %v914_v16, %v1133_v31  ;;  %v1195_v46 = vsel %vm1074_vm9, %v977_v22, %v1135_v48  ;;  %v5782_v15 = vld [vmem:[#allocation10 + $0x7a4] ss:$16 sps:$4 sm:$0xff]   ;;  %v5780_v31 = vld [vmem:[#allocation10 + $0x7a0] ss:$16 sps:$4 sm:$0xff]  }
 0x198   :  { %v6883_v50 = vpop.f32.mrf.mxu0  ;;  %v6891_v62 = vpop.f32.mrf.mxu1  ;;  %v301_v16 = vsub.s32 4, %v6669_v25  ;;  %v5788_v5 = vld [vmem:[#allocation10 + $0x784] ss:$16 sps:$4 sm:$0xff]   ;;  %v5783_v48 = vld [vmem:[#allocation10 + $0x580] ss:$16 sps:$4 sm:$0xff]  }
 0x199   :  { %3359 = vmatpush1.bf16.msra.mxu1 %v5753_v18  ;;  %vm1082_vm10 = vcmp.gt.f32.partialorder %v918_v23, 0.0  ;;  %v1143_v36 = vmul.f32 %v6700_v39, %v918_v23  ;;  %vm1084_vm11 = vcmp.gt.f32.partialorder %v981_v47, 0.0  ;;  %v1145_v24 = vmul.f32 %v6700_v39, %v981_v47 }
 0x19a   :  { %3422 = vmatpush1.bf16.msra.mxu0 %v5756_v32  ;;  %3360 = vmatprep.subr.bf16.mxu1 %v5761_v34  ;;  %v6889_v60 = vpop.f32.mrf.mxu0  ;;  %v6899_v43 = vpop.f32.mrf.mxu1  ;;  %v309_v18 = vsub.s32 6, %v6669_v25  ;;  %v5785_v32 = vld [vmem:[#allocation10 + $0x584] ss:$16 sps:$4 sm:$0xff]   ;;  %v6906_v17 = vrot.slane %v6675_v28, %v301_v16 }
 0x19b   :  { %3423 = vmatprep.subr.bf16.mxu0 %v5764_v41  ;;  %v1203_v52 = vsel %vm1082_vm10, %v918_v23, %v1143_v36  ;;  %v1205_v59 = vsel %vm1084_vm11, %v981_v47, %v1145_v24  ;;  %v5786_v23 = vld [vmem:[#allocation10 + $0x780] ss:$16 sps:$4 sm:$0xff]   ;;  %v5791_v47 = vld [vmem:[#allocation10 + $0x564] ss:$16 sps:$4 sm:$0xff]  }
 0x19c   :  { %v6887_v58 = vpack.c.bf16 %v1203_v52, %v1193_v51  ;;  %v6893_v1 = vpack.c.bf16 %v1205_v59, %v1195_v46  ;;  %v6897_v0 = vpop.f32.mrf.mxu0  ;;  %v6903_v34 = vpop.f32.mrf.mxu1  ;;  %v5794_v51 = vld [vmem:[#allocation10 + $0x764] ss:$16 sps:$4 sm:$0xff]   ;;  %v5789_v52 = vld [vmem:[#allocation10 + $0x560] ss:$16 sps:$4 sm:$0xff]  }
 0x19d   :  { %3361 = vmatpush1.bf16.msra.mxu1 %v5759_v38  ;;  %v6909_v38 = vrot.slane %v6675_v28, %v309_v18  ;;  %v916_v28 = vadd.f32 %v6873_v19, %v6906_v17  ;;  %v5792_v46 = vld [vmem:[#allocation10 + $0x760] ss:$16 sps:$4 sm:$0xff]   ;;  %v5797_v59 = vld [vmem:[#allocation10 + $0x544] ss:$16 sps:$4 sm:$0xff]  }
 0x19e   :  { %3424 = vmatpush1.bf16.msra.mxu0 %v5762_v35  ;;  %3362 = vmatprep.subr.bf16.mxu1 %v5767_v37  ;;  %v927_v22 = vpop.f32.mrf.mxu0  ;;  %v990_v36 = vpop.f32.mrf.mxu1  ;;  %v912_v35 = vadd.f32 %v6859_v12, %v6906_v17  ;;  %v5800_v12 = vld [vmem:[#allocation10 + $0x744] ss:$16 sps:$4 sm:$0xff]  }
 0x19f   :  { %3425 = vmatprep.subr.bf16.mxu0 %v5770_v49  ;;  %3378 = vmatprep.mubr.bf16.mxu1 %v6887_v58  ;;  %v975_v37 = vadd.f32 %v6862_v56, %v6909_v38  ;;  %v979_v49 = vadd.f32 %v6876_v44, %v6909_v38  ;;  %v1142_v19 = vmul.f32 %v6700_v39, %v916_v28  ;;  %vm1081_vm14 = vcmp.gt.f32.partialorder %v916_v28, 0.0 }
 0x1a0   :  { %3441 = vmatprep.mubr.bf16.mxu0 %v6893_v1  ;;  %v6911_v41 = vpop.f32.mrf.mxu0  ;;  %v1132_v56 = vmul.f32 %v6700_v39, %v912_v35  ;;  %vm1071_vm12 = vcmp.gt.f32.partialorder %v912_v35, 0.0 }
 0x1a1   :  { %3363 = vmatpush2.bf16.msra.mxu1 %v5765_v40  ;;  %v6923_v40 = vpop.f32.mrf.mxu1  ;;  %vm1073_vm13 = vcmp.gt.f32.partialorder %v975_v37, 0.0  ;;  %v1144_v44 = vmul.f32 %v6700_v39, %v979_v49  ;;  %vm1083_vm15 = vcmp.gt.f32.partialorder %v979_v49, 0.0 }
 0x1a2   :  { %3426 = vmatpush2.bf16.msra.mxu0 %v5768_v53  ;;  %3364 = vmatprep.subr.bf16.mxu1 %v5773_v61  ;;  %v6919_v24 = vpop.f32.mrf.mxu0  ;;  %v1134_v53 = vmul.f32 %v6700_v39, %v975_v37  ;;  %v1192_v16 = vsel %vm1071_vm12, %v912_v35, %v1132_v56  ;;  %v5809_v35 = vld [vmem:[#allocation10 + $0x504] ss:$16 sps:$4 sm:$0xff]  }
 0x1a3   :  { %3427 = vmatprep.subr.bf16.mxu0 %v5776_v55  ;;  %v5795_v55 = vld [vmem:[#allocation10 + $0x540] ss:$16 sps:$4 sm:$0xff]  }
 0x1a4   :  { %v6928_v61 = vpop.f32.mrf.mxu0  ;;  %v1194_v18 = vsel %vm1073_vm13, %v975_v37, %v1134_v53  ;;  %v5807_v53 = vld [vmem:[#allocation10 + $0x500] ss:$16 sps:$4 sm:$0xff]  }
 0x1a5   :  { %3365 = vmatpush2.bf16.msra.mxu1 %v5771_v3  ;;  %v5798_v3 = vld [vmem:[#allocation10 + $0x740] ss:$16 sps:$4 sm:$0xff]  }
 0x1a6   :  { %3428 = vmatpush2.bf16.msra.mxu0 %v5774_v7  ;;  %3366 = vmatprep.subr.bf16.mxu1 %v5779_v9  ;;  %v5803_v7 = vld [vmem:[#allocation10 + $0x524] ss:$16 sps:$4 sm:$0xff]   ;;  %v996_v9 = vpop.f32.mrf.mxu1 }
 0x1a7   :  { %3429 = vmatprep.subr.bf16.mxu0 %v5782_v15  ;;  %v924_v15 = vadd.f32 %v6889_v60, %v6857_v6  ;;  %v5804_v60 = vld [vmem:[#allocation10 + $0x720] ss:$16 sps:$4 sm:$0xff]  }
 0x1a8   :  { %v6941_v37 = vpop.f32.mrf.mxu1 }
 0x1a9   :  { %3367 = vmatpush2.bf16.msra.mxu1 %v5777_v14  ;;  %v5806_v14 = vld [vmem:[#allocation10 + $0x724] ss:$16 sps:$4 sm:$0xff]   ;;  %vm1092_vm0 = vcmp.gt.f32.partialorder %v924_v15, 0.0 }
 0x1aa   :  { %3430 = vmatpush2.bf16.msra.mxu0 %v5780_v31  ;;  %3368 = vmatprep.subr.bf16.mxu1 %v5785_v32  ;;  %v1202_v31 = vsel %vm1081_vm14, %v916_v28, %v1142_v19  ;;  %v928_v32 = vadd.f32 %v927_v22, %v6857_v6  ;;  %v6947_v28 = vadd.f32 %v6891_v62, %v6909_v38 }
 0x1ab   :  { %3431 = vmatprep.subr.bf16.mxu0 %v5788_v5  ;;  %v937_v5 = vpop.f32.mrf.mxu0 }
 0x1ac   :  { %v1163_v56 = vmul.f32 %v6700_v39, %v928_v32  ;;  %vm1102_vm2 = vcmp.gt.f32.partialorder %v928_v32, 0.0  ;;  %vm1093_vm5 = vcmp.gt.f32.partialorder %v6947_v28, 0.0 }
 0x1ad   :  { %3369 = vmatpush2.bf16.msra.mxu1 %v5783_v48  ;;  %v6934_v48 = vld [vmem:[#allocation9 + $0x8] sm:$0x3] }
 0x1ae   :  { %3432 = vmatpush2.bf16.msra.mxu0 %v5786_v23  ;;  %3370 = vmatprep.subr.bf16.mxu1 %v5791_v47  ;;  %v1204_v23 = vsel %vm1083_vm15, %v979_v49, %v1144_v44  ;;  %v5801_v47 = vld [vmem:[#allocation10 + $0x520] ss:$16 sps:$4 sm:$0xff]   ;;  %v5812_v49 = vld [vmem:[#allocation10 + $0x704] ss:$16 sps:$4 sm:$0xff]  }
 0x1af   :  { %3433 = vmatprep.subr.bf16.mxu0 %v5794_v51  ;;  %v922_v51 = vadd.f32 %v6883_v50, %v6906_v17  ;;  %v1153_v50 = vmul.f32 %v6700_v39, %v924_v15  ;;  %v5810_v44 = vld [vmem:[#allocation10 + $0x700] ss:$16 sps:$4 sm:$0xff]  }
 0x1b1   :  { %3371 = vmatpush2.bf16.msra.mxu1 %v5789_v52  ;;  %v987_v52 = vadd.f32 %v6899_v43, %v6867_v54  ;;  %v6943_v22 = vpop.f32.mrf.mxu0  ;;  %v926_v43 = vadd.f32 %v6897_v0, %v6906_v17  ;;  %vm1091_vm1 = vcmp.gt.f32.partialorder %v922_v51, 0.0  ;;  %v1152_v0 = vmul.f32 %v6700_v39, %v922_v51 }
 0x1b2   :  { %3434 = vmatpush2.bf16.msra.mxu0 %v5792_v46  ;;  %3372 = vmatprep.subr.bf16.mxu1 %v5797_v59  ;;  %v991_v46 = vadd.f32 %v990_v36, %v6867_v54  ;;  %v6954_v36 = vrot.slane %v6934_v48, %v6678_v29  ;;  %v6956_v59 = vpack.c.bf16 %v1202_v31, %v1192_v16 }
 0x1b3   :  { %3435 = vmatprep.subr.bf16.mxu0 %v5800_v12  ;;  %v6958_v12 = vpack.c.bf16 %v1204_v23, %v1194_v18  ;;  %v1155_v62 = vmul.f32 %v6700_v39, %v987_v52  ;;  %vm1094_vm3 = vcmp.gt.f32.partialorder %v987_v52, 0.0  ;;  %v1162_v16 = vmul.f32 %v6700_v39, %v926_v43  ;;  %v5818_v18 = vld [vmem:[#allocation10 + $0xec] ss:$16 sps:$4 sm:$0xff]  }
 0x1b4   :  { %v1165_v19 = vmul.f32 %v6700_v39, %v991_v46  ;;  %vm1104_vm4 = vcmp.gt.f32.partialorder %v991_v46, 0.0  ;;  %v934_v31 = vadd.f32 %v6919_v24, %v6857_v6  ;;  %v1213_v23 = vsel %vm1092_vm0, %v924_v15, %v1153_v50 }
 0x1b5   :  { %3373 = vmatpush2.bf16.msra.mxu1 %v5795_v55  ;;  %v989_v55 = vadd.f32 %v6903_v34, %v6909_v38  ;;  %vm1101_vm6 = vcmp.gt.f32.partialorder %v926_v43, 0.0  ;;  %v938_v34 = vadd.f32 %v937_v5, %v6857_v6  ;;  %v1215_v30 = vsel %vm1094_vm3, %v987_v52, %v1155_v62 }
 0x1b6   :  { %3436 = vmatpush2.bf16.msra.mxu0 %v5798_v3  ;;  %3374 = vmatprep.subr.bf16.mxu1 %v5803_v7  ;;  %v5815_v3 = vld [vmem:[#allocation10 + $0x8e4] ss:$16 sps:$4 sm:$0xff]   ;;  %v1000_v7 = vpop.f32.mrf.mxu1  ;;  %v1225_v24 = vsel %vm1104_vm4, %v991_v46, %v1165_v19  ;;  %v6984_v6 = vadd.f32 %v6911_v41, %v6906_v17  ;;  %v1212_v5 = vsel %vm1091_vm1, %v922_v51, %v1152_v0  ;;  %v5824_v46 = vld [vmem:[#allocation10 + $0xcc] ss:$16 sps:$4 sm:$0xff]   ;;  %vm1112_vm8 = vcmp.gt.f32.partialorder %v934_v31, 0.0 }
 0x1b7   :  { %3437 = vmatprep.subr.bf16.mxu0 %v5806_v14  ;;  %v6966_v14 = vpop.f32.mrf.mxu0  ;;  %v1001_v2 = vadd.f32 %v1000_v7, %v6867_v54  ;;  %vm1103_vm7 = vcmp.gt.f32.partialorder %v989_v55, 0.0  ;;  %v1164_v15 = vmul.f32 %v6700_v39, %v989_v55  ;;  %v1173_v52 = vmul.f32 %v6700_v39, %v934_v31  ;;  %v5822_v0 = vld [vmem:[#allocation10 + $0xc8] ss:$16 sps:$4 sm:$0xff]  }
 0x1b8   :  { %v1222_v62 = vsel %vm1101_vm6, %v926_v43, %v1162_v16  ;;  %v936_v51 = vadd.f32 %v6928_v61, %v6906_v17  ;;  %v7002_v19 = vpack.c.bf16 %v1225_v24, %v1215_v30  ;;  %vm1122_vm10 = vcmp.gt.f32.partialorder %v938_v34, 0.0  ;;  %v5827_v61 = vld [vmem:[#allocation10 + $0x8a4] ss:$16 sps:$4 sm:$0xff]  }
 0x1b9   :  { %3375 = vmatpush2.bf16.msra.mxu1 %v5801_v47  ;;  %v997_v47 = vadd.f32 %v996_v9, %v6867_v54  ;;  %v5816_v9 = vld [vmem:[#allocation10 + $0xe8] ss:$16 sps:$4 sm:$0xff]   ;;  %v6987_v50 = vpop.f32.mrf.mxu0  ;;  %v6991_v54 = vadd.f32 %v6923_v40, %v6909_v38  ;;  %v5819_v40 = vld [vmem:[#allocation10 + $0x8c0] ss:$16 sps:$4 sm:$0xff]   ;;  %v1185_v43 = vmul.f32 %v6700_v39, %v1001_v2  ;;  %vm1124_vm11 = vcmp.gt.f32.partialorder %v1001_v2, 0.0 }
 0x1ba   :  { %3438 = vmatpush2.bf16.msra.mxu0 %v5804_v60  ;;  %3376 = vmatprep.subr.bf16.mxu1 %v5809_v35  ;;  %v1223_v60 = vsel %vm1102_vm2, %v928_v32, %v1163_v56  ;;  %v1154_v35 = vmul.f32 %v6700_v39, %v6947_v28  ;;  %v5821_v32 = vld [vmem:[#allocation10 + $0x8c4] ss:$16 sps:$4 sm:$0xff]   ;;  %v1224_v17 = vsel %vm1103_vm7, %v989_v55, %v1164_v15  ;;  %vm1111_vm12 = vcmp.gt.f32.partialorder %v6984_v6, 0.0 }
 0x1bb   :  { %3439 = vmatprep.subr.bf16.mxu0 %v5812_v49  ;;  %v5813_v49 = vld [vmem:[#allocation10 + $0x8e0] ss:$16 sps:$4 sm:$0xff]   ;;  %v6994_v56 = vpack.c.bf16 %v1223_v60, %v1213_v23  ;;  %v1175_v41 = vmul.f32 %v6700_v39, %v997_v47  ;;  %vm1114_vm9 = vcmp.gt.f32.partialorder %v997_v47, 0.0  ;;  %v1172_v7 = vmul.f32 %v6700_v39, %v6984_v6 }
 0x1bc   :  { %v1214_v30 = vsel %vm1093_vm5, %v6947_v28, %v1154_v35  ;;  %v7016_v16 = vpack.c.bf16 %v1222_v62, %v1212_v5  ;;  %v1233_v28 = vsel %vm1112_vm8, %v934_v31, %v1173_v52  ;;  %v5825_v60 = vld [vmem:[#allocation10 + $0x8a0] ss:$16 sps:$4 sm:$0xff]   ;;  %v1245_v35 = vsel %vm1124_vm11, %v1001_v2, %v1185_v43  ;;  %v5836_v2 = vld [vmem:[#allocation10 + $0x8c] ss:$16 sps:$4 sm:$0xff]  }
 0x1bd   :  { %3377 = vmatpush2.bf16.msra.mxu1 %v5807_v53  ;;  %v1183_v53 = vmul.f32 %v6700_v39, %v938_v34  ;;  %v7023_v23 = vpack.c.bf16 %v1224_v17, %v1214_v30  ;;  %v1174_v15 = vmul.f32 %v6700_v39, %v6991_v54  ;;  %vm1121_vm13 = vcmp.gt.f32.partialorder %v936_v51, 0.0  ;;  %v5831_v5 = vld [vmem:[#allocation10 + $0x880] ss:$16 sps:$4 sm:$0xff]  }
 0x1be   :  { %3440 = vmatpush2.bf16.msra.mxu0 %v5810_v44  ;;  %3472 = vmatprep.subr.bf16.mxu1 %v5815_v3  ;;  %v999_v44 = vadd.f32 %v6941_v37, %v6909_v38  ;;  %v1043_v3 = vpop.f32.mrf.mxu0  ;;  %v5830_v38 = vld [vmem:[#allocation10 + $0xac] ss:$16 sps:$4 sm:$0xff]   ;;  %v1182_v37 = vmul.f32 %v6700_v39, %v936_v51  ;;  %vm1113_vm14 = vcmp.gt.f32.partialorder %v6991_v54, 0.0  ;;  %v5837_v30 = vld [vmem:[#allocation10 + $0x860] ss:$16 sps:$4 sm:$0xff]  }
 0x1bf   :  { %3535 = vmatprep.subr.bf16.mxu0 %v5818_v18  ;;  %v1243_v55 = vsel %vm1122_vm10, %v938_v34, %v1183_v53  ;;  %v1235_v18 = vsel %vm1114_vm9, %v997_v47, %v1175_v41  ;;  %v1044_v24 = vadd.f32 %v1043_v3, %v6954_v36  ;;  %v5828_v47 = vld [vmem:[#allocation10 + $0xa8] ss:$16 sps:$4 sm:$0xff]   ;;  %v5833_v34 = vld [vmem:[#allocation10 + $0x884] ss:$16 sps:$4 sm:$0xff]   ;;  %v1234_v53 = vsel %vm1113_vm14, %v6991_v54, %v1174_v15  ;;  %v5848_v3 = vld [vmem:[#allocation10 + $0x4c] ss:$16 sps:$4 sm:$0xff]  }
 0x1c0   :  { %3379 = vmatmul.mubr.bf16.vlgmr.msra.gmra.mxu1 %v6956_v59  ;;  %v1184_v31 = vmul.f32 %v6700_v39, %v999_v44  ;;  %vm1123_vm15 = vcmp.gt.f32.partialorder %v999_v44, 0.0  ;;  %v1242_v52 = vsel %vm1121_vm13, %v936_v51, %v1182_v37  ;;  %v5834_v41 = vld [vmem:[#allocation10 + $0x88] ss:$16 sps:$4 sm:$0xff]   ;;  %v5842_v51 = vld [vmem:[#allocation10 + $0x6c] ss:$16 sps:$4 sm:$0xff]  }
 0x1c1   :  { %3442 = vmatmul.mubr.bf16.vlgmr.msra.gmra.mxu0 %v6958_v12  ;;  %3473 = vmatpush1.bf16.msra.mxu1 %v5813_v49  ;;  %v1040_v49 = vadd.f32 %v6966_v14, %v6954_v36  ;;  %v7036_v14 = vpack.c.bf16 %v1245_v35, %v1235_v18  ;;  %v1147_v62 = vmul.f32 %v6700_v39, %v1044_v24  ;;  %vm1086_vm1 = vcmp.gt.f32.partialorder %v1044_v24, 0.0  ;;  %v5840_v54 = vld [vmem:[#allocation10 + $0x68] ss:$16 sps:$4 sm:$0xff]   ;;  %v5849_v18 = vld [vmem:[#allocation10 + $0x820] ss:$16 sps:$4 sm:$0xff]  }
 0x1c2   :  { %3536 = vmatpush1.bf16.msra.mxu0 %v5816_v9  ;;  %3474 = vmatprep.subr.bf16.mxu1 %v5821_v32  ;;  %v7033_v9 = vpack.c.bf16 %v1243_v55, %v1233_v28  ;;  %v1232_v32 = vsel %vm1111_vm12, %v6984_v6, %v1172_v7  ;;  %v5839_v6 = vld [vmem:[#allocation10 + $0x864] ss:$16 sps:$4 sm:$0xff]   ;;  %v5846_v37 = vld [vmem:[#allocation10 + $0x48] ss:$16 sps:$4 sm:$0xff]   ;;  %v5854_v55 = vld [vmem:[#allocation10 + $0x2c] ss:$16 sps:$4 sm:$0xff]  }
 0x1c3   :  { %3537 = vmatprep.subr.bf16.mxu0 %v5824_v46  ;;  %3388 = vmatprep.mubr.bf16.mxu1 %v6994_v56  ;;  %v1137_v46 = vmul.f32 %v6700_v39, %v1040_v49  ;;  %vm1076_vm0 = vcmp.gt.f32.partialorder %v1040_v49, 0.0  ;;  %v7051_v43 = vpack.c.bf16 %v1242_v52, %v1232_v32  ;;  %v5851_v28 = vld [vmem:[#allocation10 + $0x824] ss:$16 sps:$4 sm:$0xff]   ;;  %v7061_v32 = vpop.f32.mrf.mxu0  ;;  %v5867_v52 = vld [vmem:[#allocation10 + $0x9c0] ss:$16 sps:$4 sm:$0xff]  }
 0x1c4   :  { %3451 = vmatprep.mubr.bf16.mxu0 %v7002_v19  ;;  %v5857_v35 = vld [vmem:[#allocation10 + $0x804] ss:$16 sps:$4 sm:$0xff]  }
 0x1c5   :  { %3475 = vmatpush1.bf16.msra.mxu1 %v5819_v40  ;;  %v1244_v40 = vsel %vm1123_vm15, %v999_v44, %v1184_v31  ;;  %v1197_v17 = vsel %vm1076_vm0, %v1040_v49, %v1137_v46  ;;  %v5845_v44 = vld [vmem:[#allocation10 + $0x844] ss:$16 sps:$4 sm:$0xff]   ;;  %v5860_v49 = vld [vmem:[#allocation10 + $0xc] ss:$16 sps:$4 sm:$0xff]   ;;  %v5870_v46 = vld [vmem:[#allocation10 + $0x1c8] ss:$16 sps:$4 sm:$0xff]  }
 0x1c6   :  { %3538 = vmatpush1.bf16.msra.mxu0 %v5822_v0  ;;  %3476 = vmatprep.subr.bf16.mxu1 %v5827_v61  ;;  %v7053_v0 = vpack.c.bf16 %v1244_v40, %v1234_v53  ;;  %v1207_v61 = vsel %vm1086_vm1, %v1044_v24, %v1147_v62  ;;  %v5855_v24 = vld [vmem:[#allocation10 + $0x800] ss:$16 sps:$4 sm:$0xff]   ;;  %v5863_v15 = vld [vmem:[#allocation10 + $0x9e4] ss:$16 sps:$4 sm:$0xff]   ;;  %v5866_v31 = vld [vmem:[#allocation10 + $0x1ec] ss:$16 sps:$4 sm:$0xff]  }
 0x1c7   :  { %3539 = vmatprep.subr.bf16.mxu0 %v5830_v38  ;;  %v7056_v7 = vpack.c.bf16 %v1207_v61, %v1197_v17  ;;  %v5843_v38 = vld [vmem:[#allocation10 + $0x840] ss:$16 sps:$4 sm:$0xff]   ;;  %v5875_v62 = vld [vmem:[#allocation10 + $0x9a4] ss:$16 sps:$4 sm:$0xff]   ;;  %v5878_v53 = vld [vmem:[#allocation10 + $0x1ac] ss:$16 sps:$4 sm:$0xff]  }
 0x1c8   :  { %3389 = vmatmul.mubr.bf16.gmra.mxu1 %v7016_v16  ;;  %v5873_v40 = vld [vmem:[#allocation10 + $0x9a0] ss:$16 sps:$4 sm:$0xff]   ;;  %v5884_v17 = vld [vmem:[#allocation10 + $0x18c] ss:$16 sps:$4 sm:$0xff]  }
 0x1c9   :  { %3452 = vmatmul.mubr.bf16.gmra.mxu0 %v7023_v23  ;;  %3477 = vmatpush1.bf16.msra.mxu1 %v5825_v60  ;;  %v5852_v60 = vld [vmem:[#allocation10 + $0x28] ss:$16 sps:$4 sm:$0xff]   ;;  %v5879_v61 = vld [vmem:[#allocation10 + $0x980] ss:$16 sps:$4 sm:$0xff]  }
 0x1ca   :  { %3540 = vmatpush1.bf16.msra.mxu0 %v5828_v47  ;;  %3478 = vmatprep.subr.bf16.mxu1 %v5833_v34  ;;  %v5861_v47 = vld [vmem:[#allocation10 + $0x9e0] ss:$16 sps:$4 sm:$0xff]   ;;  %v5864_v34 = vld [vmem:[#allocation10 + $0x1e8] ss:$16 sps:$4 sm:$0xff]  }
 0x1cb   :  { %3541 = vmatprep.subr.bf16.mxu0 %v5836_v2  ;;  %3398 = vmatprep.mubr.bf16.mxu1 %v7033_v9  ;;  %v5869_v2 = vld [vmem:[#allocation10 + $0x9c4] ss:$16 sps:$4 sm:$0xff]  }
 0x1cc   :  { %3461 = vmatprep.mubr.bf16.mxu0 %v7036_v14 }
 0x1cd   :  { %3479 = vmatpush1.bf16.msra.mxu1 %v5831_v5  ;;  %v5872_v5 = vld [vmem:[#allocation10 + $0x1cc] ss:$16 sps:$4 sm:$0xff]  }
 0x1ce   :  { %3542 = vmatpush1.bf16.msra.mxu0 %v5834_v41  ;;  %3480 = vmatprep.subr.bf16.mxu1 %v5839_v6  ;;  %v1049_v41 = vpop.f32.mrf.mxu0  ;;  %v5876_v6 = vld [vmem:[#allocation10 + $0x1a8] ss:$16 sps:$4 sm:$0xff]  }
 0x1cf   :  { %3543 = vmatprep.subr.bf16.mxu0 %v5842_v51  ;;  %v5881_v51 = vld [vmem:[#allocation10 + $0x984] ss:$16 sps:$4 sm:$0xff]  }
 0x1d0   :  { %3399 = vmatmul.mubr.bf16.gmra.mxu1 %v7051_v43 }
 0x1d1   :  { %3462 = vmatmul.mubr.bf16.gmra.mxu0 %v7053_v0  ;;  %3481 = vmatpush1.bf16.msra.mxu1 %v5837_v30  ;;  %v1051_v30 = vpop.f32.mrf.mxu0 }
 0x1d2   :  { %3544 = vmatpush1.bf16.msra.mxu0 %v5840_v54  ;;  %3567 = vmatprep.mubr.bf16.mxu0 %v6737_v21  ;;  %v5858_v21 = vld [vmem:[#allocation10 + $0x8] ss:$16 sps:$4 sm:$0xff]  }
 0x1d3   :  { %3482 = vmatprep.subr.bf16.mxu1 %v5845_v44  ;;  %3545 = vmatprep.subr.bf16.mxu0 %v5848_v3  ;;  %v5882_v54 = vld [vmem:[#allocation10 + $0x188] ss:$16 sps:$4 sm:$0xff]   ;;  %v5887_v44 = vld [vmem:[#allocation10 + $0x964] ss:$16 sps:$4 sm:$0xff]   ;;  %v1053_v3 = vpop.f32.mrf.mxu0 }
 0x1d4   :  { %3504 = vmatprep.mubr.bf16.mxu1 %v7056_v7 }
 0x1d5   :  { %3483 = vmatpush1.bf16.msra.mxu1 %v5843_v38  ;;  %v5890_v38 = vld [vmem:[#allocation10 + $0x16c] ss:$16 sps:$4 sm:$0xff]  }
 0x1d6   :  { %3546 = vmatpush1.bf16.msra.mxu0 %v5846_v37  ;;  %3484 = vmatprep.subr.bf16.mxu1 %v5851_v28  ;;  %v5885_v37 = vld [vmem:[#allocation10 + $0x960] ss:$16 sps:$4 sm:$0xff]   ;;  %v5888_v28 = vld [vmem:[#allocation10 + $0x168] ss:$16 sps:$4 sm:$0xff]  }
 0x1d7   :  { %3547 = vmatprep.subr.bf16.mxu0 %v5854_v55  ;;  %v5893_v55 = vld [vmem:[#allocation10 + $0x944] ss:$16 sps:$4 sm:$0xff]  }
 0x1d9   :  { %3485 = vmatpush1.bf16.msra.mxu1 %v5849_v18  ;;  %v7063_v18 = vpop.f32.mrf.mxu0 }
 0x1da   :  { %3548 = vmatpush1.bf16.msra.mxu0 %v5852_v60  ;;  %3486 = vmatprep.subr.bf16.mxu1 %v5857_v35  ;;  %v7067_v60 = vrot.slane %v6934_v48, %v6672_v26  ;;  %v5896_v35 = vld [vmem:[#allocation10 + $0x14c] ss:$16 sps:$4 sm:$0xff]   ;;  %v5897_v48 = vld [vmem:[#allocation10 + $0x920] ss:$16 sps:$4 sm:$0xff]  }
 0x1db   :  { %3549 = vmatprep.subr.bf16.mxu0 %v5860_v49  ;;  %v5891_v49 = vld [vmem:[#allocation10 + $0x940] ss:$16 sps:$4 sm:$0xff]  }
 0x1dd   :  { %3487 = vmatpush1.bf16.msra.mxu1 %v5855_v24  ;;  %v5894_v24 = vld [vmem:[#allocation10 + $0x148] ss:$16 sps:$4 sm:$0xff]  }
 0x1de   :  { %3550 = vmatpush1.bf16.msra.mxu0 %v5858_v21  ;;  %3488 = vmatprep.subr.bf16.mxu1 %v5863_v15  ;;  %v5899_v21 = vld [vmem:[#allocation10 + $0x924] ss:$16 sps:$4 sm:$0xff]   ;;  %v1059_v15 = vpop.f32.mrf.mxu0 }
 0x1df   :  { %3551 = vmatprep.subr.bf16.mxu0 %v5866_v31  ;;  %v1038_v31 = vadd.f32 %v6943_v22, %v7067_v60 }
 0x1e1   :  { %3489 = vmatpush2.bf16.msra.mxu1 %v5861_v47  ;;  %v1042_v47 = vadd.f32 %v6987_v50, %v7067_v60  ;;  %vm1075_vm2 = vcmp.gt.f32.partialorder %v1038_v31, 0.0  ;;  %v1048_v50 = vadd.f32 %v7061_v32, %v7067_v60 }
 0x1e2   :  { %3552 = vmatpush2.bf16.msra.mxu0 %v5864_v34  ;;  %3490 = vmatprep.subr.bf16.mxu1 %v5869_v2  ;;  %v5902_v34 = vld [vmem:[#allocation10 + $0x12c] ss:$16 sps:$4 sm:$0xff]   ;;  %v1050_v2 = vadd.f32 %v1049_v41, %v6954_v36  ;;  %v1052_v41 = vadd.f32 %v1051_v30, %v7067_v60 }
 0x1e3   :  { %3553 = vmatprep.subr.bf16.mxu0 %v5872_v5  ;;  %v1054_v5 = vadd.f32 %v1053_v3, %v6954_v36  ;;  %v1146_v22 = vmul.f32 %v6700_v39, %v1042_v47  ;;  %vm1085_vm3 = vcmp.gt.f32.partialorder %v1042_v47, 0.0  ;;  %vm1095_vm6 = vcmp.gt.f32.partialorder %v1048_v50, 0.0 }
 0x1e4   :  { %vm1096_vm4 = vcmp.gt.f32.partialorder %v1050_v2, 0.0  ;;  %v1156_v32 = vmul.f32 %v6700_v39, %v1048_v50  ;;  %vm1105_vm7 = vcmp.gt.f32.partialorder %v1052_v41, 0.0  ;;  %v1166_v30 = vmul.f32 %v6700_v39, %v1052_v41 }
 0x1e5   :  { %3491 = vmatpush2.bf16.msra.mxu1 %v5867_v52  ;;  %v5900_v52 = vld [vmem:[#allocation10 + $0x128] ss:$16 sps:$4 sm:$0xff]   ;;  %vm1106_vm5 = vcmp.gt.f32.partialorder %v1054_v5, 0.0 }
 0x1e6   :  { %3554 = vmatpush2.bf16.msra.mxu0 %v5870_v46  ;;  %3492 = vmatprep.subr.bf16.mxu1 %v5875_v62  ;;  %v5905_v46 = vld [vmem:[#allocation10 + $0x904] ss:$16 sps:$4 sm:$0xff]   ;;  %v1061_v62 = vpop.f32.mrf.mxu0 }
 0x1e7   :  { %3555 = vmatprep.subr.bf16.mxu0 %v5878_v53  ;;  %v1136_v53 = vmul.f32 %v6700_v39, %v1038_v31 }
 0x1e9   :  { %3493 = vmatpush2.bf16.msra.mxu1 %v5873_v40  ;;  %v5908_v40 = vld [vmem:[#allocation10 + $0x10c] ss:$16 sps:$4 sm:$0xff]   ;;  %v1196_v3 = vsel %vm1075_vm2, %v1038_v31, %v1136_v53  ;;  %v5912_v31 = vld [vmem:[#allocation10 + $0x4e8] ss:$16 sps:$4 sm:$0xff]  }
 0x1ea   :  { %3556 = vmatpush2.bf16.msra.mxu0 %v5876_v6  ;;  %3494 = vmatprep.subr.bf16.mxu1 %v5881_v51  ;;  %v1157_v6 = vmul.f32 %v6700_v39, %v1050_v2  ;;  %v5903_v51 = vld [vmem:[#allocation10 + $0x900] ss:$16 sps:$4 sm:$0xff]  }
 0x1eb   :  { %3557 = vmatprep.subr.bf16.mxu0 %v5884_v17  ;;  %v1167_v17 = vmul.f32 %v6700_v39, %v1054_v5 }
 0x1ed   :  { %3495 = vmatpush2.bf16.msra.mxu1 %v5879_v61  ;;  %v5906_v61 = vld [vmem:[#allocation10 + $0x108] ss:$16 sps:$4 sm:$0xff]  }
 0x1ee   :  { %3558 = vmatpush2.bf16.msra.mxu0 %v5882_v54  ;;  %3496 = vmatprep.subr.bf16.mxu1 %v5887_v44  ;;  %v5911_v54 = vld [vmem:[#allocation10 + $0x2ec] ss:$16 sps:$4 sm:$0xff]   ;;  %v1063_v44 = vpop.f32.mrf.mxu0 }
 0x1ef   :  { %3559 = vmatprep.subr.bf16.mxu0 %v5890_v38  ;;  %v1206_v38 = vsel %vm1085_vm3, %v1042_v47, %v1146_v22  ;;  %v5917_v47 = vld [vmem:[#allocation10 + $0x2cc] ss:$16 sps:$4 sm:$0xff]  }
 0x1f0   :  { %v5923_v22 = vld [vmem:[#allocation10 + $0x2ac] ss:$16 sps:$4 sm:$0xff]  }
 0x1f1   :  { %3497 = vmatpush2.bf16.msra.mxu1 %v5885_v37  ;;  %v5914_v37 = vld [vmem:[#allocation10 + $0x4ec] ss:$16 sps:$4 sm:$0xff]  }
 0x1f2   :  { %3560 = vmatpush2.bf16.msra.mxu0 %v5888_v28  ;;  %3498 = vmatprep.subr.bf16.mxu1 %v5893_v55  ;;  %v5909_v28 = vld [vmem:[#allocation10 + $0x2e8] ss:$16 sps:$4 sm:$0xff]   ;;  %v1060_v55 = vadd.f32 %v1059_v15, %v6954_v36 }
 0x1f3   :  { %3561 = vmatprep.subr.bf16.mxu0 %v5896_v35  ;;  %v1064_v35 = vadd.f32 %v1063_v44, %v6954_v36  ;;  %v1216_v36 = vsel %vm1095_vm6, %v1048_v50, %v1156_v32 }
 0x1f4   :  { %vm1116_vm8 = vcmp.gt.f32.partialorder %v1060_v55, 0.0 }
 0x1f5   :  { %3499 = vmatpush2.bf16.msra.mxu1 %v5891_v49  ;;  %v1217_v49 = vsel %vm1096_vm4, %v1050_v2, %v1157_v6  ;;  %v1226_v2 = vsel %vm1105_vm7, %v1052_v41, %v1166_v30  ;;  %v1187_v53 = vmul.f32 %v6700_v39, %v1064_v35  ;;  %vm1126_vm9 = vcmp.gt.f32.partialorder %v1064_v35, 0.0  ;;  %v5924_v6 = vld [vmem:[#allocation10 + $0x4a8] ss:$16 sps:$4 sm:$0xff]  }
 0x1f6   :  { %3562 = vmatpush2.bf16.msra.mxu0 %v5894_v24  ;;  %3500 = vmatprep.subr.bf16.mxu1 %v5899_v21  ;;  %v1227_v24 = vsel %vm1106_vm5, %v1054_v5, %v1167_v17  ;;  %v7088_v21 = vpack.c.bf16 %v1206_v38, %v1196_v3  ;;  %v1177_v5 = vmul.f32 %v6700_v39, %v1060_v55  ;;  %v5932_v17 = vld [vmem:[#allocation10 + $0x48c] ss:$16 sps:$4 sm:$0xff]   ;;  %v5930_v3 = vld [vmem:[#allocation10 + $0x488] ss:$16 sps:$4 sm:$0xff]  }
 0x1f7   :  { %3563 = vmatprep.subr.bf16.mxu0 %v5902_v34  ;;  %v5920_v34 = vld [vmem:[#allocation10 + $0x4cc] ss:$16 sps:$4 sm:$0xff]   ;;  %v7093_v15 = vpack.c.bf16 %v1227_v24, %v1217_v49  ;;  %v5933_v30 = vld [vmem:[#allocation10 + $0x268] ss:$16 sps:$4 sm:$0xff]  }
 0x1f8   :  { %v1237_v41 = vsel %vm1116_vm8, %v1060_v55, %v1177_v5  ;;  %v5935_v38 = vld [vmem:[#allocation10 + $0x26c] ss:$16 sps:$4 sm:$0xff]   ;;  %v5939_v55 = vld [vmem:[#allocation10 + $0x248] ss:$16 sps:$4 sm:$0xff]  }
 0x1f9   :  { %3501 = vmatpush2.bf16.msra.mxu1 %v5897_v48  ;;  %v1058_v48 = vadd.f32 %v7063_v18, %v7067_v60  ;;  %v5918_v18 = vld [vmem:[#allocation10 + $0x4c8] ss:$16 sps:$4 sm:$0xff]   ;;  %v5947_v49 = vld [vmem:[#allocation10 + $0x22c] ss:$16 sps:$4 sm:$0xff]  }
 0x1fa   :  { %3564 = vmatpush2.bf16.msra.mxu0 %v5900_v52  ;;  %3502 = vmatprep.subr.bf16.mxu1 %v5905_v46  ;;  %v5915_v52 = vld [vmem:[#allocation10 + $0x2c8] ss:$16 sps:$4 sm:$0xff]   ;;  %v1062_v46 = vadd.f32 %v1061_v62, %v7067_v60  ;;  %v5950_v24 = vld [vmem:[#allocation10 + $0x42c] ss:$16 sps:$4 sm:$0xff]  }
 0x1fb   :  { %3565 = vmatprep.subr.bf16.mxu0 %v5908_v40  ;;  %v5926_v40 = vld [vmem:[#allocation10 + $0x4ac] ss:$16 sps:$4 sm:$0xff]   ;;  %v1176_v50 = vmul.f32 %v6700_v39, %v1058_v48  ;;  %v5921_v62 = vld [vmem:[#allocation10 + $0x2a8] ss:$16 sps:$4 sm:$0xff]   ;;  %vm1115_vm10 = vcmp.gt.f32.partialorder %v1058_v48, 0.0 }
 0x1fc   :  { %v1186_v60 = vmul.f32 %v6700_v39, %v1062_v46  ;;  %vm1125_vm11 = vcmp.gt.f32.partialorder %v1062_v46, 0.0  ;;  %v5927_v39 = vld [vmem:[#allocation10 + $0x288] ss:$16 sps:$4 sm:$0xff]  }
 0x1fd   :  { %3503 = vmatpush2.bf16.msra.mxu1 %v5903_v51  ;;  %v5929_v51 = vld [vmem:[#allocation10 + $0x28c] ss:$16 sps:$4 sm:$0xff]   ;;  %v5960_v5 = vld [vmem:[#allocation10 + $0x5e8] ss:$16 sps:$4 sm:$0xff]  }
 0x1fe   :  { %3566 = vmatpush2.bf16.msra.mxu0 %v5906_v61  ;;  %3598 = vmatprep.subr.bf16.mxu1 %v5911_v54  ;;  %v1236_v54 = vsel %vm1115_vm10, %v1058_v48, %v1176_v50  ;;  %v1246_v44 = vsel %vm1125_vm11, %v1062_v46, %v1186_v60  ;;  %v5951_v48 = vld [vmem:[#allocation10 + $0x208] ss:$16 sps:$4 sm:$0xff]   ;;  %v5968_v46 = vld [vmem:[#allocation10 + $0x5cc] ss:$16 sps:$4 sm:$0xff]  }
 0x1ff   :  { %3661 = vmatprep.subr.bf16.mxu0 %v5914_v37  ;;  %v5938_v37 = vld [vmem:[#allocation10 + $0x46c] ss:$16 sps:$4 sm:$0xff]   ;;  %v7113_v32 = vpack.c.bf16 %v1246_v44, %v1236_v54  ;;  %v5969_v50 = vld [vmem:[#allocation10 + $0x3a8] ss:$16 sps:$4 sm:$0xff]  }
 0x200   :  { %3505 = vmatmul.mubr.bf16.vlgmr.msra.gmra.mxu1 %v7088_v21  ;;  %v5972_v60 = vld [vmem:[#allocation10 + $0x5a8] ss:$16 sps:$4 sm:$0xff]   ;;  %v5989_v44 = vld [vmem:[#allocation10 + $0x34c] ss:$16 sps:$4 sm:$0xff]  }
 0x201   :  { %3568 = vmatmul.mubr.bf16.vlgmr.msra.gmra.mxu0 %v6726_v10  ;;  %3599 = vmatpush1.bf16.msra.mxu1 %v5909_v28  ;;  %v7103_v10 = vpack.c.bf16 %v1226_v2, %v1216_v36  ;;  %v5941_v28 = vld [vmem:[#allocation10 + $0x24c] ss:$16 sps:$4 sm:$0xff]   ;;  %v5984_v54 = vld [vmem:[#allocation10 + $0x568] ss:$16 sps:$4 sm:$0xff]  }
 0x202   :  { %3577 = vmatprep.mubr.bf16.mxu0 %v6800_v20  ;;  %3662 = vmatpush1.bf16.msra.mxu0 %v5912_v31  ;;  %v1247_v20 = vsel %vm1126_vm9, %v1064_v35, %v1187_v53  ;;  %v5942_v35 = vld [vmem:[#allocation10 + $0x448] ss:$16 sps:$4 sm:$0xff]   ;;  %v5959_v36 = vld [vmem:[#allocation10 + $0x3ec] ss:$16 sps:$4 sm:$0xff]  }
 0x203   :  { %3600 = vmatprep.subr.bf16.mxu1 %v5917_v47  ;;  %3663 = vmatprep.subr.bf16.mxu0 %v5920_v34  ;;  %v7108_v61 = vpack.c.bf16 %v1247_v20, %v1237_v41  ;;  %v5945_v31 = vld [vmem:[#allocation10 + $0x228] ss:$16 sps:$4 sm:$0xff]   ;;  %v5953_v34 = vld [vmem:[#allocation10 + $0x20c] ss:$16 sps:$4 sm:$0xff]  }
 0x204   :  { %3514 = vmatprep.mubr.bf16.mxu1 %v7093_v15  ;;  %v5948_v47 = vld [vmem:[#allocation10 + $0x428] ss:$16 sps:$4 sm:$0xff]   ;;  %v5962_v2 = vld [vmem:[#allocation10 + $0x5ec] ss:$16 sps:$4 sm:$0xff]  }
 0x205   :  { %3601 = vmatpush1.bf16.msra.mxu1 %v5915_v52  ;;  %v5965_v52 = vld [vmem:[#allocation10 + $0x3cc] ss:$16 sps:$4 sm:$0xff]   ;;  %v5963_v53 = vld [vmem:[#allocation10 + $0x3c8] ss:$16 sps:$4 sm:$0xff]  }
 0x206   :  { %3664 = vmatpush1.bf16.msra.mxu0 %v5918_v18  ;;  %3602 = vmatprep.subr.bf16.mxu1 %v5923_v22  ;;  %v5966_v18 = vld [vmem:[#allocation10 + $0x5c8] ss:$16 sps:$4 sm:$0xff]   ;;  %v5971_v22 = vld [vmem:[#allocation10 + $0x3ac] ss:$16 sps:$4 sm:$0xff]  }
 0x207   :  { %3665 = vmatprep.subr.bf16.mxu0 %v5926_v40  ;;  %v5974_v40 = vld [vmem:[#allocation10 + $0x5ac] ss:$16 sps:$4 sm:$0xff]   ;;  %v5975_v20 = vld [vmem:[#allocation10 + $0x388] ss:$16 sps:$4 sm:$0xff]  }
 0x208   :  { %3515 = vmatmul.mubr.bf16.gmra.mxu1 %v7103_v10  ;;  %v5980_v41 = vld [vmem:[#allocation10 + $0x58c] ss:$16 sps:$4 sm:$0xff]  }
 0x209   :  { %3578 = vmatmul.mubr.bf16.gmra.mxu0 %v6810_v42  ;;  %3603 = vmatpush1.bf16.msra.mxu1 %v5921_v62  ;;  %v5936_v42 = vld [vmem:[#allocation10 + $0x468] ss:$16 sps:$4 sm:$0xff]   ;;  %v5977_v62 = vld [vmem:[#allocation10 + $0x38c] ss:$16 sps:$4 sm:$0xff]  }
 0x20a   :  { %3587 = vmatprep.mubr.bf16.mxu0 %v6835_v45  ;;  %3666 = vmatpush1.bf16.msra.mxu0 %v5924_v6  ;;  %v5944_v45 = vld [vmem:[#allocation10 + $0x44c] ss:$16 sps:$4 sm:$0xff]   ;;  %v5978_v6 = vld [vmem:[#allocation10 + $0x588] ss:$16 sps:$4 sm:$0xff]  }
 0x20b   :  { %3604 = vmatprep.subr.bf16.mxu1 %v5929_v51  ;;  %3667 = vmatprep.subr.bf16.mxu0 %v5932_v17  ;;  %v5983_v51 = vld [vmem:[#allocation10 + $0x36c] ss:$16 sps:$4 sm:$0xff]  }
 0x20c   :  { %3524 = vmatprep.mubr.bf16.mxu1 %v7108_v61  ;;  %v5986_v17 = vld [vmem:[#allocation10 + $0x56c] ss:$16 sps:$4 sm:$0xff]  }
 0x20d   :  { %3605 = vmatpush1.bf16.msra.mxu1 %v5927_v39  ;;  %v5981_v39 = vld [vmem:[#allocation10 + $0x368] ss:$16 sps:$4 sm:$0xff]  }
 0x20e   :  { %3668 = vmatpush1.bf16.msra.mxu0 %v5930_v3  ;;  %3606 = vmatprep.subr.bf16.mxu1 %v5935_v38  ;;  %v5992_v3 = vld [vmem:[#allocation10 + $0x54c] ss:$16 sps:$4 sm:$0xff]   ;;  %v5987_v38 = vld [vmem:[#allocation10 + $0x348] ss:$16 sps:$4 sm:$0xff]  }
 0x20f   :  { %3669 = vmatprep.subr.bf16.mxu0 %v5938_v37  ;;  %v5990_v37 = vld [vmem:[#allocation10 + $0x548] ss:$16 sps:$4 sm:$0xff]  }
 0x210   :  { %3525 = vmatmul.mubr.bf16.gmra.mxu1 %v7113_v32 }
 0x211   :  { %3588 = vmatmul.mubr.bf16.gmra.mxu0 %v6852_v4  ;;  %3607 = vmatpush1.bf16.msra.mxu1 %v5933_v30  ;;  %v5956_v4 = vld [vmem:[#allocation10 + $0x40c] ss:$16 sps:$4 sm:$0xff]  }
 0x212   :  { %3630 = vmatprep.mubr.bf16.mxu1 %v6745_v33  ;;  %3670 = vmatpush1.bf16.msra.mxu0 %v5936_v42  ;;  %v5954_v33 = vld [vmem:[#allocation10 + $0x408] ss:$16 sps:$4 sm:$0xff]   ;;  %v5995_v30 = vld [vmem:[#allocation10 + $0x32c] ss:$16 sps:$4 sm:$0xff]  }
 0x213   :  { %3693 = vmatprep.mubr.bf16.mxu0 %v6887_v58  ;;  %3608 = vmatprep.subr.bf16.mxu1 %v5941_v28  ;;  %v5957_v58 = vld [vmem:[#allocation10 + $0x3e8] ss:$16 sps:$4 sm:$0xff]   ;;  %v5998_v42 = vld [vmem:[#allocation10 + $0x52c] ss:$16 sps:$4 sm:$0xff]  }
 0x214   :  { %3671 = vmatprep.subr.bf16.mxu0 %v5944_v45  ;;  %v5993_v28 = vld [vmem:[#allocation10 + $0x328] ss:$16 sps:$4 sm:$0xff]  }
 0x215   :  { %3609 = vmatpush1.bf16.msra.mxu1 %v5939_v55  ;;  %v5996_v45 = vld [vmem:[#allocation10 + $0x528] ss:$16 sps:$4 sm:$0xff]   ;;  %v6001_v55 = vld [vmem:[#allocation10 + $0x30c] ss:$16 sps:$4 sm:$0xff]  }
 0x216   :  { %3672 = vmatpush1.bf16.msra.mxu0 %v5942_v35  ;;  %3610 = vmatprep.subr.bf16.mxu1 %v5947_v49  ;;  %v6004_v35 = vld [vmem:[#allocation10 + $0x50c] ss:$16 sps:$4 sm:$0xff]   ;;  %v5999_v49 = vld [vmem:[#allocation10 + $0x308] ss:$16 sps:$4 sm:$0xff]  }
 0x217   :  { %3673 = vmatprep.subr.bf16.mxu0 %v5950_v24  ;;  %v6002_v24 = vld [vmem:[#allocation10 + $0x508] ss:$16 sps:$4 sm:$0xff]  }
 0x219   :  { %3611 = vmatpush1.bf16.msra.mxu1 %v5945_v31  ;;  %v6007_v31 = vld [vmem:[#allocation10 + $0x6ec] ss:$16 sps:$4 sm:$0xff]  }
 0x21a   :  { %3674 = vmatpush1.bf16.msra.mxu0 %v5948_v47  ;;  %3612 = vmatprep.subr.bf16.mxu1 %v5953_v34  ;;  %v6010_v47 = vld [vmem:[#allocation10 + $0x8ec] ss:$16 sps:$4 sm:$0xff]   ;;  %v6005_v34 = vld [vmem:[#allocation10 + $0x6e8] ss:$16 sps:$4 sm:$0xff]  }
 0x21b   :  { %3675 = vmatprep.subr.bf16.mxu0 %v5956_v4  ;;  %v6008_v4 = vld [vmem:[#allocation10 + $0x8e8] ss:$16 sps:$4 sm:$0xff]  }
 0x21d   :  { %3613 = vmatpush1.bf16.msra.mxu1 %v5951_v48  ;;  %v6013_v48 = vld [vmem:[#allocation10 + $0x6cc] ss:$16 sps:$4 sm:$0xff]  }
 0x21e   :  { %3676 = vmatpush1.bf16.msra.mxu0 %v5954_v33  ;;  %3614 = vmatprep.subr.bf16.mxu1 %v5959_v36  ;;  %v6016_v33 = vld [vmem:[#allocation10 + $0x8cc] ss:$16 sps:$4 sm:$0xff]   ;;  %v6011_v36 = vld [vmem:[#allocation10 + $0x6c8] ss:$16 sps:$4 sm:$0xff]  }
 0x21f   :  { %3677 = vmatprep.subr.bf16.mxu0 %v5962_v2  ;;  %v6014_v2 = vld [vmem:[#allocation10 + $0x8c8] ss:$16 sps:$4 sm:$0xff]  }
 0x221   :  { %3615 = vmatpush2.bf16.msra.mxu1 %v5957_v58  ;;  %v6019_v58 = vld [vmem:[#allocation10 + $0x6ac] ss:$16 sps:$4 sm:$0xff]  }
 0x222   :  { %3678 = vmatpush2.bf16.msra.mxu0 %v5960_v5  ;;  %3616 = vmatprep.subr.bf16.mxu1 %v5965_v52  ;;  %v6022_v5 = vld [vmem:[#allocation10 + $0x8ac] ss:$16 sps:$4 sm:$0xff]   ;;  %v6017_v52 = vld [vmem:[#allocation10 + $0x6a8] ss:$16 sps:$4 sm:$0xff]  }
 0x223   :  { %3679 = vmatprep.subr.bf16.mxu0 %v5968_v46  ;;  %v6025_v46 = vld [vmem:[#allocation10 + $0x68c] ss:$16 sps:$4 sm:$0xff]  }
 0x225   :  { %3617 = vmatpush2.bf16.msra.mxu1 %v5963_v53  ;;  %v6031_v53 = vld [vmem:[#allocation10 + $0x66c] ss:$16 sps:$4 sm:$0xff]  }
 0x226   :  { %3680 = vmatpush2.bf16.msra.mxu0 %v5966_v18  ;;  %3618 = vmatprep.subr.bf16.mxu1 %v5971_v22  ;;  %v6034_v18 = vld [vmem:[#allocation10 + $0x86c] ss:$16 sps:$4 sm:$0xff]   ;;  %v6029_v22 = vld [vmem:[#allocation10 + $0x668] ss:$16 sps:$4 sm:$0xff]  }
 0x227   :  { %3681 = vmatprep.subr.bf16.mxu0 %v5974_v40  ;;  %v6037_v40 = vld [vmem:[#allocation10 + $0x64c] ss:$16 sps:$4 sm:$0xff]  }
 0x229   :  { %3619 = vmatpush2.bf16.msra.mxu1 %v5969_v50  ;;  %v6043_v50 = vld [vmem:[#allocation10 + $0x62c] ss:$16 sps:$4 sm:$0xff]  }
 0x22a   :  { %3682 = vmatpush2.bf16.msra.mxu0 %v5972_v60  ;;  %3620 = vmatprep.subr.bf16.mxu1 %v5977_v62  ;;  %v6046_v60 = vld [vmem:[#allocation10 + $0x82c] ss:$16 sps:$4 sm:$0xff]   ;;  %v6041_v62 = vld [vmem:[#allocation10 + $0x628] ss:$16 sps:$4 sm:$0xff]  }
 0x22b   :  { %3683 = vmatprep.subr.bf16.mxu0 %v5980_v41  ;;  %v6049_v41 = vld [vmem:[#allocation10 + $0x60c] ss:$16 sps:$4 sm:$0xff]  }
 0x22d   :  { %3621 = vmatpush2.bf16.msra.mxu1 %v5975_v20  ;;  %v6055_v20 = vld [vmem:[#allocation10 + $0x7ec] ss:$16 sps:$4 sm:$0xff]  }
 0x22e   :  { %3684 = vmatpush2.bf16.msra.mxu0 %v5978_v6  ;;  %3622 = vmatprep.subr.bf16.mxu1 %v5983_v51  ;;  %v6058_v6 = vld [vmem:[#allocation10 + $0x9ec] ss:$16 sps:$4 sm:$0xff]   ;;  %v6053_v51 = vld [vmem:[#allocation10 + $0x7e8] ss:$16 sps:$4 sm:$0xff]  }
 0x22f   :  { %3685 = vmatprep.subr.bf16.mxu0 %v5986_v17  ;;  %v6056_v17 = vld [vmem:[#allocation10 + $0x9e8] ss:$16 sps:$4 sm:$0xff]  }
 0x231   :  { %3623 = vmatpush2.bf16.msra.mxu1 %v5981_v39  ;;  %v6061_v39 = vld [vmem:[#allocation10 + $0x7cc] ss:$16 sps:$4 sm:$0xff]  }
 0x232   :  { %3686 = vmatpush2.bf16.msra.mxu0 %v5984_v54  ;;  %3624 = vmatprep.subr.bf16.mxu1 %v5989_v44  ;;  %v6064_v54 = vld [vmem:[#allocation10 + $0x9cc] ss:$16 sps:$4 sm:$0xff]   ;;  %v6059_v44 = vld [vmem:[#allocation10 + $0x7c8] ss:$16 sps:$4 sm:$0xff]  }
 0x233   :  { %3687 = vmatprep.subr.bf16.mxu0 %v5992_v3  ;;  %v6062_v3 = vld [vmem:[#allocation10 + $0x9c8] ss:$16 sps:$4 sm:$0xff]  }
 0x235   :  { %3625 = vmatpush2.bf16.msra.mxu1 %v5987_v38  ;;  %v6067_v38 = vld [vmem:[#allocation10 + $0x7ac] ss:$16 sps:$4 sm:$0xff]  }
 0x236   :  { %3688 = vmatpush2.bf16.msra.mxu0 %v5990_v37  ;;  %3626 = vmatprep.subr.bf16.mxu1 %v5995_v30  ;;  %v6070_v37 = vld [vmem:[#allocation10 + $0x9ac] ss:$16 sps:$4 sm:$0xff]  }
 0x237   :  { %3689 = vmatprep.subr.bf16.mxu0 %v5998_v42  ;;  %v6065_v42 = vld [vmem:[#allocation10 + $0x7a8] ss:$16 sps:$4 sm:$0xff]  }
 0x239   :  { %3627 = vmatpush2.bf16.msra.mxu1 %v5993_v28  ;;  %v6068_v28 = vld [vmem:[#allocation10 + $0x9a8] ss:$16 sps:$4 sm:$0xff]  }
 0x23a   :  { %3690 = vmatpush2.bf16.msra.mxu0 %v5996_v45  ;;  %3628 = vmatprep.subr.bf16.mxu1 %v6001_v55  ;;  %v6073_v45 = vld [vmem:[#allocation10 + $0x78c] ss:$16 sps:$4 sm:$0xff]  }
 0x23b   :  { %3691 = vmatprep.subr.bf16.mxu0 %v6004_v35  ;;  %v6076_v55 = vld [vmem:[#allocation10 + $0x98c] ss:$16 sps:$4 sm:$0xff]  }
 0x23d   :  { %3629 = vmatpush2.bf16.msra.mxu1 %v5999_v49  ;;  %v6071_v49 = vld [vmem:[#allocation10 + $0x788] ss:$16 sps:$4 sm:$0xff]  }
 0x23e   :  { %3692 = vmatpush2.bf16.msra.mxu0 %v6002_v24  ;;  %3724 = vmatprep.subr.bf16.mxu1 %v6007_v31  ;;  %v6074_v24 = vld [vmem:[#allocation10 + $0x988] ss:$16 sps:$4 sm:$0xff]   ;;  %v6079_v31 = vld [vmem:[#allocation10 + $0x76c] ss:$16 sps:$4 sm:$0xff]  }
 0x23f   :  { %3787 = vmatprep.subr.bf16.mxu0 %v6010_v47  ;;  %v6082_v47 = vld [vmem:[#allocation10 + $0x96c] ss:$16 sps:$4 sm:$0xff]  }
 0x240   :  { %3631 = vmatmul.mubr.bf16.vlgmr.msra.gmra.mxu1 %v6728_v11  ;;  %v6020_v11 = vld [vmem:[#allocation10 + $0x8a8] ss:$16 sps:$4 sm:$0xff]   ;;  %v7131_v30 = vpop.f32.mrf.mxu1 }
 0x241   :  { %3694 = vmatmul.mubr.bf16.vlgmr.msra.gmra.mxu0 %v6956_v59  ;;  %3640 = vmatprep.mubr.bf16.mxu1 %v6823_v57  ;;  %v6028_v57 = vld [vmem:[#allocation10 + $0x88c] ss:$16 sps:$4 sm:$0xff]   ;;  %v6023_v59 = vld [vmem:[#allocation10 + $0x688] ss:$16 sps:$4 sm:$0xff]  }
 0x242   :  { %3703 = vmatprep.mubr.bf16.mxu0 %v6994_v56  ;;  %3725 = vmatpush1.bf16.msra.mxu1 %v6005_v34  ;;  %v6026_v56 = vld [vmem:[#allocation10 + $0x888] ss:$16 sps:$4 sm:$0xff]   ;;  %v7133_v35 = vpop.f32.mrf.mxu1 }
 0x243   :  { %3788 = vmatpush1.bf16.msra.mxu0 %v6008_v4  ;;  %3726 = vmatprep.subr.bf16.mxu1 %v6013_v48  ;;  %v6077_v4 = vld [vmem:[#allocation10 + $0x768] ss:$16 sps:$4 sm:$0xff]  }
 0x244   :  { %3789 = vmatprep.subr.bf16.mxu0 %v6016_v33  ;;  %v7135_v34 = vpop.f32.mrf.mxu1  ;;  %v6080_v48 = vld [vmem:[#allocation10 + $0x968] ss:$16 sps:$4 sm:$0xff]   ;;  %v6085_v33 = vld [vmem:[#allocation10 + $0x74c] ss:$16 sps:$4 sm:$0xff]  }
 0x246   :  { %3727 = vmatpush1.bf16.msra.mxu1 %v6011_v36  ;;  %v6088_v36 = vld [vmem:[#allocation10 + $0x94c] ss:$16 sps:$4 sm:$0xff]  }
 0x247   :  { %3790 = vmatpush1.bf16.msra.mxu0 %v6014_v2  ;;  %3728 = vmatprep.subr.bf16.mxu1 %v6019_v58  ;;  %v7137_v2 = vpop.f32.mrf.mxu1  ;;  %v6083_v58 = vld [vmem:[#allocation10 + $0x748] ss:$16 sps:$4 sm:$0xff]  }
 0x248   :  { %3641 = vmatmul.mubr.bf16.gmra.mxu1 %v6830_v8  ;;  %3791 = vmatprep.subr.bf16.mxu0 %v6022_v5  ;;  %v6032_v8 = vld [vmem:[#allocation10 + $0x868] ss:$16 sps:$4 sm:$0xff]  }
 0x249   :  { %3704 = vmatmul.mubr.bf16.gmra.mxu0 %v7016_v16  ;;  %3650 = vmatprep.mubr.bf16.mxu1 %v6844_v63  ;;  %v6040_v63 = vld [vmem:[#allocation10 + $0x84c] ss:$16 sps:$4 sm:$0xff]   ;;  %v6035_v16 = vld [vmem:[#allocation10 + $0x648] ss:$16 sps:$4 sm:$0xff]  }
 0x24a   :  { %3713 = vmatprep.mubr.bf16.mxu0 %v7033_v9  ;;  %3729 = vmatpush1.bf16.msra.mxu1 %v6017_v52  ;;  %v6038_v9 = vld [vmem:[#allocation10 + $0x848] ss:$16 sps:$4 sm:$0xff]   ;;  %v6091_v52 = vld [vmem:[#allocation10 + $0x72c] ss:$16 sps:$4 sm:$0xff]  }
 0x24b   :  { %3792 = vmatpush1.bf16.msra.mxu0 %v6020_v11  ;;  %3730 = vmatprep.subr.bf16.mxu1 %v6025_v46  ;;  %v6086_v5 = vld [vmem:[#allocation10 + $0x948] ss:$16 sps:$4 sm:$0xff]   ;;  %v7139_v11 = vpop.f32.mrf.mxu1  ;;  %v6094_v46 = vld [vmem:[#allocation10 + $0x92c] ss:$16 sps:$4 sm:$0xff]  }
 0x24c   :  { %3793 = vmatprep.subr.bf16.mxu0 %v6028_v57  ;;  %v6089_v57 = vld [vmem:[#allocation10 + $0x728] ss:$16 sps:$4 sm:$0xff]  }
 0x24e   :  { %3731 = vmatpush1.bf16.msra.mxu1 %v6023_v59  ;;  %v6092_v59 = vld [vmem:[#allocation10 + $0x928] ss:$16 sps:$4 sm:$0xff]  }
 0x24f   :  { %3794 = vmatpush1.bf16.msra.mxu0 %v6026_v56  ;;  %3732 = vmatprep.subr.bf16.mxu1 %v6031_v53  ;;  %v6097_v56 = vld [vmem:[#allocation10 + $0x70c] ss:$16 sps:$4 sm:$0xff]   ;;  %v7141_v53 = vpop.f32.mrf.mxu1 }
 0x250   :  { %3651 = vmatmul.mubr.bf16.gmra.mxu1 %v6869_v13  ;;  %3795 = vmatprep.subr.bf16.mxu0 %v6034_v18  ;;  %v6044_v13 = vld [vmem:[#allocation10 + $0x828] ss:$16 sps:$4 sm:$0xff]   ;;  %v6100_v18 = vld [vmem:[#allocation10 + $0x90c] ss:$16 sps:$4 sm:$0xff]  }
 0x251   :  { %3714 = vmatmul.mubr.bf16.gmra.mxu0 %v7051_v43  ;;  %3756 = vmatprep.mubr.bf16.mxu1 %v6893_v1  ;;  %v6052_v43 = vld [vmem:[#allocation10 + $0x80c] ss:$16 sps:$4 sm:$0xff]   ;;  %v6047_v1 = vld [vmem:[#allocation10 + $0x608] ss:$16 sps:$4 sm:$0xff]  }
 0x252   :  { %3733 = vmatpush1.bf16.msra.mxu1 %v6029_v22  ;;  %3819 = vmatprep.mubr.bf16.mxu0 %v7056_v7  ;;  %v6050_v7 = vld [vmem:[#allocation10 + $0x808] ss:$16 sps:$4 sm:$0xff]  }
 0x253   :  { %3796 = vmatpush1.bf16.msra.mxu0 %v6032_v8  ;;  %3734 = vmatprep.subr.bf16.mxu1 %v6037_v40  ;;  %v6095_v22 = vld [vmem:[#allocation10 + $0x708] ss:$16 sps:$4 sm:$0xff]  }
 0x254   :  { %3797 = vmatprep.subr.bf16.mxu0 %v6040_v63  ;;  %v6098_v8 = vld [vmem:[#allocation10 + $0x908] ss:$16 sps:$4 sm:$0xff]   ;;  %v7143_v63 = vpop.f32.mrf.mxu0 }
 0x255   :  { %v6103_v40 = vld [vmem:[#allocation13 + $0x74] ss:$8 sps:$4 sm:$0xff]  }
 0x256   :  { %3735 = vmatpush1.bf16.msra.mxu1 %v6035_v16  ;;  %v7145_v16 = vpop.f32.mrf.mxu1 }
 0x257   :  { %3798 = vmatpush1.bf16.msra.mxu0 %v6038_v9  ;;  %3736 = vmatprep.subr.bf16.mxu1 %v6043_v50  ;;  %v6101_v9 = vld [vmem:[#allocation13 + $0x70] ss:$8 sps:$4 sm:$0xff]   ;;  %v7147_v50 = vpop.f32.mrf.mxu0 }
 0x258   :  { %3799 = vmatprep.subr.bf16.mxu0 %v6046_v60  ;;  %v7149_v60 = vpop.f32.mrf.mxu1 }
 0x25a   :  { %3737 = vmatpush1.bf16.msra.mxu1 %v6041_v62  ;;  %v6106_v62 = vld [vmem:[#allocation13 + $0x64] ss:$8 sps:$4 sm:$0xff]  }
 0x25b   :  { %3800 = vmatpush1.bf16.msra.mxu0 %v6044_v13  ;;  %3738 = vmatprep.subr.bf16.mxu1 %v6049_v41  ;;  %v6104_v13 = vld [vmem:[#allocation13 + $0x60] ss:$8 sps:$4 sm:$0xff]   ;;  %v7155_v41 = vpop.f32.mrf.mxu0 }
 0x25c   :  { %3801 = vmatprep.subr.bf16.mxu0 %v6052_v43  ;;  %v7157_v43 = vpop.f32.mrf.mxu1 }
 0x25e   :  { %3739 = vmatpush1.bf16.msra.mxu1 %v6047_v1  ;;  %v6109_v1 = vld [vmem:[#allocation13 + $0x54] ss:$8 sps:$4 sm:$0xff]  }
 0x25f   :  { %3802 = vmatpush1.bf16.msra.mxu0 %v6050_v7  ;;  %3740 = vmatprep.subr.bf16.mxu1 %v6055_v20  ;;  %v6107_v7 = vld [vmem:[#allocation13 + $0x50] ss:$8 sps:$4 sm:$0xff]   ;;  %v7159_v20 = vpop.f32.mrf.mxu0 }
 0x260   :  { %3803 = vmatprep.subr.bf16.mxu0 %v6058_v6  ;;  %v7161_v6 = vpop.f32.mrf.mxu1 }
 0x262   :  { %3741 = vmatpush2.bf16.msra.mxu1 %v6053_v51  ;;  %v6115_v51 = vld [vmem:[#allocation13 + $0x34] ss:$8 sps:$4 sm:$0xff]  }
 0x263   :  { %3804 = vmatpush2.bf16.msra.mxu0 %v6056_v17  ;;  %3742 = vmatprep.subr.bf16.mxu1 %v6061_v39  ;;  %v6113_v39 = vld [vmem:[#allocation13 + $0x30] ss:$8 sps:$4 sm:$0xff]  }
 0x264   :  { %3805 = vmatprep.subr.bf16.mxu0 %v6064_v54 }
 0x266   :  { %3743 = vmatpush2.bf16.msra.mxu1 %v6059_v44  ;;  %v6149_v44 = vld [vmem:[#allocation13 + $0x170] ss:$8 sps:$4 sm:$0xff]  }
 0x267   :  { %3806 = vmatpush2.bf16.msra.mxu0 %v6062_v3  ;;  %3744 = vmatprep.subr.bf16.mxu1 %v6067_v38  ;;  %v6116_v3 = vld [vmem:[#allocation13 + $0x20] ss:$8 sps:$4 sm:$0xff]   ;;  %v6121_v38 = vld [vmem:[#allocation13 + $0x14] ss:$8 sps:$4 sm:$0xff]  }
 0x268   :  { %3807 = vmatprep.subr.bf16.mxu0 %v6070_v37  ;;  %v6154_v37 = vld [vmem:[#allocation13 + $0x164] ss:$8 sps:$4 sm:$0xff]  }
 0x26a   :  { %3745 = vmatpush2.bf16.msra.mxu1 %v6065_v42 }
 0x26b   :  { %3808 = vmatpush2.bf16.msra.mxu0 %v6068_v28  ;;  %3746 = vmatprep.subr.bf16.mxu1 %v6073_v45  ;;  %v6119_v45 = vld [vmem:[#allocation13 + $0x10] ss:$8 sps:$4 sm:$0xff]  }
 0x26c   :  { %3809 = vmatprep.subr.bf16.mxu0 %v6076_v55  ;;  %v6124_v55 = vld [vmem:[#allocation13 + $0x4] ss:$8 sps:$4 sm:$0xff]  }
 0x26e   :  { %3747 = vmatpush2.bf16.msra.mxu1 %v6071_v49  ;;  %v6157_v49 = vld [vmem:[#allocation13 + $0x154] ss:$8 sps:$4 sm:$0xff]  }
 0x26f   :  { %3810 = vmatpush2.bf16.msra.mxu0 %v6074_v24  ;;  %3748 = vmatprep.subr.bf16.mxu1 %v6079_v31 }
 0x270   :  { %3811 = vmatprep.subr.bf16.mxu0 %v6082_v47  ;;  %v6160_v47 = vld [vmem:[#allocation13 + $0x144] ss:$8 sps:$4 sm:$0xff]  }
 0x272   :  { %3749 = vmatpush2.bf16.msra.mxu1 %v6077_v4  ;;  %v6122_v4 = vld [vmem:[#allocation13] ss:$8 sps:$4 sm:$0xff]  }
 0x273   :  { %3812 = vmatpush2.bf16.msra.mxu0 %v6080_v48  ;;  %3750 = vmatprep.subr.bf16.mxu1 %v6085_v33  ;;  %v6127_v48 = vld [vmem:[#allocation13 + $0xf4] ss:$8 sps:$4 sm:$0xff]   ;;  %v6158_v33 = vld [vmem:[#allocation13 + $0x140] ss:$8 sps:$4 sm:$0xff]  }
 0x274   :  { %3813 = vmatprep.subr.bf16.mxu0 %v6088_v36  ;;  %v6163_v36 = vld [vmem:[#allocation13 + $0x134] ss:$8 sps:$4 sm:$0xff]  }
 0x276   :  { %3751 = vmatpush2.bf16.msra.mxu1 %v6083_v58 }
 0x277   :  { %3814 = vmatpush2.bf16.msra.mxu0 %v6086_v5  ;;  %3752 = vmatprep.subr.bf16.mxu1 %v6091_v52  ;;  %v6125_v52 = vld [vmem:[#allocation13 + $0xf0] ss:$8 sps:$4 sm:$0xff]  }
 0x278   :  { %3815 = vmatprep.subr.bf16.mxu0 %v6094_v46  ;;  %v6130_v46 = vld [vmem:[#allocation13 + $0xe4] ss:$8 sps:$4 sm:$0xff]  }
 0x27a   :  { %3753 = vmatpush2.bf16.msra.mxu1 %v6089_v57  ;;  %v6161_v57 = vld [vmem:[#allocation13 + $0x130] ss:$8 sps:$4 sm:$0xff]  }
 0x27b   :  { %3816 = vmatpush2.bf16.msra.mxu0 %v6092_v59  ;;  %3754 = vmatprep.subr.bf16.mxu1 %v6097_v56  ;;  %v6166_v59 = vld [vmem:[#allocation13 + $0x124] ss:$8 sps:$4 sm:$0xff]  }
 0x27c   :  { %3817 = vmatprep.subr.bf16.mxu0 %v6100_v18 }
 0x27e   :  { %3755 = vmatpush2.bf16.msra.mxu1 %v6095_v22  ;;  %v6128_v22 = vld [vmem:[#allocation13 + $0xe0] ss:$8 sps:$4 sm:$0xff]  }
 0x27f   :  { %3818 = vmatpush2.bf16.msra.mxu0 %v6098_v8  ;;  %4332 = vmatprep.subr.bf16.mxu1 %v6103_v40  ;;  %v6133_v8 = vld [vmem:[#allocation13 + $0xd4] ss:$8 sps:$4 sm:$0xff]   ;;  %v6164_v40 = vld [vmem:[#allocation13 + $0x120] ss:$8 sps:$4 sm:$0xff]  }
 0x281   :  { %3757 = vmatmul.mubr.bf16.vlgmr.msra.gmra.mxu1 %v6958_v12  ;;  %v6112_v12 = vld [vmem:[#allocation13 + $0x44] ss:$8 sps:$4 sm:$0xff]  }
 0x282   :  { %3820 = vmatmul.mubr.bf16.vlgmr.msra.gmra.mxu0 %v7088_v21  ;;  %3766 = vmatprep.mubr.bf16.mxu1 %v7002_v19  ;;  %v7164_v19 = vpop.f32.mrf.mxu0  ;;  %v6110_v21 = vld [vmem:[#allocation13 + $0x40] ss:$8 sps:$4 sm:$0xff]  }
 0x283   :  { %3829 = vmatprep.mubr.bf16.mxu0 %v7093_v15  ;;  %4333 = vmatpush1.bf16.msra.mxu1 %v6101_v9  ;;  %v7169_v15 = vpop.f32.mrf.mxu1  ;;  %v6169_v9 = vld [vmem:[#allocation13 + $0x114] ss:$8 sps:$4 sm:$0xff]  }
 0x284   :  { %4334 = vmatprep.subr.bf16.mxu1 %v6106_v62  ;;  %v7171_v17 = vpop.f32.mrf.mxu0 }
 0x285   :  { %v7173_v54 = vpop.f32.mrf.mxu1 }
 0x287   :  { %4335 = vmatpush1.bf16.msra.mxu1 %v6104_v13 }
 0x288   :  { %4336 = vmatprep.subr.bf16.mxu1 %v6109_v1  ;;  %v6131_v1 = vld [vmem:[#allocation13 + $0xd0] ss:$8 sps:$4 sm:$0xff]  }
 0x289   :  { %3767 = vmatmul.mubr.bf16.gmra.mxu1 %v7023_v23  ;;  %v6118_v23 = vld [vmem:[#allocation13 + $0x24] ss:$8 sps:$4 sm:$0xff]  }
 0x28a   :  { %3830 = vmatmul.mubr.bf16.gmra.mxu0 %v7103_v10  ;;  %3776 = vmatprep.mubr.bf16.mxu1 %v7036_v14  ;;  %v6151_v10 = vld [vmem:[#allocation13 + $0x174] ss:$8 sps:$4 sm:$0xff]   ;;  %v7176_v14 = vpop.f32.mrf.mxu0 }
 0x28b   :  { %3839 = vmatprep.mubr.bf16.mxu0 %v7108_v61  ;;  %4337 = vmatpush1.bf16.msra.mxu1 %v6107_v7  ;;  %v7178_v61 = vpop.f32.mrf.mxu1 }
 0x28c   :  { %4338 = vmatprep.subr.bf16.mxu1 %v6112_v12  ;;  %4395 = vmatprep.subr.bf16.mxu0 %v6151_v10  ;;  %v7181_v42 = vpop.f32.mrf.mxu0  ;;  %v6136_v12 = vld [vmem:[#allocation13 + $0xc4] ss:$8 sps:$4 sm:$0xff]  }
 0x28d   :  { %4396 = vmatpush1.bf16.msra.mxu0 %v6149_v44  ;;  %v7183_v28 = vpop.f32.mrf.mxu1  ;;  %v6139_v44 = vld [vmem:[#allocation13 + $0xb4] ss:$8 sps:$4 sm:$0xff]  }
 0x28e   :  { %4397 = vmatprep.subr.bf16.mxu0 %v6154_v37  ;;  %v7185_v24 = vpop.f32.mrf.mxu0 }
 0x28f   :  { %4339 = vmatpush1.bf16.msra.mxu1 %v6110_v21  ;;  %v7187_v31 = vpop.f32.mrf.mxu1  ;;  %v6167_v21 = vld [vmem:[#allocation13 + $0x110] ss:$8 sps:$4 sm:$0xff]  }
 0x290   :  { %4340 = vmatprep.subr.bf16.mxu1 %v6115_v51  ;;  %v7189_v58 = vpop.f32.mrf.mxu0  ;;  %v6172_v51 = vld [vmem:[#allocation13 + $0x104] ss:$8 sps:$4 sm:$0xff]  }
 0x291   :  { %3777 = vmatmul.mubr.bf16.gmra.mxu1 %v7053_v0  ;;  %v6152_v0 = vld [vmem:[#allocation13 + $0x160] ss:$8 sps:$4 sm:$0xff]   ;;  %v7191_v5 = vpop.f32.mrf.mxu1 }
 0x292   :  { %3840 = vmatmul.mubr.bf16.gmra.mxu0 %v7113_v32  ;;  %v6155_v32 = vld [vmem:[#allocation13 + $0x150] ss:$8 sps:$4 sm:$0xff]   ;;  %v7193_v56 = vpop.f32.mrf.mxu0 }
 0x293   :  { %4341 = vmatpush1.bf16.msra.mxu1 %v6113_v39  ;;  %4398 = vmatpush1.bf16.msra.mxu0 %v6152_v0  ;;  %v7195_v18 = vpop.f32.mrf.mxu1  ;;  %v6137_v0 = vld [vmem:[#allocation13 + $0xb0] ss:$8 sps:$4 sm:$0xff]  }
 0x294   :  { %4342 = vmatprep.subr.bf16.mxu1 %v6118_v23  ;;  %4399 = vmatprep.subr.bf16.mxu0 %v6157_v49  ;;  %v7197_v62 = vpop.f32.mrf.mxu0  ;;  %v6134_v23 = vld [vmem:[#allocation13 + $0xc0] ss:$8 sps:$4 sm:$0xff]   ;;  %v7211_v49 = vld [vmem:[#allocation12] sm:$0xf] }
 0x295   :  { %v7199_v13 = vpop.f32.mrf.mxu1 }
 0x296   :  { %v7201_v7 = vpop.f32.mrf.mxu0 }
 0x297   :  { %4343 = vmatpush1.bf16.msra.mxu1 %v6116_v3  ;;  %4400 = vmatpush1.bf16.msra.mxu0 %v6155_v32  ;;  %v7203_v39 = vpop.f32.mrf.mxu1  ;;  %v6170_v3 = vld [vmem:[#allocation13 + $0x100] ss:$8 sps:$4 sm:$0xff]   ;;  %v6173_v32 = vld [vmem:[#allocation13 + $0x1f0] ss:$8 sps:$4 sm:$0xff]  }
 0x298   :  { %4344 = vmatprep.subr.bf16.mxu1 %v6121_v38  ;;  %4401 = vmatprep.subr.bf16.mxu0 %v6160_v47  ;;  %v7205_v10 = vpop.f32.mrf.mxu0  ;;  %v6175_v38 = vld [vmem:[#allocation13 + $0x1f4] ss:$8 sps:$4 sm:$0xff]   ;;  %v6178_v47 = vld [vmem:[#allocation13 + $0x1e4] ss:$8 sps:$4 sm:$0xff]  }
 0x299   :  { %v7207_v37 = vpop.f32.mrf.mxu1 }
 0x29b   :  { %4345 = vmatpush1.bf16.msra.mxu1 %v6119_v45  ;;  %4402 = vmatpush1.bf16.msra.mxu0 %v6158_v33  ;;  %v7209_v45 = vpop.f32.mrf.mxu0  ;;  %v6140_v33 = vld [vmem:[#allocation13 + $0xa0] ss:$8 sps:$4 sm:$0xff]  }
 0x29c   :  { %4346 = vmatprep.subr.bf16.mxu1 %v6124_v55  ;;  %4403 = vmatprep.subr.bf16.mxu0 %v6163_v36  ;;  %v6142_v55 = vld [vmem:[#allocation13 + $0xa4] ss:$8 sps:$4 sm:$0xff]   ;;  %v7221_v36 = vrot.slane %v7211_v49, %v6672_v26 }
 0x29f   :  { %4347 = vmatpush1.bf16.msra.mxu1 %v6122_v4  ;;  %4404 = vmatpush1.bf16.msra.mxu0 %v6161_v57  ;;  %v7213_v4 = vpop.f32.mrf.mxu1  ;;  %v6176_v57 = vld [vmem:[#allocation13 + $0x1e0] ss:$8 sps:$4 sm:$0xff]  }
 0x2a0   :  { %4348 = vmatprep.subr.bf16.mxu1 %v6127_v48  ;;  %4405 = vmatprep.subr.bf16.mxu0 %v6166_v59  ;;  %v7217_v48 = vrot.slane %v7211_v49, %v6678_v29  ;;  %v6181_v59 = vld [vmem:[#allocation13 + $0x1d4] ss:$8 sps:$4 sm:$0xff]  }
 0x2a3   :  { %4349 = vmatpush2.bf16.msra.mxu1 %v6125_v52  ;;  %4406 = vmatpush1.bf16.msra.mxu0 %v6164_v40  ;;  %v7223_v52 = vpop.f32.mrf.mxu0  ;;  %v3257_v40 = vadd.f32 %v7133_v35, %v7217_v48 }
 0x2a4   :  { %4350 = vmatprep.subr.bf16.mxu1 %v6130_v46  ;;  %4407 = vmatprep.subr.bf16.mxu0 %v6169_v9  ;;  %v6145_v46 = vld [vmem:[#allocation13 + $0x94] ss:$8 sps:$4 sm:$0xff]   ;;  %v6143_v9 = vld [vmem:[#allocation13 + $0x90] ss:$8 sps:$4 sm:$0xff]  }
 0x2a5   :  { %v3320_v35 = vadd.f32 %v7147_v50, %v3257_v40  ;;  %v3267_v50 = vadd.f32 %v7141_v53, %v7217_v48  ;;  %v3271_v53 = vadd.f32 %v7149_v60, %v7217_v48  ;;  %v6187_v40 = vld [vmem:[#allocation13 + $0x1b4] ss:$8 sps:$4 sm:$0xff]  }
 0x2a7   :  { %4351 = vmatpush2.bf16.msra.mxu1 %v6128_v22  ;;  %4408 = vmatpush1.bf16.msra.mxu0 %v6167_v21  ;;  %v7225_v22 = vpop.f32.mrf.mxu0  ;;  %v6179_v21 = vld [vmem:[#allocation13 + $0x1d0] ss:$8 sps:$4 sm:$0xff]  }
 0x2a8   :  { %4352 = vmatprep.subr.bf16.mxu1 %v6133_v8  ;;  %4409 = vmatprep.subr.bf16.mxu0 %v6172_v51  ;;  %v7227_v8 = vpop.f32.mrf.mxu1  ;;  %v3259_v51 = vadd.f32 %v7135_v34, %v7221_v36 }
 0x2aa   :  { %v3322_v34 = vadd.f32 %v7155_v41, %v3259_v51 }
 0x2ab   :  { %4353 = vmatpush2.bf16.msra.mxu1 %v6131_v1  ;;  %4410 = vmatpush1.bf16.msra.mxu0 %v6170_v3  ;;  %v3255_v1 = vadd.f32 %v7131_v30, %v7221_v36  ;;  %v7237_v3 = vpop.f32.mrf.mxu1  ;;  %v6146_v30 = vld [vmem:[#allocation13 + $0x80] ss:$8 sps:$4 sm:$0xff]  }
 0x2ac   :  { %4354 = vmatprep.subr.bf16.mxu1 %v6136_v12  ;;  %4411 = vmatprep.subr.bf16.mxu0 %v6175_v38  ;;  %v6148_v12 = vld [vmem:[#allocation13 + $0x84] ss:$8 sps:$4 sm:$0xff]   ;;  %v3261_v38 = vadd.f32 %v7137_v2, %v7217_v48  ;;  %v3385_v41 = vadd.f32 %v7187_v31, %v3322_v34 }
 0x2ae   :  { %v3448_v60 = vadd.f32 %v7209_v45, %v3385_v41  ;;  %v6190_v45 = vld [vmem:[#allocation13 + $0x1a4] ss:$8 sps:$4 sm:$0xff]  }
 0x2af   :  { %4355 = vmatpush2.bf16.msra.mxu1 %v6134_v23  ;;  %4412 = vmatpush2.bf16.msra.mxu0 %v6173_v32  ;;  %v6184_v23 = vld [vmem:[#allocation13 + $0x1c4] ss:$8 sps:$4 sm:$0xff]   ;;  %v3383_v32 = vadd.f32 %v7183_v28, %v3320_v35  ;;  %v3269_v28 = vadd.f32 %v7145_v16, %v7221_v36  ;;  %v7277_v35 = vstv %s7245_s11 }
 0x2b0   :  { %4356 = vmatprep.subr.bf16.mxu1 %v6139_v44  ;;  %4413 = vmatprep.subr.bf16.mxu0 %v6178_v47  ;;  %v7235_v44 = vpop.f32.mrf.mxu0 }
 0x2b2   :  { %v7250_v2 = vpop.f32.mrf.mxu0 }
 0x2b3   :  { %4357 = vmatpush2.bf16.msra.mxu1 %v6137_v0  ;;  %4414 = vmatpush2.bf16.msra.mxu0 %v6176_v57  ;;  %v3318_v0 = vadd.f32 %v7143_v63, %v3255_v1  ;;  %v3324_v63 = vadd.f32 %v7159_v20, %v3261_v38  ;;  %v3330_v20 = vadd.f32 %v7171_v17, %v3267_v50  ;;  %v6185_v1 = vld [vmem:[#allocation13 + $0x1b0] ss:$8 sps:$4 sm:$0xff]   ;;  %v6193_v50 = vld [vmem:[#allocation13 + $0x194] ss:$8 sps:$4 sm:$0xff]  }
 0x2b4   :  { %4358 = vmatprep.subr.bf16.mxu1 %v6142_v55  ;;  %4415 = vmatprep.subr.bf16.mxu0 %v6181_v59  ;;  %v6182_v55 = vld [vmem:[#allocation13 + $0x1c0] ss:$8 sps:$4 sm:$0xff]   ;;  %v3277_v17 = vadd.f32 %v7161_v6, %v7217_v48 }
 0x2b5   :  { %v3381_v47 = vadd.f32 %v7178_v61, %v3318_v0  ;;  %v3446_v61 = vadd.f32 %v7205_v10, %v3383_v32  ;;  %v3387_v59 = vadd.f32 %v7191_v5, %v3324_v63  ;;  %v3332_v5 = vadd.f32 %v7176_v14, %v3269_v28  ;;  %v6191_v28 = vld [vmem:[#allocation13 + $0x190] ss:$8 sps:$4 sm:$0xff]  }
 0x2b6   :  { %v3393_v10 = vadd.f32 %v7199_v13, %v3330_v20  ;;  %v3279_v14 = vadd.f32 %v7169_v15, %v7221_v36 }
 0x2b7   :  { %4359 = vmatpush2.bf16.msra.mxu1 %v6140_v33  ;;  %4416 = vmatpush2.bf16.msra.mxu0 %v6179_v21  ;;  %v7252_v33 = vpop.f32.mrf.mxu1  ;;  %v3444_v31 = vadd.f32 %v7201_v7, %v3381_v47  ;;  %v3334_v7 = vadd.f32 %v7181_v42, %v3271_v53  ;;  %v3395_v13 = vadd.f32 %v7203_v39, %v3332_v5 }
 0x2b8   :  { %4360 = vmatprep.subr.bf16.mxu1 %v6145_v46  ;;  %4417 = vmatprep.subr.bf16.mxu0 %v6184_v23  ;;  %v3265_v46 = vadd.f32 %v7139_v11, %v7221_v36  ;;  %v3275_v11 = vadd.f32 %v7157_v43, %v7221_v36  ;;  %v3450_v23 = vadd.f32 %v7223_v52, %v3387_v59 }
 0x2b9   :  { %v3456_v32 = vadd.f32 %v7235_v44, %v3393_v10  ;;  %v3397_v39 = vadd.f32 %v7207_v37, %v3334_v7  ;;  %v3281_v47 = vadd.f32 %v7173_v54, %v7217_v48  ;;  %v3342_v63 = vadd.f32 %v7193_v56, %v3279_v14 }
 0x2ba   :  { %v3338_v38 = vadd.f32 %v7185_v24, %v3275_v11  ;;  %v3340_v24 = vadd.f32 %v7189_v58, %v3277_v17 }
 0x2bb   :  { %4361 = vmatpush2.bf16.msra.mxu1 %v6143_v9  ;;  %4418 = vmatpush2.bf16.msra.mxu0 %v6182_v55  ;;  %v3459_v9 = vpop.f32.mrf.mxu0  ;;  %v6188_v55 = vld [vmem:[#allocation13 + $0x1a0] ss:$8 sps:$4 sm:$0xff]  }
 0x2bc   :  { %4362 = vmatprep.subr.bf16.mxu1 %v6148_v12  ;;  %v3328_v12 = vadd.f32 %v7164_v19, %v3265_v46  ;;  %4419 = vmatprep.subr.bf16.mxu0 %v6187_v40  ;;  %v3403_v59 = vadd.f32 %v7227_v8, %v3340_v24  ;;  %v6194_v8 = vld [vmem:[#allocation13 + $0x180] ss:$8 sps:$4 sm:$0xff]  }
 0x2be   :  { %v3391_v6 = vadd.f32 %v7195_v18, %v3328_v12 }
 0x2bf   :  { %4363 = vmatpush2.bf16.msra.mxu1 %v6146_v30  ;;  %4420 = vmatpush2.bf16.msra.mxu0 %v6185_v1  ;;  %v7284_v30 = vpop.f32.mrf.mxu0  ;;  %v3405_v1 = vadd.f32 %v7237_v3, %v3342_v63 }
 0x2c0   :  { %v3506_v57 = vpop.f32.mrf.mxu1  ;;  %4421 = vmatprep.subr.bf16.mxu0 %v6190_v45  ;;  %v3454_v58 = vadd.f32 %v7225_v22, %v3391_v6  ;;  %v3460_v22 = vadd.f32 %v3459_v9, %v3397_v39 }
 0x2c1   :  { %v3507_v43 = vadd.f32 %v3506_v57, %v3444_v31  ;;  %v3465_v44 = vpop.f32.mrf.mxu0  ;;  %v3458_v57 = vadd.f32 %v7250_v2, %v3395_v13  ;;  %v6196_v31 = vld [vmem:[#allocation13 + $0x184] ss:$8 sps:$4 sm:$0xff]   ;;  %v3401_v2 = vadd.f32 %v7213_v4, %v3338_v38 }
 0x2c2   :  { %v3508_v16 = vpop.f32.mrf.mxu1  ;;  %v3466_v9 = vadd.f32 %v3465_v44, %v3403_v59 }
 0x2c3   :  { %v3509_v21 = vadd.f32 %v3508_v16, %v3446_v61  ;;  %v3876_v15 = vmul.f32 %v7277_v35, %v3507_v43  ;;  %4422 = vmatpush2.bf16.msra.mxu0 %v6188_v55  ;;  %vm3851_vm14 = vcmp.gt.f32.partialorder %v3507_v43, 0.0  ;;  %v3344_v16 = vadd.f32 %v7197_v62, %v3281_v47  ;;  %v3467_v12 = vpop.f32.mrf.mxu0 }
 0x2c4   :  { %v3510_v51 = vpop.f32.mrf.mxu1  ;;  %4423 = vmatprep.subr.bf16.mxu0 %v6193_v50 }
 0x2c5   :  { %v3511_v19 = vadd.f32 %v3510_v51, %v3448_v60  ;;  %v3877_v42 = vmul.f32 %v7277_v35, %v3509_v21  ;;  %vm3852_vm13 = vcmp.gt.f32.partialorder %v3509_v21, 0.0  ;;  %v3900_v54 = vsel %vm3851_vm14, %v3507_v43, %v3876_v15  ;;  %v3469_v51 = vpop.f32.mrf.mxu0 }
 0x2c6   :  { %v3512_v0 = vpop.f32.mrf.mxu1  ;;  %v3407_v4 = vadd.f32 %v7252_v33, %v3344_v16  ;;  %v3464_v43 = vadd.f32 %v7284_v30, %v3401_v2 }
 0x2c7   :  { %vm3855_vm12 = vcmp.gt.f32.partialorder %v3511_v19, 0.0  ;;  %v3880_v52 = vmul.f32 %v7277_v35, %v3511_v19  ;;  %v3513_v34 = vadd.f32 %v3512_v0, %v3450_v23  ;;  %v3901_v53 = vsel %vm3852_vm13, %v3509_v21, %v3877_v42  ;;  %4424 = vmatpush2.bf16.msra.mxu0 %v6191_v28  ;;  %v3569_v44 = vpop.f32.mrf.mxu0 }
 0x2c8   :  { %v3516_v18 = vpop.f32.mrf.mxu1  ;;  %4425 = vmatprep.subr.bf16.mxu0 %v6196_v31  ;;  %v3470_v42 = vadd.f32 %v3469_v51, %v3407_v4  ;;  %v6203_v51 = vld [vmem:[#allocation16 + $0x60] sm:$0xff]  }
 0x2c9   :  { %vm3856_vm15 = vcmp.gt.f32.partialorder %v3513_v34, 0.0  ;;  %v3881_v36 = vmul.f32 %v7277_v35, %v3513_v34  ;;  %v3904_v46 = vsel %vm3855_vm12, %v3511_v19, %v3880_v52  ;;  %v3517_v48 = vadd.f32 %v3516_v18, %v3454_v58 }
 0x2ca   :  { %v3518_v41 = vpop.f32.mrf.mxu1  ;;  %v3924_v20 = vpack.c.bf16 %v3904_v46, %v3900_v54  ;;  %v3468_v19 = vadd.f32 %v3467_v12, %v3405_v1  ;;  %v3571_v46 = vpop.f32.mrf.mxu0 }
 0x2cb   :  { %v3519_v37 = vadd.f32 %v3518_v41, %v3456_v32  ;;  %v3905_v61 = vsel %vm3856_vm15, %v3513_v34, %v3881_v36  ;;  %v3884_v10 = vmul.f32 %v7277_v35, %v3517_v48  ;;  %4426 = vmatpush2.bf16.msra.mxu0 %v6194_v8  ;;  %vm3859_vm2 = vcmp.gt.f32.partialorder %v3517_v48, 0.0  ;;  %v6197_v8 = vld [vmem:[#allocation16 + $0x78] sm:$0xff]  }
 0x2cc   :  { %v3520_v56 = vpop.f32.mrf.mxu1  ;;  %v3925_v40 = vpack.c.bf16 %v3905_v61, %v3901_v53  ;;  %v3573_v41 = vpop.f32.mrf.mxu0  ;;  %5426 = vmatprep.subr.bf16.mxu1 %v6197_v8 }
 0x2cd   :  { %v3521_v11 = vadd.f32 %v3520_v56, %v3458_v57  ;;  %v3885_v21 = vmul.f32 %v7277_v35, %v3519_v37  ;;  %vm3860_vm1 = vcmp.gt.f32.partialorder %v3519_v37, 0.0  ;;  %v3908_v55 = vsel %vm3859_vm2, %v3517_v48, %v3884_v10  ;;  %v6200_v10 = vld [vmem:[#allocation16 + $0x30] sm:$0xff]  }
 0x2ce   :  { %v3522_v60 = vpop.f32.mrf.mxu1  ;;  %4364 = vmatprep.mubr.bf16.mxu1 %v3925_v40  ;;  %v3575_v28 = vpop.f32.mrf.mxu0 }
 0x2cf   :  { %vm3863_vm0 = vcmp.gt.f32.partialorder %v3521_v11, 0.0  ;;  %v3888_v5 = vmul.f32 %v7277_v35, %v3521_v11  ;;  %v3523_v17 = vadd.f32 %v3522_v60, %v3460_v22  ;;  %4365 = vmatmul.mubr.bf16.vlgmr.msra.gmra.mxu1 %v3924_v20  ;;  %v3909_v38 = vsel %vm3860_vm1, %v3519_v37, %v3885_v21  ;;  %v6198_v21 = vld [vmem:[#allocation16 + $0x38] sm:$0xff]  }
 0x2d0   :  { %v3526_v62 = vpop.f32.mrf.mxu1  ;;  %v7316_v57 = vpop.f32.mrf.mxu0  ;;  %5427 = vmatpush3.bf16.msra.mxu1 %v6198_v21 }
 0x2d1   :  { %vm3864_vm3 = vcmp.gt.f32.partialorder %v3523_v17, 0.0  ;;  %v3889_v3 = vmul.f32 %v7277_v35, %v3523_v17  ;;  %v3912_v23 = vsel %vm3863_vm0, %v3521_v11, %v3888_v5  ;;  %v3527_v6 = vadd.f32 %v3526_v62, %v3464_v43  ;;  %v6199_v5 = vld [vmem:[#allocation16 + $0x70] sm:$0xff]   ;;  %v6201_v62 = vld [vmem:[#allocation16 + $0x68] sm:$0xff]  }
 0x2d2   :  { %v3528_v7 = vpop.f32.mrf.mxu1  ;;  %v3928_v52 = vpack.c.bf16 %v3912_v23, %v3908_v55  ;;  %v7318_v37 = vpop.f32.mrf.mxu0  ;;  %5428 = vmatprep.subr.bf16.mxu1 %v6199_v5  ;;  %v6202_v43 = vld [vmem:[#allocation16 + $0x28] sm:$0xff]  }
 0x2d3   :  { %v3529_v45 = vadd.f32 %v3528_v7, %v3466_v9  ;;  %v3913_v14 = vsel %vm3864_vm3, %v3523_v17, %v3889_v3  ;;  %v3892_v15 = vmul.f32 %v7277_v35, %v3527_v6  ;;  %vm3867_vm6 = vcmp.gt.f32.partialorder %v3527_v6, 0.0 }
 0x2d4   :  { %v3530_v13 = vpop.f32.mrf.mxu1  ;;  %v3929_v0 = vpack.c.bf16 %v3913_v14, %v3909_v38  ;;  %v7320_v53 = vpop.f32.mrf.mxu0  ;;  %5429 = vmatpush3.bf16.msra.mxu1 %v6200_v10 }
 0x2d5   :  { %v3531_v33 = vadd.f32 %v3530_v13, %v3468_v19  ;;  %v3893_v24 = vmul.f32 %v7277_v35, %v3529_v45  ;;  %vm3868_vm5 = vcmp.gt.f32.partialorder %v3529_v45, 0.0  ;;  %v3916_v63 = vsel %vm3867_vm6, %v3527_v6, %v3892_v15  ;;  %5430 = vmatprep.subr.bf16.mxu1 %v6201_v62  ;;  %v6204_v19 = vld [vmem:[#allocation16 + $0x20] sm:$0xff]  }
 0x2d6   :  { %v3532_v34 = vpop.f32.mrf.mxu1  ;;  %4374 = vmatprep.mubr.bf16.mxu1 %v3929_v0  ;;  %v7322_v61 = vpop.f32.mrf.mxu0  ;;  %v1611_v13 = vrot.slane %v7211_v49, %v293_v27  ;;  %v7492_v0 = vsub.s32 3, %v6669_v25 }
 0x2d7   :  { %vm3871_vm4 = vcmp.gt.f32.partialorder %v3531_v33, 0.0  ;;  %v3896_v30 = vmul.f32 %v7277_v35, %v3531_v33  ;;  %v3533_v32 = vadd.f32 %v3532_v34, %v3470_v42  ;;  %4375 = vmatmul.mubr.bf16.gmra.mxu1 %v3928_v52  ;;  %v3917_v36 = vsel %vm3868_vm5, %v3529_v45, %v3893_v24  ;;  %v6205_v45 = vld [vmem:[#allocation16 + $0x58] sm:$0xff]  }
 0x2d8   :  { %v7324_v59 = vpop.f32.mrf.mxu0  ;;  %5431 = vmatpush3.bf16.msra.mxu1 %v6202_v43  ;;  %v7352_v55 = vrot.slane %v7211_v49, %v7492_v0  ;;  %v3570_v52 = vadd.f32 %v3569_v44, %v1611_v13 }
 0x2d9   :  { %vm3872_vm7 = vcmp.gt.f32.partialorder %v3533_v32, 0.0  ;;  %v3897_v18 = vmul.f32 %v7277_v35, %v3533_v32  ;;  %v3920_v39 = vsel %vm3871_vm4, %v3531_v33, %v3896_v30  ;;  %5432 = vmatprep.subr.bf16.mxu1 %v6203_v51  ;;  %v3574_v30 = vadd.f32 %v3573_v41, %v1611_v13 }
 0x2da   :  { %v3932_v58 = vpack.c.bf16 %v3920_v39, %v3916_v63  ;;  %v7326_v54 = vpop.f32.mrf.mxu0  ;;  %v3572_v34 = vadd.f32 %v3571_v46, %v7352_v55  ;;  %v3576_v25 = vadd.f32 %v3575_v28, %v7352_v55  ;;  %v3580_v63 = vadd.f32 %v7316_v57, %v1611_v13 }
 0x2db   :  { %v3921_v50 = vsel %vm3872_vm7, %v3533_v32, %v3897_v18  ;;  %v3582_v46 = vadd.f32 %v7318_v37, %v7352_v55  ;;  %v3586_v28 = vadd.f32 %v7322_v61, %v7352_v55  ;;  %v3592_v61 = vadd.f32 %v7326_v54, %v7352_v55 }
 0x2dc   :  { %v3933_v47 = vpack.c.bf16 %v3921_v50, %v3917_v36  ;;  %v7328_v48 = vpop.f32.mrf.mxu0  ;;  %5433 = vmatpush3.bf16.msra.mxu1 %v6204_v19 }
 0x2dd   :  { %5434 = vmatprep.subr.bf16.mxu1 %v6205_v45  ;;  %v3590_v45 = vadd.f32 %v7324_v59, %v1611_v13 }
 0x2de   :  { %4384 = vmatprep.mubr.bf16.mxu1 %v3933_v47  ;;  %v7330_v56 = vpop.f32.mrf.mxu0 }
 0x2df   :  { %4385 = vmatmul.mubr.bf16.gmra.mxu1 %v3932_v58 }
 0x300   :  { %v3632_v40 = vpop.f32.mrf.mxu1 }
 0x301   :  { %v3695_v22 = vpop.f32.mrf.mxu0  ;;  %v3633_v32 = vadd.f32 %v3632_v40, %v3570_v52 }
 0x302   :  { %v3634_v20 = vpop.f32.mrf.mxu1 }
 0x303   :  { %v3697_v11 = vpop.f32.mrf.mxu0  ;;  %v3635_v15 = vadd.f32 %v3634_v20, %v3572_v34  ;;  %v3696_v36 = vadd.f32 %v3695_v22, %v3633_v32 }
 0x304   :  { %v3636_v31 = vpop.f32.mrf.mxu1 }
 0x305   :  { %v3699_v16 = vpop.f32.mrf.mxu0  ;;  %v3637_v27 = vadd.f32 %v3636_v31, %v3574_v30  ;;  %v3698_v50 = vadd.f32 %v3697_v11, %v3635_v15  ;;  %v3584_v31 = vadd.f32 %v7320_v53, %v1611_v13 }
 0x306   :  { %v3638_v2 = vpop.f32.mrf.mxu1 }
 0x307   :  { %v7332_v1 = vpop.f32.mrf.mxu0  ;;  %v3639_v58 = vadd.f32 %v3638_v2, %v3576_v25  ;;  %v3700_v41 = vadd.f32 %v3699_v16, %v3637_v27 }
 0x308   :  { %v3642_v12 = vpop.f32.mrf.mxu1 }
 0x309   :  { %v7334_v60 = vpop.f32.mrf.mxu0  ;;  %v3643_v22 = vadd.f32 %v3642_v12, %v3580_v63  ;;  %v3702_v57 = vadd.f32 %v7332_v1, %v3639_v58  ;;  %v3594_v12 = vadd.f32 %v7328_v48, %v1611_v13  ;;  %v3596_v58 = vadd.f32 %v7330_v56, %v7352_v55 }
 0x30a   :  { %v3644_v17 = vpop.f32.mrf.mxu1 }
 0x30b   :  { %v7336_v9 = vpop.f32.mrf.mxu0  ;;  %v3645_v11 = vadd.f32 %v3644_v17, %v3582_v46  ;;  %v3706_v17 = vadd.f32 %v7334_v60, %v3643_v22 }
 0x30c   :  { %v3646_v4 = vpop.f32.mrf.mxu1 }
 0x30d   :  { %v7338_v3 = vpop.f32.mrf.mxu0  ;;  %v3647_v2 = vadd.f32 %v3646_v4, %v3584_v31  ;;  %v3708_v1 = vadd.f32 %v7336_v9, %v3645_v11 }
 0x30e   :  { %v3648_v7 = vpop.f32.mrf.mxu1 }
 0x30f   :  { %v3711_v23 = vpop.f32.mrf.mxu0  ;;  %v3649_v62 = vadd.f32 %v3648_v7, %v3586_v28  ;;  %v3710_v7 = vadd.f32 %v7338_v3, %v3647_v2 }
 0x310   :  { %v7340_v38 = vpop.f32.mrf.mxu1 }
 0x311   :  { %v7342_v14 = vpop.f32.mrf.mxu0  ;;  %v3712_v52 = vadd.f32 %v3711_v23, %v3649_v62  ;;  %v3653_v3 = vadd.f32 %v7340_v38, %v3590_v45 }
 0x312   :  { %v7344_v6 = vpop.f32.mrf.mxu1 }
 0x313   :  { %v7354_v42 = vpop.f32.mrf.mxu0  ;;  %v3655_v23 = vadd.f32 %v7344_v6, %v3592_v61  ;;  %v3716_v11 = vadd.f32 %v7342_v14, %v3653_v3  ;;  %v6206_v3 = vld [vmem:[#allocation16 + $0x18] sm:$0xff]  }
 0x314   :  { %v7356_v33 = vpop.f32.mrf.mxu1  ;;  %5435 = vmatpush3.bf16.msra.mxu1 %v6206_v3 }
 0x315   :  { %v7359_v24 = vpop.f32.mrf.mxu0  ;;  %v3718_v31 = vadd.f32 %v7354_v42, %v3655_v23  ;;  %v6207_v23 = vld [vmem:[#allocation16 + $0x50] sm:$0xff]  }
 0x316   :  { %v7361_v18 = vpop.f32.mrf.mxu1  ;;  %5436 = vmatprep.subr.bf16.mxu1 %v6207_v23 }
 0x317   :  { %v7363_v39 = vpop.f32.mrf.mxu0 }
 0x341   :  { %v3758_v49 = vpop.f32.mrf.mxu1 }
 0x342   :  { %v3821_v47 = vpop.f32.mrf.mxu0  ;;  %v3759_v40 = vadd.f32 %v3758_v49, %v3696_v36  ;;  %v3657_v49 = vadd.f32 %v7356_v33, %v3594_v12  ;;  %v3659_v33 = vadd.f32 %v7361_v18, %v3596_v58  ;;  %v7410_v58 = vld [vmem:[#allocation19 + $0x60] ss:$8 sps:$4 sm:$0xff]  }
 0x343   :  { %v3760_v44 = vpop.f32.mrf.mxu1 }
 0x344   :  { %v3761_v20 = vadd.f32 %v3760_v44, %v3698_v50  ;;  %v3823_v8 = vpop.f32.mrf.mxu0  ;;  %v3822_v37 = vadd.f32 %v3821_v47, %v3759_v40  ;;  %v3720_v56 = vadd.f32 %v7359_v24, %v3657_v49  ;;  %v3722_v24 = vadd.f32 %v7363_v39, %v3659_v33  ;;  %v6210_v49 = vld [vmem:[#allocation16 + $0x8] sm:$0xff]  }
 0x345   :  { %v3762_v21 = vpop.f32.mrf.mxu1 }
 0x346   :  { %v3763_v5 = vadd.f32 %v3762_v21, %v3700_v41  ;;  %v3825_v10 = vpop.f32.mrf.mxu0  ;;  %v3824_v16 = vadd.f32 %v3823_v8, %v3761_v20  ;;  %v3878_v59 = vmul.f32 %v7277_v35, %v3822_v37  ;;  %vm3853_vm11 = vcmp.gt.f32.partialorder %v3822_v37, 0.0 }
 0x347   :  { %v3764_v43 = vpop.f32.mrf.mxu1 }
 0x348   :  { %v3826_v51 = vadd.f32 %v3825_v10, %v3763_v5  ;;  %v3827_v19 = vpop.f32.mrf.mxu0  ;;  %v3765_v53 = vadd.f32 %v3764_v43, %v3702_v57  ;;  %v3879_v15 = vmul.f32 %v7277_v35, %v3824_v16  ;;  %vm3854_vm9 = vcmp.gt.f32.partialorder %v3824_v16, 0.0 }
 0x349   :  { %v3768_v0 = vpop.f32.mrf.mxu1  ;;  %v3902_v38 = vsel %vm3853_vm11, %v3822_v37, %v3878_v59 }
 0x34a   :  { %v3831_v4 = vpop.f32.mrf.mxu0  ;;  %v3882_v34 = vmul.f32 %v7277_v35, %v3826_v51  ;;  %v3828_v30 = vadd.f32 %v3827_v19, %v3765_v53  ;;  %vm3857_vm8 = vcmp.gt.f32.partialorder %v3826_v51, 0.0  ;;  %v3769_v60 = vadd.f32 %v3768_v0, %v3706_v17 }
 0x34b   :  { %v3770_v32 = vpop.f32.mrf.mxu1  ;;  %v3903_v40 = vsel %vm3854_vm9, %v3824_v16, %v3879_v15 }
 0x34c   :  { %v3771_v54 = vadd.f32 %v3770_v32, %v3708_v1  ;;  %v3833_v27 = vpop.f32.mrf.mxu0  ;;  %vm3858_vm10 = vcmp.gt.f32.partialorder %v3828_v30, 0.0  ;;  %v3883_v48 = vmul.f32 %v7277_v35, %v3828_v30  ;;  %v3906_v36 = vsel %vm3857_vm8, %v3826_v51, %v3882_v34 }
 0x34d   :  { %v3772_v9 = vpop.f32.mrf.mxu1  ;;  %v3832_v20 = vadd.f32 %v3831_v4, %v3769_v60  ;;  %v3926_v28 = vpack.c.bf16 %v3906_v36, %v3902_v38  ;;  %v6212_v36 = vld [vmem:[#allocation16] sm:$0xff]  }
 0x34e   :  { %v3773_v13 = vadd.f32 %v3772_v9, %v3710_v7  ;;  %v3835_v25 = vpop.f32.mrf.mxu0  ;;  %v3834_v50 = vadd.f32 %v3833_v27, %v3771_v54  ;;  %v3907_v63 = vsel %vm3858_vm10, %v3828_v30, %v3883_v48  ;;  %v7493_v9 = vmov 0  }
 0x34f   :  { %v3774_v47 = vpop.f32.mrf.mxu1  ;;  %v3927_v8 = vpack.c.bf16 %v3907_v63, %v3903_v40  ;;  %v3886_v2 = vmul.f32 %v7277_v35, %v3832_v20  ;;  %vm3861_vm15 = vcmp.gt.f32.partialorder %v3832_v20, 0.0  ;;  %v7407_v63 = vld [vmem:[#allocation19 + $0x64] ss:$8 sps:$4 sm:$0xff]   ;;  %v7422_v40 = vld [vmem:[#allocation19 + $0x40] ss:$8 sps:$4 sm:$0xff]  }
 0x350   :  { %v3836_v44 = vadd.f32 %v3835_v25, %v3773_v13  ;;  %v3775_v46 = vadd.f32 %v3774_v47, %v3712_v52  ;;  %v3837_v41 = vpop.f32.mrf.mxu0  ;;  %v3887_v55 = vmul.f32 %v7277_v35, %v3834_v50  ;;  %vm3862_vm14 = vcmp.gt.f32.partialorder %v3834_v50, 0.0  ;;  %v6208_v13 = vld [vmem:[#allocation16 + $0x10] sm:$0xff]   ;;  %v6209_v25 = vld [vmem:[#allocation16 + $0x48] sm:$0xff]  }
 0x351   :  { %v3778_v6 = vpop.f32.mrf.mxu1  ;;  %4427 = vmatprep.mubr.bf16.mxu0 %v3927_v8  ;;  %v3910_v4 = vsel %vm3861_vm15, %v3832_v20, %v3886_v2  ;;  %5437 = vmatpush3.bf16.msra.mxu1 %v6208_v13  ;;  %v6215_v47 = vld [vmem:[#allocation19 + $0x74] ss:$8 sps:$4 sm:$0xff]  }
 0x352   :  { %v3838_v21 = vadd.f32 %v3837_v41, %v3775_v46  ;;  %v3841_v22 = vpop.f32.mrf.mxu0  ;;  %v3890_v5 = vmul.f32 %v7277_v35, %v3836_v44  ;;  %vm3865_vm12 = vcmp.gt.f32.partialorder %v3836_v44, 0.0  ;;  %4428 = vmatmul.mubr.bf16.vlgmr.msra.gmra.mxu0 %v3926_v28  ;;  %v3779_v62 = vadd.f32 %v3778_v6, %v3716_v11  ;;  %5438 = vmatprep.subr.bf16.mxu1 %v6209_v25  ;;  %v7416_v46 = vld [vmem:[#allocation19 + $0x50] ss:$8 sps:$4 sm:$0xff]   ;;  %v7419_v41 = vld [vmem:[#allocation19 + $0x44] ss:$8 sps:$4 sm:$0xff]  }
 0x353   :  { %v3780_v10 = vpop.f32.mrf.mxu1  ;;  %v3911_v61 = vsel %vm3862_vm14, %v3834_v50, %v3887_v55  ;;  %v7405_v50 = vld [vmem:[#allocation19 + $0x70] ss:$8 sps:$4 sm:$0xff]   ;;  %4825 = vmatprep.subr.bf16.mxu0 %v6215_v47  ;;  %v4000_v28 = vld [vmem:[#allocation15] sm:$0x3] }
 0x354   :  { %vm3866_vm13 = vcmp.gt.f32.partialorder %v3838_v21, 0.0  ;;  %v3891_v57 = vmul.f32 %v7277_v35, %v3838_v21  ;;  %v3781_v42 = vadd.f32 %v3780_v10, %v3718_v31  ;;  %v3843_v18 = vpop.f32.mrf.mxu0  ;;  %v3914_v45 = vsel %vm3865_vm12, %v3836_v44, %v3890_v5  ;;  %4826 = vmatpush1.bf16.msra.mxu0 %v7405_v50  ;;  %v7413_v44 = vld [vmem:[#allocation19 + $0x54] ss:$8 sps:$4 sm:$0xff]  }
 0x355   :  { %v3782_v14 = vpop.f32.mrf.mxu1  ;;  %v3842_v12 = vadd.f32 %v3841_v22, %v3779_v62  ;;  %v3930_v34 = vpack.c.bf16 %v3914_v45, %v3910_v4  ;;  %5439 = vmatpush3.bf16.msra.mxu1 %v6210_v49  ;;  %4827 = vmatprep.subr.bf16.mxu0 %v7407_v63  ;;  %v7430_v22 = vrot.slane %v4000_v28, %v6672_v26 }
 0x356   :  { %v3844_v43 = vadd.f32 %v3843_v18, %v3781_v42  ;;  %v3783_v37 = vadd.f32 %v3782_v14, %v3720_v56  ;;  %v3845_v16 = vpop.f32.mrf.mxu0  ;;  %v3915_v19 = vsel %vm3866_vm13, %v3838_v21, %v3891_v57  ;;  %v7427_v21 = vrot.slane %v4000_v28, %v6678_v29 }
 0x357   :  { %v3784_v51 = vpop.f32.mrf.mxu1  ;;  %v3931_v1 = vpack.c.bf16 %v3915_v19, %v3911_v61  ;;  %v3894_v32 = vmul.f32 %v7277_v35, %v3842_v12  ;;  %vm3869_vm3 = vcmp.gt.f32.partialorder %v3842_v12, 0.0 }
 0x358   :  { %v3846_v53 = vadd.f32 %v3845_v16, %v3783_v37  ;;  %v3785_v0 = vadd.f32 %v3784_v51, %v3722_v24  ;;  %v3847_v17 = vpop.f32.mrf.mxu0  ;;  %v3895_v7 = vmul.f32 %v7277_v35, %v3844_v43  ;;  %vm3870_vm0 = vcmp.gt.f32.partialorder %v3844_v43, 0.0  ;;  %4828 = vmatpush1.bf16.msra.mxu0 %v7410_v58 }
 0x359   :  { %4437 = vmatprep.mubr.bf16.mxu0 %v3931_v1  ;;  %v3918_v48 = vsel %vm3869_vm3, %v3842_v12, %v3894_v32  ;;  %4829 = vmatprep.subr.bf16.mxu0 %v7413_v44  ;;  %v7436_v24 = vstv %s5391_s10 }
 0x35a   :  { %v3848_v52 = vadd.f32 %v3847_v17, %v3785_v0  ;;  %v3898_v39 = vmul.f32 %v7277_v35, %v3846_v53  ;;  %vm3873_vm1 = vcmp.gt.f32.partialorder %v3846_v53, 0.0  ;;  %4438 = vmatmul.mubr.bf16.gmra.mxu0 %v3930_v34  ;;  %v3919_v59 = vsel %vm3870_vm0, %v3844_v43, %v3895_v7 }
 0x35c   :  { %vm3874_vm2 = vcmp.gt.f32.partialorder %v3848_v52, 0.0  ;;  %v3899_v30 = vmul.f32 %v7277_v35, %v3848_v52  ;;  %v3922_v27 = vsel %vm3873_vm1, %v3846_v53, %v3898_v39  ;;  %v6211_v35 = vld [vmem:[#allocation16 + $0x40] sm:$0xff]   ;;  %4830 = vmatpush1.bf16.msra.mxu0 %v7416_v46 }
 0x35d   :  { %v3934_v60 = vpack.c.bf16 %v3922_v27, %v3918_v48  ;;  %5440 = vmatprep.subr.bf16.mxu1 %v6211_v35  ;;  %4831 = vmatprep.subr.bf16.mxu0 %v7419_v41 }
 0x35e   :  { %v3923_v15 = vsel %vm3874_vm2, %v3848_v52, %v3899_v30  ;;  %5441 = vmatpush3.bf16.msra.mxu1 %v6212_v36 }
 0x35f   :  { %v3935_v54 = vpack.c.bf16 %v3923_v15, %v3919_v59  ;;  %5460 = vmatprep.subr.bf16.mxu1 %v6215_v47 }
 0x360   :  { %4832 = vmatpush1.bf16.msra.mxu0 %v7422_v40 }
 0x361   :  { %4447 = vmatprep.mubr.bf16.mxu0 %v3935_v54 }
 0x362   :  { %4448 = vmatmul.mubr.bf16.gmra.mxu0 %v3934_v60 }
 0x363   :  { %4857 = vmatprep.mubr.bf16.mxu0 %v7493_v9 }
 0x38f   :  { %v4366_v38 = vpop.f32.mrf.mxu1 }
 0x390   :  { %v4367_v5 = vadd.f32 %v4366_v38, %v7430_v22 }
 0x391   :  { %v4368_v20 = vpop.f32.mrf.mxu1 }
 0x392   :  { %v4369_v55 = vadd.f32 %v4368_v20, %v7427_v21 }
 0x393   :  { %v4370_v6 = vpop.f32.mrf.mxu1 }
 0x394   :  { %v4371_v42 = vadd.f32 %v4370_v6, %v7430_v22 }
 0x395   :  { %v4372_v8 = vpop.f32.mrf.mxu1 }
 0x396   :  { %v4373_v14 = vadd.f32 %v4372_v8, %v7427_v21 }
 0x397   :  { %v4376_v31 = vpop.f32.mrf.mxu1 }
 0x398   :  { %v4377_v17 = vadd.f32 %v4376_v31, %v7430_v22 }
 0x399   :  { %v4378_v33 = vpop.f32.mrf.mxu1 }
 0x39a   :  { %v4379_v61 = vadd.f32 %v4378_v33, %v7427_v21 }
 0x39b   :  { %v4380_v11 = vpop.f32.mrf.mxu1 }
 0x39c   :  { %v4381_v52 = vadd.f32 %v4380_v11, %v7430_v22 }
 0x39d   :  { %v4382_v10 = vpop.f32.mrf.mxu1 }
 0x39e   :  { %v4383_v27 = vadd.f32 %v4382_v10, %v7427_v21 }
 0x39f   :  { %v4386_v37 = vpop.f32.mrf.mxu1 }
 0x3a0   :  { %v4387_v20 = vadd.f32 %v4386_v37, %v7430_v22 }
 0x3a1   :  { %v4388_v1 = vpop.f32.mrf.mxu1 }
 0x3a2   :  { %v4389_v47 = vadd.f32 %v4388_v1, %v7427_v21 }
 0x3a3   :  { %v4390_v3 = vpop.f32.mrf.mxu1 }
 0x3a4   :  { %v4391_v33 = vadd.f32 %v4390_v3, %v7430_v22 }
 0x3a5   :  { %v4392_v6 = vpop.f32.mrf.mxu1 }
 0x412   :  { %v4429_v56 = vpop.f32.mrf.mxu0 }
 0x413   :  { %v4430_v2 = vadd.f32 %v4429_v56, %v4367_v5 }
 0x414   :  { %v4431_v57 = vpop.f32.mrf.mxu0 }
 0x415   :  { %v4432_v18 = vadd.f32 %v4431_v57, %v4369_v55  ;;  %v4472_v53 = vmul.f32 %v7436_v24, %v4430_v2  ;;  %vm4459_vm6 = vcmp.gt.f32.partialorder %v4430_v2, 0.0  ;;  %v4393_v57 = vadd.f32 %v4392_v6, %v7427_v21 }
 0x416   :  { %v4433_v62 = vpop.f32.mrf.mxu0 }
 0x417   :  { %v4434_v43 = vadd.f32 %v4433_v62, %v4371_v42  ;;  %v4473_v51 = vmul.f32 %v7436_v24, %v4432_v18  ;;  %vm4460_vm5 = vcmp.gt.f32.partialorder %v4432_v18, 0.0  ;;  %v4484_v32 = vsel %vm4459_vm6, %v4430_v2, %v4472_v53  ;;  %v6231_v53 = vld [vmem:[#allocation19 + $0x10] ss:$8 sps:$4 sm:$0xff]  }
 0x418   :  { %v4435_v16 = vpop.f32.mrf.mxu0 }
 0x419   :  { %vm4461_vm4 = vcmp.gt.f32.partialorder %v4434_v43, 0.0  ;;  %v4474_v19 = vmul.f32 %v7436_v24, %v4434_v43  ;;  %v4436_v45 = vadd.f32 %v4435_v16, %v4373_v14  ;;  %v4485_v39 = vsel %vm4460_vm5, %v4432_v18, %v4473_v51 }
 0x41a   :  { %v4439_v0 = vpop.f32.mrf.mxu0 }
 0x41b   :  { %vm4462_vm7 = vcmp.gt.f32.partialorder %v4436_v45, 0.0  ;;  %v4475_v12 = vmul.f32 %v7436_v24, %v4436_v45  ;;  %v4486_v4 = vsel %vm4461_vm4, %v4434_v43, %v4474_v19  ;;  %v4440_v59 = vadd.f32 %v4439_v0, %v4377_v17  ;;  %v6227_v19 = vld [vmem:[#allocation19 + $0x34] ss:$8 sps:$4 sm:$0xff]   ;;  %v6234_v0 = vld [vmem:[#allocation19] ss:$8 sps:$4 sm:$0xff]  }
 0x41c   :  { %v4441_v7 = vpop.f32.mrf.mxu0  ;;  %v4496_v48 = vpack.c.bf16 %v4486_v4, %v4484_v32  ;;  %4833 = vmatprep.subr.bf16.mxu0 %v6227_v19 }
 0x41d   :  { %v4442_v34 = vadd.f32 %v4441_v7, %v4379_v61  ;;  %v4487_v30 = vsel %vm4462_vm7, %v4436_v45, %v4475_v12  ;;  %v4476_v35 = vmul.f32 %v7436_v24, %v4440_v59  ;;  %vm4463_vm10 = vcmp.gt.f32.partialorder %v4440_v59, 0.0  ;;  %v6233_v45 = vld [vmem:[#allocation19 + $0x14] ss:$8 sps:$4 sm:$0xff]  }
 0x41e   :  { %v4443_v15 = vpop.f32.mrf.mxu0  ;;  %v4497_v54 = vpack.c.bf16 %v4487_v30, %v4485_v39  ;;  %v5392_v12 = vld [vmem:[#allocation18] ss:$0 sm:$0xff] }
 0x41f   :  { %v4444_v60 = vadd.f32 %v4443_v15, %v4381_v52  ;;  %v4477_v13 = vmul.f32 %v7436_v24, %v4442_v34  ;;  %vm4464_vm9 = vcmp.gt.f32.partialorder %v4442_v34, 0.0  ;;  %v4488_v10 = vsel %vm4463_vm10, %v4440_v59, %v4476_v35 }
 0x420   :  { %v4445_v23 = vpop.f32.mrf.mxu0  ;;  %4669 = vmatprep.mubr.bf16.mxu1 %v4497_v54  ;;  %v4701_v52 = vstv %s5409_s19 }
 0x421   :  { %vm4465_vm8 = vcmp.gt.f32.partialorder %v4444_v60, 0.0  ;;  %v4478_v25 = vmul.f32 %v7436_v24, %v4444_v60  ;;  %v4446_v49 = vadd.f32 %v4445_v23, %v4383_v27  ;;  %4670 = vmatmul.mubr.bf16.vlgmr.msra.gmra.mxu1 %v4496_v48  ;;  %v4489_v11 = vsel %vm4464_vm9, %v4442_v34, %v4477_v13 }
 0x422   :  { %v4449_v36 = vpop.f32.mrf.mxu0  ;;  %5468 = vmatpush1.bf16.msra.mxu1 %v7405_v50 }
 0x423   :  { %vm4466_vm11 = vcmp.gt.f32.partialorder %v4446_v49, 0.0  ;;  %v4479_v38 = vmul.f32 %v7436_v24, %v4446_v49  ;;  %5461 = vmatprep.subr.bf16.mxu1 %v7407_v63  ;;  %v4490_v31 = vsel %vm4465_vm8, %v4444_v60, %v4478_v25  ;;  %v4450_v50 = vadd.f32 %v4449_v36, %v4387_v20 }
 0x424   :  { %v4451_v8 = vpop.f32.mrf.mxu0  ;;  %v4498_v42 = vpack.c.bf16 %v4490_v31, %v4488_v10 }
 0x425   :  { %v4452_v28 = vadd.f32 %v4451_v8, %v4389_v47  ;;  %v4491_v56 = vsel %vm4466_vm11, %v4446_v49, %v4479_v38  ;;  %v4480_v14 = vmul.f32 %v7436_v24, %v4450_v50  ;;  %vm4467_vm14 = vcmp.gt.f32.partialorder %v4450_v50, 0.0 }
 0x426   :  { %v4453_v55 = vpop.f32.mrf.mxu0  ;;  %v4499_v5 = vpack.c.bf16 %v4491_v56, %v4489_v11  ;;  %5469 = vmatpush1.bf16.msra.mxu1 %v7410_v58 }
 0x427   :  { %v4454_v63 = vadd.f32 %v4453_v55, %v4391_v33  ;;  %5462 = vmatprep.subr.bf16.mxu1 %v7413_v44  ;;  %v4481_v2 = vmul.f32 %v7436_v24, %v4452_v28  ;;  %vm4468_vm13 = vcmp.gt.f32.partialorder %v4452_v28, 0.0  ;;  %v4492_v16 = vsel %vm4467_vm14, %v4450_v50, %v4480_v14 }
 0x428   :  { %v4455_v18 = vpop.f32.mrf.mxu0  ;;  %4677 = vmatprep.mubr.bf16.mxu1 %v4499_v5 }
 0x429   :  { %vm4469_vm12 = vcmp.gt.f32.partialorder %v4454_v63, 0.0  ;;  %v4482_v22 = vmul.f32 %v7436_v24, %v4454_v63  ;;  %v4456_v62 = vadd.f32 %v4455_v18, %v4393_v57  ;;  %4678 = vmatmul.mubr.bf16.gmra.mxu1 %v4498_v42  ;;  %v4493_v21 = vsel %vm4468_vm13, %v4452_v28, %v4481_v2  ;;  %v4733_v18 = vld [vmem:[#allocation21] sm:$0x3] }
 0x42a   :  { %5470 = vmatpush1.bf16.msra.mxu1 %v7416_v46  ;;  %v6225_v46 = vld [vmem:[#allocation19 + $0x30] ss:$8 sps:$4 sm:$0xff]   ;;  %v4738_v2 = vrot.slane %v4733_v18, %v6672_v26 }
 0x42b   :  { %vm4470_vm15 = vcmp.gt.f32.partialorder %v4456_v62, 0.0  ;;  %v4483_v58 = vmul.f32 %v7436_v24, %v4456_v62  ;;  %5463 = vmatprep.subr.bf16.mxu1 %v7419_v41  ;;  %v4494_v44 = vsel %vm4469_vm12, %v4454_v63, %v4482_v22  ;;  %4834 = vmatpush1.bf16.msra.mxu0 %v6225_v46  ;;  %v6230_v24 = vld [vmem:[#allocation19 + $0x24] ss:$8 sps:$4 sm:$0xff]   ;;  %v6228_v41 = vld [vmem:[#allocation19 + $0x20] ss:$8 sps:$4 sm:$0xff]   ;;  %v4742_v22 = vrot.slane %v4733_v18, %v6678_v29 }
 0x42c   :  { %v4500_v51 = vpack.c.bf16 %v4494_v44, %v4492_v16  ;;  %4835 = vmatprep.subr.bf16.mxu0 %v6230_v24 }
 0x42d   :  { %v4495_v43 = vsel %vm4470_vm15, %v4456_v62, %v4483_v58 }
 0x42e   :  { %v4501_v37 = vpack.c.bf16 %v4495_v43, %v4493_v21  ;;  %5471 = vmatpush1.bf16.msra.mxu1 %v7422_v40  ;;  %v6236_v40 = vld [vmem:[#allocation19 + $0x4] ss:$8 sps:$4 sm:$0xff]  }
 0x42f   :  { %5464 = vmatprep.subr.bf16.mxu1 %v6227_v19  ;;  %4836 = vmatpush1.bf16.msra.mxu0 %v6228_v41 }
 0x430   :  { %4685 = vmatprep.mubr.bf16.mxu1 %v4501_v37  ;;  %4837 = vmatprep.subr.bf16.mxu0 %v6233_v45 }
 0x431   :  { %4686 = vmatmul.mubr.bf16.gmra.mxu1 %v4500_v51 }
 0x432   :  { %4867 = vmatprep.mubr.bf16.mxu1 %v7493_v9  ;;  %5472 = vmatpush1.bf16.msra.mxu1 %v6225_v46 }
 0x433   :  { %5465 = vmatprep.subr.bf16.mxu1 %v6230_v24  ;;  %4838 = vmatpush1.bf16.msra.mxu0 %v6231_v53 }
 0x434   :  { %4839 = vmatprep.subr.bf16.mxu0 %v6236_v40 }
 0x436   :  { %5473 = vmatpush1.bf16.msra.mxu1 %v6228_v41 }
 0x437   :  { %5466 = vmatprep.subr.bf16.mxu1 %v6233_v45  ;;  %4840 = vmatpush1.bf16.msra.mxu0 %v6234_v0 }
 0x43a   :  { %5474 = vmatpush1.bf16.msra.mxu1 %v6231_v53 }
 0x43b   :  { %5467 = vmatprep.subr.bf16.mxu1 %v6236_v40 }
 0x43e   :  { %5475 = vmatpush1.bf16.msra.mxu1 %v6234_v0 }
 0x4e1   :  { %v5442_v61 = vpop.f32.mrf.mxu1 }
 0x4e3   :  { %v5443_v17 = vpop.f32.mrf.mxu1 }
 0x4e4   :  { %v5444_v1 = vadd.f32 %v5443_v17, %v5442_v61 }
 0x4e5   :  { %v5445_v4 = vpop.f32.mrf.mxu1 }
 0x4e6   :  { %v4672_v7 = vadd.f32 %v5444_v1, %v5392_v12 }
 0x4e7   :  { %v5446_v34 = vpop.f32.mrf.mxu1 }
 0x4e8   :  { %v5447_v39 = vadd.f32 %v5446_v34, %v5445_v4  ;;  %v4702_v32 = vmul.f32 %v4701_v52, %v4672_v7  ;;  %vm4695_vm0 = vcmp.gt.f32.partialorder %v4672_v7, 0.0 }
 0x4e9   :  { %v5448_v30 = vpop.f32.mrf.mxu1 }
 0x4ea   :  { %v4675_v59 = vadd.f32 %v5447_v39, %v5392_v12  ;;  %v4708_v60 = vsel %vm4695_vm0, %v4672_v7, %v4702_v32 }
 0x4eb   :  { %v5449_v15 = vpop.f32.mrf.mxu1 }
 0x4ec   :  { %vm4696_vm1 = vcmp.gt.f32.partialorder %v4675_v59, 0.0  ;;  %v4703_v54 = vmul.f32 %v4701_v52, %v4675_v59  ;;  %v5450_v27 = vadd.f32 %v5449_v15, %v5448_v30 }
 0x4ed   :  { %v5451_v48 = vpop.f32.mrf.mxu1 }
 0x4ee   :  { %v4709_v3 = vsel %vm4696_vm1, %v4675_v59, %v4703_v54  ;;  %v4680_v23 = vadd.f32 %v5450_v27, %v5392_v12 }
 0x4ef   :  { %v4714_v13 = vpack.c.bf16 %v4709_v3, %v4708_v60  ;;  %v5452_v25 = vpop.f32.mrf.mxu1 }
 0x4f0   :  { %v5453_v49 = vadd.f32 %v5452_v25, %v5451_v48  ;;  %v4704_v36 = vmul.f32 %v4701_v52, %v4680_v23  ;;  %vm4697_vm2 = vcmp.gt.f32.partialorder %v4680_v23, 0.0 }
 0x4f1   :  { %v5454_v35 = vpop.f32.mrf.mxu1  ;;  %4858 = vmatmul.mubr.bf16.vlgmr.msra.gmra.mxu0 %v4714_v13 }
 0x4f2   :  { %v4683_v47 = vadd.f32 %v5453_v49, %v5392_v12  ;;  %v4710_v31 = vsel %vm4697_vm2, %v4680_v23, %v4704_v36 }
 0x4f3   :  { %v5455_v38 = vpop.f32.mrf.mxu1 }
 0x4f4   :  { %vm4698_vm3 = vcmp.gt.f32.partialorder %v4683_v47, 0.0  ;;  %v4705_v20 = vmul.f32 %v4701_v52, %v4683_v47  ;;  %v5456_v6 = vadd.f32 %v5455_v38, %v5454_v35 }
 0x4f5   :  { %v5457_v8 = vpop.f32.mrf.mxu1 }
 0x4f6   :  { %v4711_v33 = vsel %vm4698_vm3, %v4683_v47, %v4705_v20  ;;  %v4688_v28 = vadd.f32 %v5456_v6, %v5392_v12 }
 0x4f7   :  { %v4715_v11 = vpack.c.bf16 %v4711_v33, %v4710_v31  ;;  %v5458_v56 = vpop.f32.mrf.mxu1 }
 0x4f8   :  { %v5459_v50 = vadd.f32 %v5458_v56, %v5457_v8  ;;  %v4706_v55 = vmul.f32 %v4701_v52, %v4688_v28  ;;  %vm4699_vm4 = vcmp.gt.f32.partialorder %v4688_v28, 0.0 }
 0x4f9   :  { %4868 = vmatmul.mubr.bf16.vlgmr.msra.gmra.mxu1 %v4715_v11 }
 0x4fa   :  { %v4691_v5 = vadd.f32 %v5459_v50, %v5392_v12  ;;  %4877 = vmatprep.mubr.bf16.mxu1 %v7493_v9  ;;  %v4712_v57 = vsel %vm4699_vm4, %v4688_v28, %v4706_v55 }
 0x4fc   :  { %vm4700_vm5 = vcmp.gt.f32.partialorder %v4691_v5, 0.0  ;;  %v4707_v10 = vmul.f32 %v4701_v52, %v4691_v5 }
 0x4fe   :  { %v4713_v63 = vsel %vm4700_vm5, %v4691_v5, %v4707_v10 }
 0x4ff   :  { %v4716_v42 = vpack.c.bf16 %v4713_v63, %v4712_v57 }
 0x501   :  { %4878 = vmatmul.mubr.bf16.gmra.mxu1 %v4716_v42 }
 0x5b1   :  { %v4859_v62 = vpop.f32.mrf.mxu0 }
 0x5b2   :  { %v4860_v14 = vadd.f32 %v4859_v62, %v4738_v2 }
 0x5b3   :  { %v4861_v58 = vpop.f32.mrf.mxu0 }
 0x5b4   :  { %4888 = vst [vmem:[#allocation22] sm:$0xff] %v4860_v14  ;;  %v4862_v44 = vadd.f32 %v4861_v58, %v4742_v22 }
 0x5b5   :  { %v4863_v21 = vpop.f32.mrf.mxu0 }
 0x5b6   :  { %4889 = vst [vmem:[#allocation22 + $0x8] sm:$0xff] %v4862_v44  ;;  %v4864_v9 = vadd.f32 %v4863_v21, %v4738_v2 }
 0x5b7   :  { %v4865_v43 = vpop.f32.mrf.mxu0 }
 0x5b8   :  { %4890 = vst [vmem:[#allocation22 + $0x10] sm:$0xff] %v4864_v9  ;;  %v4866_v37 = vadd.f32 %v4865_v43, %v4742_v22 }
 0x5b9   :  { %v4869_v16 = vpop.f32.mrf.mxu1 }
 0x5ba   :  { %4891 = vst [vmem:[#allocation22 + $0x18] sm:$0xff] %v4866_v37  ;;  %v4870_v51 = vadd.f32 %v4869_v16, %v4738_v2 }
 0x5bb   :  { %v4871_v19 = vpop.f32.mrf.mxu1 }
 0x5bc   :  { %4892 = vst [vmem:[#allocation22 + $0x20] sm:$0xff] %v4870_v51  ;;  %v4872_v46 = vadd.f32 %v4871_v19, %v4742_v22 }
 0x5bd   :  { %v4873_v26 = vpop.f32.mrf.mxu1 }
 0x5be   :  { %4893 = vst [vmem:[#allocation22 + $0x28] sm:$0xff] %v4872_v46  ;;  %v4874_v29 = vadd.f32 %v4873_v26, %v4738_v2 }
 0x5bf   :  { %v4875_v24 = vpop.f32.mrf.mxu1 }
 0x5c0   :  { %4894 = vst [vmem:[#allocation22 + $0x30] sm:$0xff] %v4874_v29  ;;  %v4876_v41 = vadd.f32 %v4875_v24, %v4742_v22 }
 0x5c1   :  { %v4879_v45 = vpop.f32.mrf.mxu1 }
 0x5c2   :  { %4895 = vst [vmem:[#allocation22 + $0x38] sm:$0xff] %v4876_v41  ;;  %v4880_v53 = vadd.f32 %v4879_v45, %v4738_v2 }
 0x5c3   :  { %v4881_v40 = vpop.f32.mrf.mxu1 }
 0x5c4   :  { %4896 = vst [vmem:[#allocation22 + $0x40] sm:$0xff] %v4880_v53  ;;  %v4882_v0 = vadd.f32 %v4881_v40, %v4742_v22 }
 0x5c5   :  { %v4883_v61 = vpop.f32.mrf.mxu1 }
 0x5c6   :  { %4897 = vst [vmem:[#allocation22 + $0x48] sm:$0xff] %v4882_v0  ;;  %v4884_v12 = vadd.f32 %v4883_v61, %v4738_v2 }
 0x5c7   :  { %v4885_v17 = vpop.f32.mrf.mxu1 }
 0x5c8   :  { %4898 = vst [vmem:[#allocation22 + $0x50] sm:$0xff] %v4884_v12  ;;  %v4886_v1 = vadd.f32 %v4885_v17, %v4742_v22 }
 0x5ca   :  { %4899 = vst [vmem:[#allocation22 + $0x58] sm:$0xff] %v4886_v1 }
 0x5cb   :  { %6476 = shalt.err (!%p6473_p3)
}
 0x5cc   :  { %4911 = dma.vmem_to_hbm [thread:$0]  %s4906_s20, 1536, %s7488_s12, [#allocation4], %s6505_s13, %s6505_s13, %s6506_s14  }
 0x5cd   :  { %6499 = dma.done.wait [#allocation4], 1536  }
 0x5ce   :  { %6500 = vsyncadd [#allocation4], 4294965760 }
 0x5cf   :  { %4915 = vsyncpa [#allocation3], 1 }
 0x5d0   :  { %4916 = vsyncpa [#allocation8], 1 }
 0x5d1   :  { %4917 = vsyncpa [#allocation11], 1 }
 0x5d2   :  { %4918 = vsyncpa [#allocation14], 1 }
 0x5d3   :  { %4919 = vsyncpa [#allocation17], 1 }
 0x5d4   :  { %4920 = vsyncpa [#allocation20], 1 }
 0x5d5   :  { %4921 = vsyncpa [#allocation4], 1 }
 0x5d6   :  { %4922 = vsyncpa [#allocation5], 1 }

</bundles_post_ra>
